<compile_context>
chip_gen: v7x
topology: tpu7x:2x2x1
jax: 0.10.0
libtpu: 0.0.40
codegen_flags: <defaults>
</compile_context>

<pallas_src>
import numpy as np
import jax
import jax.numpy as jnp
from jax.experimental import pallas as pl
from jax.experimental.pallas import tpu as pltpu


# ----------------------------------------------------------------------------
# Canonical layout bookkeeping
# ----------------------------------------------------------------------------
def _round_up(x, m):
    return ((x + m - 1) // m) * m


class _Layout:
    """Guarded, lane-padded flattened layout for one spatial resolution."""

    def __init__(self, H, W, B):
        self.H, self.W, self.B = H, W, B
        self.Hp, self.Wp = H + 2, W + 2
        self.Pp = self.Hp * self.Wp                      # padded positions per image
        self.G = W + 3                                   # >= max |tap shift| = (W+2)+1
        self.Mg = _round_up(B * self.Pp + 2 * self.G, 128)

    def col(self, b, y, x):
        return self.G + b * self.Pp + y * self.Wp + x


# ----------------------------------------------------------------------------
# Build-time (numpy) constant construction
# ----------------------------------------------------------------------------
def _interior_mask(L):
    m = np.zeros((1, L.Mg), np.float32)
    for b in range(L.B):
        for y in range(1, L.H + 1):
            c0 = L.col(b, y, 1)
            m[0, c0:c0 + L.W] = 1.0
    return m


def _stride2_gather(L_in, L_out):
    """0/1 matrix: full-resolution stride-1 conv output -> stride-2 conv output."""
    S = np.zeros((L_in.Mg, L_out.Mg), np.float32)
    for b in range(L_in.B):
        for y in range(1, L_out.H + 1):
            for x in range(1, L_out.W + 1):
                S[L_in.col(b, 2 * y - 1, 2 * x - 1), L_out.col(b, y, x)] = 1.0
    return S


def _avgpool_gather(L_in, L_out):
    """AvgPool2d(3, stride=2, pad=1, count_include_pad=True) as a constant matrix."""
    P = np.zeros((L_in.Mg, L_out.Mg), np.float32)
    for b in range(L_in.B):
        for y in range(1, L_out.H + 1):
            for x in range(1, L_out.W + 1):
                co = L_out.col(b, y, x)
                for ky in range(3):
                    for kx in range(3):
                        P[L_in.col(b, 2 * y - 2 + ky, 2 * x - 2 + kx), co] += 1.0 / 9.0
    return P


def _fold_coord_conv(w_full, gamma, beta, *, cin, cout, stride, L_in, L_out, eps=1e-5):
    """Fold BN(eval) scale into data-channel tap weights, and BN beta + coord-channel
    contribution into a per-output-position bias plane (canonical layout, zero borders)."""
    w_full = np.asarray(w_full, np.float64)              # (3,3,cin+2,cout)
    gamma = np.asarray(gamma, np.float64)
    beta = np.asarray(beta, np.float64)
    scale = gamma / np.sqrt(1.0 + eps)                   # running mean=0, var=1

    w_data = w_full[:, :, :cin, :]                       # data channels
    w_coord = w_full[:, :, cin:, :]                      # (3,3,2,cout) coord channels
    # (9, cout, cin), tap order t = ky*3+kx, BN scale folded in
    w_taps = np.transpose(w_data, (0, 1, 3, 2)).reshape(9, cout, cin) * scale[None, :, None]

    # AddCoords(rank=2): xx varies along W, yy along H, in [-1, 1] (DI-engine order),
    # computed on the (unpadded) conv input, zero in the conv's zero-padding ring.
    H, W = L_in.H, L_in.W
    Ho, Wo = L_out.H, L_out.W
    xx = 2.0 * np.arange(W) / max(W - 1, 1) - 1.0
    yy = 2.0 * np.arange(H) / max(H - 1, 1) - 1.0
    coordpad = np.zeros((H + 2, W + 2, 2))
    coordpad[1:-1, 1:-1, 0] = xx[None, :]
    coordpad[1:-1, 1:-1, 1] = yy[:, None]
    cb = np.zeros((Ho, Wo, cout))
    for ky in range(3):
        for kx in range(3):
            win = coordpad[ky:ky + (Ho - 1) * stride + 1:stride,
                           kx:kx + (Wo - 1) * stride + 1:stride, :]       # (Ho,Wo,2)
            cb += win @ w_coord[ky, kx]                                   # (2,cout)
    plane_int = cb * scale[None, None, :] + beta[None, None, :]           # (Ho,Wo,cout)

    plane = np.zeros((cout, L_out.Mg), np.float32)
    for b in range(L_out.B):
        for y in range(1, Ho + 1):
            c0 = L_out.col(b, y, 1)
            plane[:, c0:c0 + Wo] = plane_int[y - 1].T
    return w_taps.astype(np.float32), plane


def _conv_bn_raw(key, cin_with_coords, cout):
    kw, kg, kb = jax.random.split(key, 3)
    fan_in = 9 * cin_with_coords
    w = jax.random.normal(kw, (3, 3, cin_with_coords, cout), jnp.float32) / np.sqrt(fan_in)
    gamma = 1.0 + 0.1 * jax.random.normal(kg, (cout,), jnp.float32)
    beta = 0.1 * jax.random.normal(kb, (cout,), jnp.float32)
    return w, gamma, beta


def build_network(key, observation_shape, out_channels, batch):
    """Synthesize deterministic parameters and pre-fold everything the kernel needs."""
    obs_c, obs_h, obs_w = observation_shape
    assert obs_h % 16 == 0 and obs_w % 16 == 0, "spatial dims must be divisible by 16"
    half = out_channels // 2

    L_in = _Layout(obs_h, obs_w, batch)
    L_s2 = _Layout(obs_h // 2, obs_w // 2, batch)
    L_s4 = _Layout(obs_h // 4, obs_w // 4, batch)
    L_s8 = _Layout(obs_h // 8, obs_w // 8, batch)
    L_s16 = _Layout(obs_h // 16, obs_w // 16, batch)

    convs = [
        ("stem",  obs_c, half,         2, L_in, L_s2),
        ("rb1c1", half,  half,         1, L_s2, L_s2),
        ("rb1c2", half,  half,         1, L_s2, L_s2),
        ("dc1",   half,  out_channels, 2, L_s2, L_s4),
        ("dc3",   half,  out_channels, 2, L_s2, L_s4),
        ("dc2",   out_channels, out_channels, 1, L_s4, L_s4),
        ("rb2c1", out_channels, out_channels, 1, L_s4, L_s4),
        ("rb2c2", out_channels, out_channels, 1, L_s4, L_s4),
        ("rb3c1", out_channels, out_channels, 1, L_s8, L_s8),
        ("rb3c2", out_channels, out_channels, 1, L_s8, L_s8),
    ]
    keys = jax.random.split(key, len(convs))

    consts = {}
    for k, (name, cin, cout, stride, li, lo) in zip(keys, convs):
        w, g, b = _conv_bn_raw(k, cin + 2, cout)
        w_taps, plane = _fold_coord_conv(
            w, g, b, cin=cin, cout=cout, stride=stride, L_in=li, L_out=lo)
        consts[name + "_w"] = jnp.asarray(w_taps)          # (9, cout, cin), BN scale folded
        consts[name + "_b"] = jnp.asarray(plane)           # (cout, Mg_out), BN beta + coords

    use_pool2 = observation_shape[1] != 64
    L_final = L_s16 if use_pool2 else L_s8

    consts["S_stem"] = jnp.asarray(_stride2_gather(L_in, L_s2))
    consts["S_down"] = jnp.asarray(_stride2_gather(L_s2, L_s4))
    consts["pool1"] = jnp.asarray(_avgpool_gather(L_s4, L_s8))
    if use_pool2:
        consts["pool2"] = jnp.asarray(_avgpool_gather(L_s8, L_s16))
    consts["mask_s2"] = jnp.asarray(_interior_mask(L_s2))
    consts["mask_s4"] = jnp.asarray(_interior_mask(L_s4))
    consts["mask_s8"] = jnp.asarray(_interior_mask(L_s8))

    flops = 0
    for (_, cin, cout, stride, li, lo) in convs:
        flops += 2 * 9 * cin * cout * li.Mg
        if stride == 2:
            flops += 2 * cout * li.Mg * lo.Mg
    flops += 2 * out_channels * L_s4.Mg * L_s8.Mg
    if use_pool2:
        flops += 2 * out_channels * L_s8.Mg * L_s16.Mg

    cfg = dict(B=batch, out_channels=out_channels, use_pool2=use_pool2, flops=int(flops),
               L_in=L_in, L_s2=L_s2, L_s4=L_s4, L_s8=L_s8, L_final=L_final)
    return consts, cfg


# ----------------------------------------------------------------------------
# The single fused Pallas kernel
# ----------------------------------------------------------------------------
def _make_kernel(cfg, treedef, compute_dtype):
    Wp_in, Wp_s2, Wp_s4, Wp_s8 = (cfg["L_in"].Wp, cfg["L_s2"].Wp,
                                  cfg["L_s4"].Wp, cfg["L_s8"].Wp)
    use_pool2 = cfg["use_pool2"]

    def kernel(x_ref, *rest):
        c_refs, o_ref = rest[:-1], rest[-1]
        C = jax.tree_util.tree_unflatten(treedef, list(c_refs))

        # hoisted shared constants (loaded once, reused across layers)
        m2 = C["mask_s2"][...]
        m4 = C["mask_s4"][...]
        m8 = C["mask_s8"][...]
        s_stem = C["S_stem"][...]
        s_down = C["S_down"][...]

        def conv(x, name, Wp, *, relu, mask, gather=None, residual=None):
            """3x3 CoordConv + folded BN; stride-2 handled via a constant gather matmul."""
            w = C[name + "_w"][...]                        # (9, cout, cin)
            bias = C[name + "_b"][...]                     # (cout, Mg_out)
            Mg = x.shape[1]
            acc = None
            for ky in range(3):
                for kx in range(3):
                    d = (ky - 1) * Wp + (kx - 1)
                    xt = x if d == 0 else pltpu.roll(x, shift=(-d) % Mg, axis=1)
                    part = jnp.dot(w[ky * 3 + kx].astype(compute_dtype),
                                   xt.astype(compute_dtype),
                                   preferred_element_type=jnp.float32)
                    acc = part if acc is None else acc + part
            if gather is not None:                         # stride-2: pick odd full-res columns
                acc = jnp.dot(acc, gather, preferred_element_type=jnp.float32)
            y = acc + bias                                 # BN beta + coord-channel plane
            if residual is not None:
                y = y + residual
            if relu:
                y = jnp.maximum(y, 0.0)
            return y * mask                                # re-zero padding / guard lanes

        x = x_ref[...].astype(jnp.float32)

        # conv1 + norm1 + activation (stride 2)
        h = conv(x, "stem", Wp_in, relu=True, gather=s_stem, mask=m2)
        # resblocks1 (basic)
        t = conv(h, "rb1c1", Wp_s2, relu=True, mask=m2)
        h = conv(t, "rb1c2", Wp_s2, relu=True, residual=h, mask=m2)
        # downsample block
        a = conv(h, "dc1", Wp_s2, relu=True, gather=s_down, mask=m4)
        idn = conv(h, "dc3", Wp_s2, relu=False, gather=s_down, mask=m4)
        h = conv(a, "dc2", Wp_s4, relu=True, residual=idn, mask=m4)
        # resblocks2 (basic)
        t = conv(h, "rb2c1", Wp_s4, relu=True, mask=m4)
        h = conv(t, "rb2c2", Wp_s4, relu=True, residual=h, mask=m4)
        # pooling1: AvgPool2d(3, 2, 1) as a constant VMEM gather matmul
        h = jnp.dot(h, C["pool1"][...], preferred_element_type=jnp.float32)
        # resblocks3 (basic)
        t = conv(h, "rb3c1", Wp_s8, relu=True, mask=m8)
        h = conv(t, "rb3c2", Wp_s8, relu=True, residual=h, mask=m8)
        # pooling2 (skipped iff observation width == 64)
        if use_pool2:
            h = jnp.dot(h, C["pool2"][...], preferred_element_type=jnp.float32)

        o_ref[...] = h.astype(o_ref.dtype)

    return kernel


def make_forward(cfg, compute_dtype=jnp.float32):
    """Returns forward(x_nchw, consts) -> (B, out_channels, Hf, Wf).
    Set compute_dtype=jnp.bfloat16 on v6e/v7x for realistic shapes."""
    B = cfg["B"]
    out_channels = cfg["out_channels"]
    L_in, L_final = cfg["L_in"], cfg["L_final"]

    def forward(x_nchw, consts):
        # --- plain-JAX prolog: NCHW -> canonical guarded (C, Mg) layout (one-time, tiny)
        Cin = x_nchw.shape[1]
        xp = jnp.pad(x_nchw.astype(jnp.float32), ((0, 0), (0, 0), (1, 1), (1, 1)))
        flat = jnp.transpose(xp, (1, 0, 2, 3)).reshape(Cin, B * L_in.Pp)
        pad_l = jnp.zeros((Cin, L_in.G), jnp.float32)
        pad_r = jnp.zeros((Cin, L_in.Mg - L_in.G - B * L_in.Pp), jnp.float32)
        x_canon = jnp.concatenate([pad_l, flat, pad_r], axis=1)

        flat_consts, treedef = jax.tree_util.tree_flatten(consts)
        kernel = _make_kernel(cfg, treedef, compute_dtype)
        inputs = [x_canon] + list(flat_consts)

        out_bytes = out_channels * L_final.Mg * 4
        in_bytes = int(sum(a.size * a.dtype.itemsize for a in inputs))
        cost = pl.CostEstimate(flops=cfg["flops"], transcendentals=0,
                               bytes_accessed=in_bytes + out_bytes)

        out_canon = pl.pallas_call(
            kernel,
            grid=(1,),
            in_specs=[pl.BlockSpec(tuple(a.shape), lambda i, nd=a.ndim: (0,) * nd)
                      for a in inputs],
            out_specs=pl.BlockSpec((out_channels, L_final.Mg), lambda i: (0, 0)),
            out_shape=jax.ShapeDtypeStruct((out_channels, L_final.Mg), jnp.float32),
            compiler_params=pltpu.CompilerParams(
                dimension_semantics=("arbitrary",),
                vmem_limit_bytes=32 * 1024 * 1024,
            ),
            cost_estimate=cost,
        )(*inputs)

        # --- plain-JAX epilog: canonical -> NCHW
        Hf, Wf = L_final.H, L_final.W
        dat = out_canon[:, L_final.G:L_final.G + B * L_final.Pp]
        dat = dat.reshape(out_channels, B, Hf + 2, Wf + 2)[:, :, 1:Hf + 1, 1:Wf + 1]
        return jnp.transpose(dat, (1, 0, 2, 3))

    return forward


# ----------------------------------------------------------------------------
if __name__ == "__main__":
    observation_shape = (4, 16, 16)   # (C, W, H)
    out_channels = 8
    batch = 2

    key = jax.random.PRNGKey(0)
    k_params, k_x = jax.random.split(key)
    consts, cfg = build_network(k_params, observation_shape, out_channels, batch)
    x = jax.random.normal(
        k_x,
        (batch, observation_shape[0], observation_shape[1], observation_shape[2]),
        dtype=jnp.float32)

    fwd = jax.jit(make_forward(cfg))
    out = fwd(x, consts)
    jax.block_until_ready(out)

    # 16 -> conv1(s2) -> 8 -> downsample -> 4 -> pool1 -> 2 -> pool2 -> 1
    assert out.shape == (batch, out_channels, 1, 1), out.shape
    assert bool(jnp.all(jnp.isfinite(out)))
    print("KERNEL_OK")
</pallas_src>

<mosaic_0001>
module attributes {stable_mosaic.version = 11 : i64} {
  func.func @kernel(%arg0: i32, %arg1: memref<4x768xf32, #tpu.memory_space<vmem>>, %arg2: memref<256x128xf32, #tpu.memory_space<vmem>>, %arg3: memref<768x256xf32, #tpu.memory_space<vmem>>, %arg4: memref<8x128xf32, #tpu.memory_space<vmem>>, %arg5: memref<9x8x4xf32, #tpu.memory_space<vmem>>, %arg6: memref<8x128xf32, #tpu.memory_space<vmem>>, %arg7: memref<9x8x8xf32, #tpu.memory_space<vmem>>, %arg8: memref<8x128xf32, #tpu.memory_space<vmem>>, %arg9: memref<9x8x4xf32, #tpu.memory_space<vmem>>, %arg10: memref<1x256xf32, #tpu.memory_space<vmem>>, %arg11: memref<1x128xf32, #tpu.memory_space<vmem>>, %arg12: memref<1x128xf32, #tpu.memory_space<vmem>>, %arg13: memref<128x128xf32, #tpu.memory_space<vmem>>, %arg14: memref<128x128xf32, #tpu.memory_space<vmem>>, %arg15: memref<4x256xf32, #tpu.memory_space<vmem>>, %arg16: memref<9x4x4xf32, #tpu.memory_space<vmem>>, %arg17: memref<4x256xf32, #tpu.memory_space<vmem>>, %arg18: memref<9x4x4xf32, #tpu.memory_space<vmem>>, %arg19: memref<8x128xf32, #tpu.memory_space<vmem>>, %arg20: memref<9x8x8xf32, #tpu.memory_space<vmem>>, %arg21: memref<8x128xf32, #tpu.memory_space<vmem>>, %arg22: memref<9x8x8xf32, #tpu.memory_space<vmem>>, %arg23: memref<8x128xf32, #tpu.memory_space<vmem>>, %arg24: memref<9x8x8xf32, #tpu.memory_space<vmem>>, %arg25: memref<8x128xf32, #tpu.memory_space<vmem>>, %arg26: memref<9x8x8xf32, #tpu.memory_space<vmem>>, %arg27: memref<4x256xf32, #tpu.memory_space<vmem>>, %arg28: memref<9x4x4xf32, #tpu.memory_space<vmem>>, %arg29: memref<8x128xf32, #tpu.memory_space<vmem>>) attributes {dimension_semantics = [#tpu.dimension_semantics<arbitrary>], iteration_bounds = array<i64: 1>, scalar_prefetch = 0 : i64, scratch_operands = 0 : i64, tpu.core_type = #tpu.core_type<tc>, window_params = [{pipeline_mode = #tpu.pipeline_mode<synchronous>, transform_indices = @transform_0, window_bounds = array<i64: 4, 768>}, {pipeline_mode = #tpu.pipeline_mode<synchronous>, transform_indices = @transform_1, window_bounds = array<i64: 256, 128>}, {pipeline_mode = #tpu.pipeline_mode<synchronous>, transform_indices = @transform_2, window_bounds = array<i64: 768, 256>}, {pipeline_mode = #tpu.pipeline_mode<synchronous>, transform_indices = @transform_3, window_bounds = array<i64: 8, 128>}, {pipeline_mode = #tpu.pipeline_mode<synchronous>, transform_indices = @transform_4, window_bounds = array<i64: 9, 8, 4>}, {pipeline_mode = #tpu.pipeline_mode<synchronous>, transform_indices = @transform_5, window_bounds = array<i64: 8, 128>}, {pipeline_mode = #tpu.pipeline_mode<synchronous>, transform_indices = @transform_6, window_bounds = array<i64: 9, 8, 8>}, {pipeline_mode = #tpu.pipeline_mode<synchronous>, transform_indices = @transform_7, window_bounds = array<i64: 8, 128>}, {pipeline_mode = #tpu.pipeline_mode<synchronous>, transform_indices = @transform_8, window_bounds = array<i64: 9, 8, 4>}, {pipeline_mode = #tpu.pipeline_mode<synchronous>, transform_indices = @transform_9, window_bounds = array<i64: 1, 256>}, {pipeline_mode = #tpu.pipeline_mode<synchronous>, transform_indices = @transform_10, window_bounds = array<i64: 1, 128>}, {pipeline_mode = #tpu.pipeline_mode<synchronous>, transform_indices = @transform_11, window_bounds = array<i64: 1, 128>}, {pipeline_mode = #tpu.pipeline_mode<synchronous>, transform_indices = @transform_12, window_bounds = array<i64: 128, 128>}, {pipeline_mode = #tpu.pipeline_mode<synchronous>, transform_indices = @transform_13, window_bounds = array<i64: 128, 128>}, {pipeline_mode = #tpu.pipeline_mode<synchronous>, transform_indices = @transform_14, window_bounds = array<i64: 4, 256>}, {pipeline_mode = #tpu.pipeline_mode<synchronous>, transform_indices = @transform_15, window_bounds = array<i64: 9, 4, 4>}, {pipeline_mode = #tpu.pipeline_mode<synchronous>, transform_indices = @transform_16, window_bounds = array<i64: 4, 256>}, {pipeline_mode = #tpu.pipeline_mode<synchronous>, transform_indices = @transform_17, window_bounds = array<i64: 9, 4, 4>}, {pipeline_mode = #tpu.pipeline_mode<synchronous>, transform_indices = @transform_18, window_bounds = array<i64: 8, 128>}, {pipeline_mode = #tpu.pipeline_mode<synchronous>, transform_indices = @transform_19, window_bounds = array<i64: 9, 8, 8>}, {pipeline_mode = #tpu.pipeline_mode<synchronous>, transform_indices = @transform_20, window_bounds = array<i64: 8, 128>}, {pipeline_mode = #tpu.pipeline_mode<synchronous>, transform_indices = @transform_21, window_bounds = array<i64: 9, 8, 8>}, {pipeline_mode = #tpu.pipeline_mode<synchronous>, transform_indices = @transform_22, window_bounds = array<i64: 8, 128>}, {pipeline_mode = #tpu.pipeline_mode<synchronous>, transform_indices = @transform_23, window_bounds = array<i64: 9, 8, 8>}, {pipeline_mode = #tpu.pipeline_mode<synchronous>, transform_indices = @transform_24, window_bounds = array<i64: 8, 128>}, {pipeline_mode = #tpu.pipeline_mode<synchronous>, transform_indices = @transform_25, window_bounds = array<i64: 9, 8, 8>}, {pipeline_mode = #tpu.pipeline_mode<synchronous>, transform_indices = @transform_26, window_bounds = array<i64: 4, 256>}, {pipeline_mode = #tpu.pipeline_mode<synchronous>, transform_indices = @transform_27, window_bounds = array<i64: 9, 4, 4>}, {pipeline_mode = #tpu.pipeline_mode<synchronous>, transform_indices = @transform_28, window_bounds = array<i64: 8, 128>}]} {
    %c0 = arith.constant 0 : index
    %c0_0 = arith.constant 0 : index
    %0 = vector.load %arg10[%c0, %c0_0] : memref<1x256xf32, #tpu.memory_space<vmem>>, vector<1x256xf32>
    %c0_1 = arith.constant 0 : index
    %c0_2 = arith.constant 0 : index
    %1 = vector.load %arg11[%c0_1, %c0_2] : memref<1x128xf32, #tpu.memory_space<vmem>>, vector<1x128xf32>
    %c0_3 = arith.constant 0 : index
    %c0_4 = arith.constant 0 : index
    %2 = vector.load %arg12[%c0_3, %c0_4] : memref<1x128xf32, #tpu.memory_space<vmem>>, vector<1x128xf32>
    %c0_5 = arith.constant 0 : index
    %c0_6 = arith.constant 0 : index
    %3 = vector.load %arg3[%c0_5, %c0_6] : memref<768x256xf32, #tpu.memory_space<vmem>>, vector<768x256xf32>
    %c0_7 = arith.constant 0 : index
    %c0_8 = arith.constant 0 : index
    %4 = vector.load %arg2[%c0_7, %c0_8] : memref<256x128xf32, #tpu.memory_space<vmem>>, vector<256x128xf32>
    %c0_9 = arith.constant 0 : index
    %c0_10 = arith.constant 0 : index
    %5 = vector.load %arg1[%c0_9, %c0_10] : memref<4x768xf32, #tpu.memory_space<vmem>>, vector<4x768xf32>
    %c0_11 = arith.constant 0 : index
    %c0_12 = arith.constant 0 : index
    %c0_13 = arith.constant 0 : index
    %6 = vector.load %arg28[%c0_11, %c0_12, %c0_13] : memref<9x4x4xf32, #tpu.memory_space<vmem>>, vector<9x4x4xf32>
    %c0_14 = arith.constant 0 : index
    %c0_15 = arith.constant 0 : index
    %7 = vector.load %arg27[%c0_14, %c0_15] : memref<4x256xf32, #tpu.memory_space<vmem>>, vector<4x256xf32>
    %c19_i32 = arith.constant 19 : i32
    %8 = tpu.dynamic_rotate %5 by %c19_i32 dim 1 : vector<4x768xf32>, i32 -> vector<4x768xf32>
    %9 = vector.extract_strided_slice %6 {offsets = [0, 0, 0], sizes = [1, 4, 4], strides = [1, 1, 1]} : vector<9x4x4xf32> to vector<1x4x4xf32>
    %10 = vector.shape_cast %9 : vector<1x4x4xf32> to vector<4x4xf32>
    %cst = arith.constant dense<0.000000e+00> : vector<4x768xf32>
    %11 = tpu.matmul %10, %8, %cst {dimension_numbers = #tpu.dot_dimension_numbers<[1], [0], [0], [1], [0, 0, 1, 1], [], []>} : vector<4x4xf32>, vector<4x768xf32>, vector<4x768xf32> -> vector<4x768xf32>
    %c18_i32 = arith.constant 18 : i32
    %12 = tpu.dynamic_rotate %5 by %c18_i32 dim 1 : vector<4x768xf32>, i32 -> vector<4x768xf32>
    %13 = vector.extract_strided_slice %6 {offsets = [1, 0, 0], sizes = [1, 4, 4], strides = [1, 1, 1]} : vector<9x4x4xf32> to vector<1x4x4xf32>
    %14 = vector.shape_cast %13 : vector<1x4x4xf32> to vector<4x4xf32>
    %cst_16 = arith.constant dense<0.000000e+00> : vector<4x768xf32>
    %15 = tpu.matmul %14, %12, %cst_16 {dimension_numbers = #tpu.dot_dimension_numbers<[1], [0], [0], [1], [0, 0, 1, 1], [], []>} : vector<4x4xf32>, vector<4x768xf32>, vector<4x768xf32> -> vector<4x768xf32>
    %16 = arith.addf %11, %15 : vector<4x768xf32>
    %c17_i32 = arith.constant 17 : i32
    %17 = tpu.dynamic_rotate %5 by %c17_i32 dim 1 : vector<4x768xf32>, i32 -> vector<4x768xf32>
    %18 = vector.extract_strided_slice %6 {offsets = [2, 0, 0], sizes = [1, 4, 4], strides = [1, 1, 1]} : vector<9x4x4xf32> to vector<1x4x4xf32>
    %19 = vector.shape_cast %18 : vector<1x4x4xf32> to vector<4x4xf32>
    %cst_17 = arith.constant dense<0.000000e+00> : vector<4x768xf32>
    %20 = tpu.matmul %19, %17, %cst_17 {dimension_numbers = #tpu.dot_dimension_numbers<[1], [0], [0], [1], [0, 0, 1, 1], [], []>} : vector<4x4xf32>, vector<4x768xf32>, vector<4x768xf32> -> vector<4x768xf32>
    %21 = arith.addf %16, %20 : vector<4x768xf32>
    %c1_i32 = arith.constant 1 : i32
    %22 = tpu.dynamic_rotate %5 by %c1_i32 dim 1 : vector<4x768xf32>, i32 -> vector<4x768xf32>
    %23 = vector.extract_strided_slice %6 {offsets = [3, 0, 0], sizes = [1, 4, 4], strides = [1, 1, 1]} : vector<9x4x4xf32> to vector<1x4x4xf32>
    %24 = vector.shape_cast %23 : vector<1x4x4xf32> to vector<4x4xf32>
    %cst_18 = arith.constant dense<0.000000e+00> : vector<4x768xf32>
    %25 = tpu.matmul %24, %22, %cst_18 {dimension_numbers = #tpu.dot_dimension_numbers<[1], [0], [0], [1], [0, 0, 1, 1], [], []>} : vector<4x4xf32>, vector<4x768xf32>, vector<4x768xf32> -> vector<4x768xf32>
    %26 = arith.addf %21, %25 : vector<4x768xf32>
    %27 = vector.extract_strided_slice %6 {offsets = [4, 0, 0], sizes = [1, 4, 4], strides = [1, 1, 1]} : vector<9x4x4xf32> to vector<1x4x4xf32>
    %28 = vector.shape_cast %27 : vector<1x4x4xf32> to vector<4x4xf32>
    %cst_19 = arith.constant dense<0.000000e+00> : vector<4x768xf32>
    %29 = tpu.matmul %28, %5, %cst_19 {dimension_numbers = #tpu.dot_dimension_numbers<[1], [0], [0], [1], [0, 0, 1, 1], [], []>} : vector<4x4xf32>, vector<4x768xf32>, vector<4x768xf32> -> vector<4x768xf32>
    %30 = arith.addf %26, %29 : vector<4x768xf32>
    %c767_i32 = arith.constant 767 : i32
    %31 = tpu.dynamic_rotate %5 by %c767_i32 dim 1 : vector<4x768xf32>, i32 -> vector<4x768xf32>
    %32 = vector.extract_strided_slice %6 {offsets = [5, 0, 0], sizes = [1, 4, 4], strides = [1, 1, 1]} : vector<9x4x4xf32> to vector<1x4x4xf32>
    %33 = vector.shape_cast %32 : vector<1x4x4xf32> to vector<4x4xf32>
    %cst_20 = arith.constant dense<0.000000e+00> : vector<4x768xf32>
    %34 = tpu.matmul %33, %31, %cst_20 {dimension_numbers = #tpu.dot_dimension_numbers<[1], [0], [0], [1], [0, 0, 1, 1], [], []>} : vector<4x4xf32>, vector<4x768xf32>, vector<4x768xf32> -> vector<4x768xf32>
    %35 = arith.addf %30, %34 : vector<4x768xf32>
    %c751_i32 = arith.constant 751 : i32
    %36 = tpu.dynamic_rotate %5 by %c751_i32 dim 1 : vector<4x768xf32>, i32 -> vector<4x768xf32>
    %37 = vector.extract_strided_slice %6 {offsets = [6, 0, 0], sizes = [1, 4, 4], strides = [1, 1, 1]} : vector<9x4x4xf32> to vector<1x4x4xf32>
    %38 = vector.shape_cast %37 : vector<1x4x4xf32> to vector<4x4xf32>
    %cst_21 = arith.constant dense<0.000000e+00> : vector<4x768xf32>
    %39 = tpu.matmul %38, %36, %cst_21 {dimension_numbers = #tpu.dot_dimension_numbers<[1], [0], [0], [1], [0, 0, 1, 1], [], []>} : vector<4x4xf32>, vector<4x768xf32>, vector<4x768xf32> -> vector<4x768xf32>
    %40 = arith.addf %35, %39 : vector<4x768xf32>
    %c750_i32 = arith.constant 750 : i32
    %41 = tpu.dynamic_rotate %5 by %c750_i32 dim 1 : vector<4x768xf32>, i32 -> vector<4x768xf32>
    %42 = vector.extract_strided_slice %6 {offsets = [7, 0, 0], sizes = [1, 4, 4], strides = [1, 1, 1]} : vector<9x4x4xf32> to vector<1x4x4xf32>
    %43 = vector.shape_cast %42 : vector<1x4x4xf32> to vector<4x4xf32>
    %cst_22 = arith.constant dense<0.000000e+00> : vector<4x768xf32>
    %44 = tpu.matmul %43, %41, %cst_22 {dimension_numbers = #tpu.dot_dimension_numbers<[1], [0], [0], [1], [0, 0, 1, 1], [], []>} : vector<4x4xf32>, vector<4x768xf32>, vector<4x768xf32> -> vector<4x768xf32>
    %45 = arith.addf %40, %44 : vector<4x768xf32>
    %c749_i32 = arith.constant 749 : i32
    %46 = tpu.dynamic_rotate %5 by %c749_i32 dim 1 : vector<4x768xf32>, i32 -> vector<4x768xf32>
    %47 = vector.extract_strided_slice %6 {offsets = [8, 0, 0], sizes = [1, 4, 4], strides = [1, 1, 1]} : vector<9x4x4xf32> to vector<1x4x4xf32>
    %48 = vector.shape_cast %47 : vector<1x4x4xf32> to vector<4x4xf32>
    %cst_23 = arith.constant dense<0.000000e+00> : vector<4x768xf32>
    %49 = tpu.matmul %48, %46, %cst_23 {dimension_numbers = #tpu.dot_dimension_numbers<[1], [0], [0], [1], [0, 0, 1, 1], [], []>} : vector<4x4xf32>, vector<4x768xf32>, vector<4x768xf32> -> vector<4x768xf32>
    %50 = arith.addf %45, %49 : vector<4x768xf32>
    %cst_24 = arith.constant dense<0.000000e+00> : vector<4x256xf32>
    %51 = tpu.matmul %50, %3, %cst_24 {dimension_numbers = #tpu.dot_dimension_numbers<[1], [0], [0], [1], [0, 0, 1, 1], [], []>} : vector<4x768xf32>, vector<768x256xf32>, vector<4x256xf32> -> vector<4x256xf32>
    %52 = arith.addf %51, %7 : vector<4x256xf32>
    %cst_25 = arith.constant 0.000000e+00 : f32
    %53 = vector.broadcast %cst_25 : f32 to vector<4x256xf32>
    %54 = arith.maximumf %52, %53 : vector<4x256xf32>
    %55 = vector.broadcast %0 : vector<1x256xf32> to vector<4x256xf32>
    %56 = arith.mulf %54, %55 : vector<4x256xf32>
    %c0_26 = arith.constant 0 : index
    %c0_27 = arith.constant 0 : index
    %c0_28 = arith.constant 0 : index
    %57 = vector.load %arg16[%c0_26, %c0_27, %c0_28] : memref<9x4x4xf32, #tpu.memory_space<vmem>>, vector<9x4x4xf32>
    %c0_29 = arith.constant 0 : index
    %c0_30 = arith.constant 0 : index
    %58 = vector.load %arg15[%c0_29, %c0_30] : memref<4x256xf32, #tpu.memory_space<vmem>>, vector<4x256xf32>
    %c11_i32 = arith.constant 11 : i32
    %59 = tpu.dynamic_rotate %56 by %c11_i32 dim 1 : vector<4x256xf32>, i32 -> vector<4x256xf32>
    %60 = vector.extract_strided_slice %57 {offsets = [0, 0, 0], sizes = [1, 4, 4], strides = [1, 1, 1]} : vector<9x4x4xf32> to vector<1x4x4xf32>
    %61 = vector.shape_cast %60 : vector<1x4x4xf32> to vector<4x4xf32>
    %cst_31 = arith.constant dense<0.000000e+00> : vector<4x256xf32>
    %62 = tpu.matmul %61, %59, %cst_31 {dimension_numbers = #tpu.dot_dimension_numbers<[1], [0], [0], [1], [0, 0, 1, 1], [], []>} : vector<4x4xf32>, vector<4x256xf32>, vector<4x256xf32> -> vector<4x256xf32>
    %c10_i32 = arith.constant 10 : i32
    %63 = tpu.dynamic_rotate %56 by %c10_i32 dim 1 : vector<4x256xf32>, i32 -> vector<4x256xf32>
    %64 = vector.extract_strided_slice %57 {offsets = [1, 0, 0], sizes = [1, 4, 4], strides = [1, 1, 1]} : vector<9x4x4xf32> to vector<1x4x4xf32>
    %65 = vector.shape_cast %64 : vector<1x4x4xf32> to vector<4x4xf32>
    %cst_32 = arith.constant dense<0.000000e+00> : vector<4x256xf32>
    %66 = tpu.matmul %65, %63, %cst_32 {dimension_numbers = #tpu.dot_dimension_numbers<[1], [0], [0], [1], [0, 0, 1, 1], [], []>} : vector<4x4xf32>, vector<4x256xf32>, vector<4x256xf32> -> vector<4x256xf32>
    %67 = arith.addf %62, %66 : vector<4x256xf32>
    %c9_i32 = arith.constant 9 : i32
    %68 = tpu.dynamic_rotate %56 by %c9_i32 dim 1 : vector<4x256xf32>, i32 -> vector<4x256xf32>
    %69 = vector.extract_strided_slice %57 {offsets = [2, 0, 0], sizes = [1, 4, 4], strides = [1, 1, 1]} : vector<9x4x4xf32> to vector<1x4x4xf32>
    %70 = vector.shape_cast %69 : vector<1x4x4xf32> to vector<4x4xf32>
    %cst_33 = arith.constant dense<0.000000e+00> : vector<4x256xf32>
    %71 = tpu.matmul %70, %68, %cst_33 {dimension_numbers = #tpu.dot_dimension_numbers<[1], [0], [0], [1], [0, 0, 1, 1], [], []>} : vector<4x4xf32>, vector<4x256xf32>, vector<4x256xf32> -> vector<4x256xf32>
    %72 = arith.addf %67, %71 : vector<4x256xf32>
    %c1_i32_34 = arith.constant 1 : i32
    %73 = tpu.dynamic_rotate %56 by %c1_i32_34 dim 1 : vector<4x256xf32>, i32 -> vector<4x256xf32>
    %74 = vector.extract_strided_slice %57 {offsets = [3, 0, 0], sizes = [1, 4, 4], strides = [1, 1, 1]} : vector<9x4x4xf32> to vector<1x4x4xf32>
    %75 = vector.shape_cast %74 : vector<1x4x4xf32> to vector<4x4xf32>
    %cst_35 = arith.constant dense<0.000000e+00> : vector<4x256xf32>
    %76 = tpu.matmul %75, %73, %cst_35 {dimension_numbers = #tpu.dot_dimension_numbers<[1], [0], [0], [1], [0, 0, 1, 1], [], []>} : vector<4x4xf32>, vector<4x256xf32>, vector<4x256xf32> -> vector<4x256xf32>
    %77 = arith.addf %72, %76 : vector<4x256xf32>
    %78 = vector.extract_strided_slice %57 {offsets = [4, 0, 0], sizes = [1, 4, 4], strides = [1, 1, 1]} : vector<9x4x4xf32> to vector<1x4x4xf32>
    %79 = vector.shape_cast %78 : vector<1x4x4xf32> to vector<4x4xf32>
    %cst_36 = arith.constant dense<0.000000e+00> : vector<4x256xf32>
    %80 = tpu.matmul %79, %56, %cst_36 {dimension_numbers = #tpu.dot_dimension_numbers<[1], [0], [0], [1], [0, 0, 1, 1], [], []>} : vector<4x4xf32>, vector<4x256xf32>, vector<4x256xf32> -> vector<4x256xf32>
    %81 = arith.addf %77, %80 : vector<4x256xf32>
    %c255_i32 = arith.constant 255 : i32
    %82 = tpu.dynamic_rotate %56 by %c255_i32 dim 1 : vector<4x256xf32>, i32 -> vector<4x256xf32>
    %83 = vector.extract_strided_slice %57 {offsets = [5, 0, 0], sizes = [1, 4, 4], strides = [1, 1, 1]} : vector<9x4x4xf32> to vector<1x4x4xf32>
    %84 = vector.shape_cast %83 : vector<1x4x4xf32> to vector<4x4xf32>
    %cst_37 = arith.constant dense<0.000000e+00> : vector<4x256xf32>
    %85 = tpu.matmul %84, %82, %cst_37 {dimension_numbers = #tpu.dot_dimension_numbers<[1], [0], [0], [1], [0, 0, 1, 1], [], []>} : vector<4x4xf32>, vector<4x256xf32>, vector<4x256xf32> -> vector<4x256xf32>
    %86 = arith.addf %81, %85 : vector<4x256xf32>
    %c247_i32 = arith.constant 247 : i32
    %87 = tpu.dynamic_rotate %56 by %c247_i32 dim 1 : vector<4x256xf32>, i32 -> vector<4x256xf32>
    %88 = vector.extract_strided_slice %57 {offsets = [6, 0, 0], sizes = [1, 4, 4], strides = [1, 1, 1]} : vector<9x4x4xf32> to vector<1x4x4xf32>
    %89 = vector.shape_cast %88 : vector<1x4x4xf32> to vector<4x4xf32>
    %cst_38 = arith.constant dense<0.000000e+00> : vector<4x256xf32>
    %90 = tpu.matmul %89, %87, %cst_38 {dimension_numbers = #tpu.dot_dimension_numbers<[1], [0], [0], [1], [0, 0, 1, 1], [], []>} : vector<4x4xf32>, vector<4x256xf32>, vector<4x256xf32> -> vector<4x256xf32>
    %91 = arith.addf %86, %90 : vector<4x256xf32>
    %c246_i32 = arith.constant 246 : i32
    %92 = tpu.dynamic_rotate %56 by %c246_i32 dim 1 : vector<4x256xf32>, i32 -> vector<4x256xf32>
    %93 = vector.extract_strided_slice %57 {offsets = [7, 0, 0], sizes = [1, 4, 4], strides = [1, 1, 1]} : vector<9x4x4xf32> to vector<1x4x4xf32>
    %94 = vector.shape_cast %93 : vector<1x4x4xf32> to vector<4x4xf32>
    %cst_39 = arith.constant dense<0.000000e+00> : vector<4x256xf32>
    %95 = tpu.matmul %94, %92, %cst_39 {dimension_numbers = #tpu.dot_dimension_numbers<[1], [0], [0], [1], [0, 0, 1, 1], [], []>} : vector<4x4xf32>, vector<4x256xf32>, vector<4x256xf32> -> vector<4x256xf32>
    %96 = arith.addf %91, %95 : vector<4x256xf32>
    %c245_i32 = arith.constant 245 : i32
    %97 = tpu.dynamic_rotate %56 by %c245_i32 dim 1 : vector<4x256xf32>, i32 -> vector<4x256xf32>
    %98 = vector.extract_strided_slice %57 {offsets = [8, 0, 0], sizes = [1, 4, 4], strides = [1, 1, 1]} : vector<9x4x4xf32> to vector<1x4x4xf32>
    %99 = vector.shape_cast %98 : vector<1x4x4xf32> to vector<4x4xf32>
    %cst_40 = arith.constant dense<0.000000e+00> : vector<4x256xf32>
    %100 = tpu.matmul %99, %97, %cst_40 {dimension_numbers = #tpu.dot_dimension_numbers<[1], [0], [0], [1], [0, 0, 1, 1], [], []>} : vector<4x4xf32>, vector<4x256xf32>, vector<4x256xf32> -> vector<4x256xf32>
    %101 = arith.addf %96, %100 : vector<4x256xf32>
    %102 = arith.addf %101, %58 : vector<4x256xf32>
    %cst_41 = arith.constant 0.000000e+00 : f32
    %103 = vector.broadcast %cst_41 : f32 to vector<4x256xf32>
    %104 = arith.maximumf %102, %103 : vector<4x256xf32>
    %105 = vector.broadcast %0 : vector<1x256xf32> to vector<4x256xf32>
    %106 = arith.mulf %104, %105 : vector<4x256xf32>
    %c0_42 = arith.constant 0 : index
    %c0_43 = arith.constant 0 : index
    %c0_44 = arith.constant 0 : index
    %107 = vector.load %arg18[%c0_42, %c0_43, %c0_44] : memref<9x4x4xf32, #tpu.memory_space<vmem>>, vector<9x4x4xf32>
    %c0_45 = arith.constant 0 : index
    %c0_46 = arith.constant 0 : index
    %108 = vector.load %arg17[%c0_45, %c0_46] : memref<4x256xf32, #tpu.memory_space<vmem>>, vector<4x256xf32>
    %c11_i32_47 = arith.constant 11 : i32
    %109 = tpu.dynamic_rotate %106 by %c11_i32_47 dim 1 : vector<4x256xf32>, i32 -> vector<4x256xf32>
    %110 = vector.extract_strided_slice %107 {offsets = [0, 0, 0], sizes = [1, 4, 4], strides = [1, 1, 1]} : vector<9x4x4xf32> to vector<1x4x4xf32>
    %111 = vector.shape_cast %110 : vector<1x4x4xf32> to vector<4x4xf32>
    %cst_48 = arith.constant dense<0.000000e+00> : vector<4x256xf32>
    %112 = tpu.matmul %111, %109, %cst_48 {dimension_numbers = #tpu.dot_dimension_numbers<[1], [0], [0], [1], [0, 0, 1, 1], [], []>} : vector<4x4xf32>, vector<4x256xf32>, vector<4x256xf32> -> vector<4x256xf32>
    %c10_i32_49 = arith.constant 10 : i32
    %113 = tpu.dynamic_rotate %106 by %c10_i32_49 dim 1 : vector<4x256xf32>, i32 -> vector<4x256xf32>
    %114 = vector.extract_strided_slice %107 {offsets = [1, 0, 0], sizes = [1, 4, 4], strides = [1, 1, 1]} : vector<9x4x4xf32> to vector<1x4x4xf32>
    %115 = vector.shape_cast %114 : vector<1x4x4xf32> to vector<4x4xf32>
    %cst_50 = arith.constant dense<0.000000e+00> : vector<4x256xf32>
    %116 = tpu.matmul %115, %113, %cst_50 {dimension_numbers = #tpu.dot_dimension_numbers<[1], [0], [0], [1], [0, 0, 1, 1], [], []>} : vector<4x4xf32>, vector<4x256xf32>, vector<4x256xf32> -> vector<4x256xf32>
    %117 = arith.addf %112, %116 : vector<4x256xf32>
    %c9_i32_51 = arith.constant 9 : i32
    %118 = tpu.dynamic_rotate %106 by %c9_i32_51 dim 1 : vector<4x256xf32>, i32 -> vector<4x256xf32>
    %119 = vector.extract_strided_slice %107 {offsets = [2, 0, 0], sizes = [1, 4, 4], strides = [1, 1, 1]} : vector<9x4x4xf32> to vector<1x4x4xf32>
    %120 = vector.shape_cast %119 : vector<1x4x4xf32> to vector<4x4xf32>
    %cst_52 = arith.constant dense<0.000000e+00> : vector<4x256xf32>
    %121 = tpu.matmul %120, %118, %cst_52 {dimension_numbers = #tpu.dot_dimension_numbers<[1], [0], [0], [1], [0, 0, 1, 1], [], []>} : vector<4x4xf32>, vector<4x256xf32>, vector<4x256xf32> -> vector<4x256xf32>
    %122 = arith.addf %117, %121 : vector<4x256xf32>
    %c1_i32_53 = arith.constant 1 : i32
    %123 = tpu.dynamic_rotate %106 by %c1_i32_53 dim 1 : vector<4x256xf32>, i32 -> vector<4x256xf32>
    %124 = vector.extract_strided_slice %107 {offsets = [3, 0, 0], sizes = [1, 4, 4], strides = [1, 1, 1]} : vector<9x4x4xf32> to vector<1x4x4xf32>
    %125 = vector.shape_cast %124 : vector<1x4x4xf32> to vector<4x4xf32>
    %cst_54 = arith.constant dense<0.000000e+00> : vector<4x256xf32>
    %126 = tpu.matmul %125, %123, %cst_54 {dimension_numbers = #tpu.dot_dimension_numbers<[1], [0], [0], [1], [0, 0, 1, 1], [], []>} : vector<4x4xf32>, vector<4x256xf32>, vector<4x256xf32> -> vector<4x256xf32>
    %127 = arith.addf %122, %126 : vector<4x256xf32>
    %128 = vector.extract_strided_slice %107 {offsets = [4, 0, 0], sizes = [1, 4, 4], strides = [1, 1, 1]} : vector<9x4x4xf32> to vector<1x4x4xf32>
    %129 = vector.shape_cast %128 : vector<1x4x4xf32> to vector<4x4xf32>
    %cst_55 = arith.constant dense<0.000000e+00> : vector<4x256xf32>
    %130 = tpu.matmul %129, %106, %cst_55 {dimension_numbers = #tpu.dot_dimension_numbers<[1], [0], [0], [1], [0, 0, 1, 1], [], []>} : vector<4x4xf32>, vector<4x256xf32>, vector<4x256xf32> -> vector<4x256xf32>
    %131 = arith.addf %127, %130 : vector<4x256xf32>
    %c255_i32_56 = arith.constant 255 : i32
    %132 = tpu.dynamic_rotate %106 by %c255_i32_56 dim 1 : vector<4x256xf32>, i32 -> vector<4x256xf32>
    %133 = vector.extract_strided_slice %107 {offsets = [5, 0, 0], sizes = [1, 4, 4], strides = [1, 1, 1]} : vector<9x4x4xf32> to vector<1x4x4xf32>
    %134 = vector.shape_cast %133 : vector<1x4x4xf32> to vector<4x4xf32>
    %cst_57 = arith.constant dense<0.000000e+00> : vector<4x256xf32>
    %135 = tpu.matmul %134, %132, %cst_57 {dimension_numbers = #tpu.dot_dimension_numbers<[1], [0], [0], [1], [0, 0, 1, 1], [], []>} : vector<4x4xf32>, vector<4x256xf32>, vector<4x256xf32> -> vector<4x256xf32>
    %136 = arith.addf %131, %135 : vector<4x256xf32>
    %c247_i32_58 = arith.constant 247 : i32
    %137 = tpu.dynamic_rotate %106 by %c247_i32_58 dim 1 : vector<4x256xf32>, i32 -> vector<4x256xf32>
    %138 = vector.extract_strided_slice %107 {offsets = [6, 0, 0], sizes = [1, 4, 4], strides = [1, 1, 1]} : vector<9x4x4xf32> to vector<1x4x4xf32>
    %139 = vector.shape_cast %138 : vector<1x4x4xf32> to vector<4x4xf32>
    %cst_59 = arith.constant dense<0.000000e+00> : vector<4x256xf32>
    %140 = tpu.matmul %139, %137, %cst_59 {dimension_numbers = #tpu.dot_dimension_numbers<[1], [0], [0], [1], [0, 0, 1, 1], [], []>} : vector<4x4xf32>, vector<4x256xf32>, vector<4x256xf32> -> vector<4x256xf32>
    %141 = arith.addf %136, %140 : vector<4x256xf32>
    %c246_i32_60 = arith.constant 246 : i32
    %142 = tpu.dynamic_rotate %106 by %c246_i32_60 dim 1 : vector<4x256xf32>, i32 -> vector<4x256xf32>
    %143 = vector.extract_strided_slice %107 {offsets = [7, 0, 0], sizes = [1, 4, 4], strides = [1, 1, 1]} : vector<9x4x4xf32> to vector<1x4x4xf32>
    %144 = vector.shape_cast %143 : vector<1x4x4xf32> to vector<4x4xf32>
    %cst_61 = arith.constant dense<0.000000e+00> : vector<4x256xf32>
    %145 = tpu.matmul %144, %142, %cst_61 {dimension_numbers = #tpu.dot_dimension_numbers<[1], [0], [0], [1], [0, 0, 1, 1], [], []>} : vector<4x4xf32>, vector<4x256xf32>, vector<4x256xf32> -> vector<4x256xf32>
    %146 = arith.addf %141, %145 : vector<4x256xf32>
    %c245_i32_62 = arith.constant 245 : i32
    %147 = tpu.dynamic_rotate %106 by %c245_i32_62 dim 1 : vector<4x256xf32>, i32 -> vector<4x256xf32>
    %148 = vector.extract_strided_slice %107 {offsets = [8, 0, 0], sizes = [1, 4, 4], strides = [1, 1, 1]} : vector<9x4x4xf32> to vector<1x4x4xf32>
    %149 = vector.shape_cast %148 : vector<1x4x4xf32> to vector<4x4xf32>
    %cst_63 = arith.constant dense<0.000000e+00> : vector<4x256xf32>
    %150 = tpu.matmul %149, %147, %cst_63 {dimension_numbers = #tpu.dot_dimension_numbers<[1], [0], [0], [1], [0, 0, 1, 1], [], []>} : vector<4x4xf32>, vector<4x256xf32>, vector<4x256xf32> -> vector<4x256xf32>
    %151 = arith.addf %146, %150 : vector<4x256xf32>
    %152 = arith.addf %151, %108 : vector<4x256xf32>
    %153 = arith.addf %152, %56 : vector<4x256xf32>
    %cst_64 = arith.constant 0.000000e+00 : f32
    %154 = vector.broadcast %cst_64 : f32 to vector<4x256xf32>
    %155 = arith.maximumf %153, %154 : vector<4x256xf32>
    %156 = vector.broadcast %0 : vector<1x256xf32> to vector<4x256xf32>
    %157 = arith.mulf %155, %156 : vector<4x256xf32>
    %c0_65 = arith.constant 0 : index
    %c0_66 = arith.constant 0 : index
    %c0_67 = arith.constant 0 : index
    %158 = vector.load %arg5[%c0_65, %c0_66, %c0_67] : memref<9x8x4xf32, #tpu.memory_space<vmem>>, vector<9x8x4xf32>
    %c0_68 = arith.constant 0 : index
    %c0_69 = arith.constant 0 : index
    %159 = vector.load %arg4[%c0_68, %c0_69] : memref<8x128xf32, #tpu.memory_space<vmem>>, vector<8x128xf32>
    %c11_i32_70 = arith.constant 11 : i32
    %160 = tpu.dynamic_rotate %157 by %c11_i32_70 dim 1 : vector<4x256xf32>, i32 -> vector<4x256xf32>
    %161 = vector.extract_strided_slice %158 {offsets = [0, 0, 0], sizes = [1, 8, 4], strides = [1, 1, 1]} : vector<9x8x4xf32> to vector<1x8x4xf32>
    %162 = vector.shape_cast %161 : vector<1x8x4xf32> to vector<8x4xf32>
    %cst_71 = arith.constant dense<0.000000e+00> : vector<8x256xf32>
    %163 = tpu.matmul %162, %160, %cst_71 {dimension_numbers = #tpu.dot_dimension_numbers<[1], [0], [0], [1], [0, 0, 1, 1], [], []>} : vector<8x4xf32>, vector<4x256xf32>, vector<8x256xf32> -> vector<8x256xf32>
    %c10_i32_72 = arith.constant 10 : i32
    %164 = tpu.dynamic_rotate %157 by %c10_i32_72 dim 1 : vector<4x256xf32>, i32 -> vector<4x256xf32>
    %165 = vector.extract_strided_slice %158 {offsets = [1, 0, 0], sizes = [1, 8, 4], strides = [1, 1, 1]} : vector<9x8x4xf32> to vector<1x8x4xf32>
    %166 = vector.shape_cast %165 : vector<1x8x4xf32> to vector<8x4xf32>
    %cst_73 = arith.constant dense<0.000000e+00> : vector<8x256xf32>
    %167 = tpu.matmul %166, %164, %cst_73 {dimension_numbers = #tpu.dot_dimension_numbers<[1], [0], [0], [1], [0, 0, 1, 1], [], []>} : vector<8x4xf32>, vector<4x256xf32>, vector<8x256xf32> -> vector<8x256xf32>
    %168 = arith.addf %163, %167 : vector<8x256xf32>
    %c9_i32_74 = arith.constant 9 : i32
    %169 = tpu.dynamic_rotate %157 by %c9_i32_74 dim 1 : vector<4x256xf32>, i32 -> vector<4x256xf32>
    %170 = vector.extract_strided_slice %158 {offsets = [2, 0, 0], sizes = [1, 8, 4], strides = [1, 1, 1]} : vector<9x8x4xf32> to vector<1x8x4xf32>
    %171 = vector.shape_cast %170 : vector<1x8x4xf32> to vector<8x4xf32>
    %cst_75 = arith.constant dense<0.000000e+00> : vector<8x256xf32>
    %172 = tpu.matmul %171, %169, %cst_75 {dimension_numbers = #tpu.dot_dimension_numbers<[1], [0], [0], [1], [0, 0, 1, 1], [], []>} : vector<8x4xf32>, vector<4x256xf32>, vector<8x256xf32> -> vector<8x256xf32>
    %173 = arith.addf %168, %172 : vector<8x256xf32>
    %c1_i32_76 = arith.constant 1 : i32
    %174 = tpu.dynamic_rotate %157 by %c1_i32_76 dim 1 : vector<4x256xf32>, i32 -> vector<4x256xf32>
    %175 = vector.extract_strided_slice %158 {offsets = [3, 0, 0], sizes = [1, 8, 4], strides = [1, 1, 1]} : vector<9x8x4xf32> to vector<1x8x4xf32>
    %176 = vector.shape_cast %175 : vector<1x8x4xf32> to vector<8x4xf32>
    %cst_77 = arith.constant dense<0.000000e+00> : vector<8x256xf32>
    %177 = tpu.matmul %176, %174, %cst_77 {dimension_numbers = #tpu.dot_dimension_numbers<[1], [0], [0], [1], [0, 0, 1, 1], [], []>} : vector<8x4xf32>, vector<4x256xf32>, vector<8x256xf32> -> vector<8x256xf32>
    %178 = arith.addf %173, %177 : vector<8x256xf32>
    %179 = vector.extract_strided_slice %158 {offsets = [4, 0, 0], sizes = [1, 8, 4], strides = [1, 1, 1]} : vector<9x8x4xf32> to vector<1x8x4xf32>
    %180 = vector.shape_cast %179 : vector<1x8x4xf32> to vector<8x4xf32>
    %cst_78 = arith.constant dense<0.000000e+00> : vector<8x256xf32>
    %181 = tpu.matmul %180, %157, %cst_78 {dimension_numbers = #tpu.dot_dimension_numbers<[1], [0], [0], [1], [0, 0, 1, 1], [], []>} : vector<8x4xf32>, vector<4x256xf32>, vector<8x256xf32> -> vector<8x256xf32>
    %182 = arith.addf %178, %181 : vector<8x256xf32>
    %c255_i32_79 = arith.constant 255 : i32
    %183 = tpu.dynamic_rotate %157 by %c255_i32_79 dim 1 : vector<4x256xf32>, i32 -> vector<4x256xf32>
    %184 = vector.extract_strided_slice %158 {offsets = [5, 0, 0], sizes = [1, 8, 4], strides = [1, 1, 1]} : vector<9x8x4xf32> to vector<1x8x4xf32>
    %185 = vector.shape_cast %184 : vector<1x8x4xf32> to vector<8x4xf32>
    %cst_80 = arith.constant dense<0.000000e+00> : vector<8x256xf32>
    %186 = tpu.matmul %185, %183, %cst_80 {dimension_numbers = #tpu.dot_dimension_numbers<[1], [0], [0], [1], [0, 0, 1, 1], [], []>} : vector<8x4xf32>, vector<4x256xf32>, vector<8x256xf32> -> vector<8x256xf32>
    %187 = arith.addf %182, %186 : vector<8x256xf32>
    %c247_i32_81 = arith.constant 247 : i32
    %188 = tpu.dynamic_rotate %157 by %c247_i32_81 dim 1 : vector<4x256xf32>, i32 -> vector<4x256xf32>
    %189 = vector.extract_strided_slice %158 {offsets = [6, 0, 0], sizes = [1, 8, 4], strides = [1, 1, 1]} : vector<9x8x4xf32> to vector<1x8x4xf32>
    %190 = vector.shape_cast %189 : vector<1x8x4xf32> to vector<8x4xf32>
    %cst_82 = arith.constant dense<0.000000e+00> : vector<8x256xf32>
    %191 = tpu.matmul %190, %188, %cst_82 {dimension_numbers = #tpu.dot_dimension_numbers<[1], [0], [0], [1], [0, 0, 1, 1], [], []>} : vector<8x4xf32>, vector<4x256xf32>, vector<8x256xf32> -> vector<8x256xf32>
    %192 = arith.addf %187, %191 : vector<8x256xf32>
    %c246_i32_83 = arith.constant 246 : i32
    %193 = tpu.dynamic_rotate %157 by %c246_i32_83 dim 1 : vector<4x256xf32>, i32 -> vector<4x256xf32>
    %194 = vector.extract_strided_slice %158 {offsets = [7, 0, 0], sizes = [1, 8, 4], strides = [1, 1, 1]} : vector<9x8x4xf32> to vector<1x8x4xf32>
    %195 = vector.shape_cast %194 : vector<1x8x4xf32> to vector<8x4xf32>
    %cst_84 = arith.constant dense<0.000000e+00> : vector<8x256xf32>
    %196 = tpu.matmul %195, %193, %cst_84 {dimension_numbers = #tpu.dot_dimension_numbers<[1], [0], [0], [1], [0, 0, 1, 1], [], []>} : vector<8x4xf32>, vector<4x256xf32>, vector<8x256xf32> -> vector<8x256xf32>
    %197 = arith.addf %192, %196 : vector<8x256xf32>
    %c245_i32_85 = arith.constant 245 : i32
    %198 = tpu.dynamic_rotate %157 by %c245_i32_85 dim 1 : vector<4x256xf32>, i32 -> vector<4x256xf32>
    %199 = vector.extract_strided_slice %158 {offsets = [8, 0, 0], sizes = [1, 8, 4], strides = [1, 1, 1]} : vector<9x8x4xf32> to vector<1x8x4xf32>
    %200 = vector.shape_cast %199 : vector<1x8x4xf32> to vector<8x4xf32>
    %cst_86 = arith.constant dense<0.000000e+00> : vector<8x256xf32>
    %201 = tpu.matmul %200, %198, %cst_86 {dimension_numbers = #tpu.dot_dimension_numbers<[1], [0], [0], [1], [0, 0, 1, 1], [], []>} : vector<8x4xf32>, vector<4x256xf32>, vector<8x256xf32> -> vector<8x256xf32>
    %202 = arith.addf %197, %201 : vector<8x256xf32>
    %cst_87 = arith.constant dense<0.000000e+00> : vector<8x128xf32>
    %203 = tpu.matmul %202, %4, %cst_87 {dimension_numbers = #tpu.dot_dimension_numbers<[1], [0], [0], [1], [0, 0, 1, 1], [], []>} : vector<8x256xf32>, vector<256x128xf32>, vector<8x128xf32> -> vector<8x128xf32>
    %204 = arith.addf %203, %159 : vector<8x128xf32>
    %cst_88 = arith.constant 0.000000e+00 : f32
    %205 = vector.broadcast %cst_88 : f32 to vector<8x128xf32>
    %206 = arith.maximumf %204, %205 : vector<8x128xf32>
    %207 = vector.broadcast %1 : vector<1x128xf32> to vector<8x128xf32>
    %208 = arith.mulf %206, %207 : vector<8x128xf32>
    %c0_89 = arith.constant 0 : index
    %c0_90 = arith.constant 0 : index
    %c0_91 = arith.constant 0 : index
    %209 = vector.load %arg9[%c0_89, %c0_90, %c0_91] : memref<9x8x4xf32, #tpu.memory_space<vmem>>, vector<9x8x4xf32>
    %c0_92 = arith.constant 0 : index
    %c0_93 = arith.constant 0 : index
    %210 = vector.load %arg8[%c0_92, %c0_93] : memref<8x128xf32, #tpu.memory_space<vmem>>, vector<8x128xf32>
    %c11_i32_94 = arith.constant 11 : i32
    %211 = tpu.dynamic_rotate %157 by %c11_i32_94 dim 1 : vector<4x256xf32>, i32 -> vector<4x256xf32>
    %212 = vector.extract_strided_slice %209 {offsets = [0, 0, 0], sizes = [1, 8, 4], strides = [1, 1, 1]} : vector<9x8x4xf32> to vector<1x8x4xf32>
    %213 = vector.shape_cast %212 : vector<1x8x4xf32> to vector<8x4xf32>
    %cst_95 = arith.constant dense<0.000000e+00> : vector<8x256xf32>
    %214 = tpu.matmul %213, %211, %cst_95 {dimension_numbers = #tpu.dot_dimension_numbers<[1], [0], [0], [1], [0, 0, 1, 1], [], []>} : vector<8x4xf32>, vector<4x256xf32>, vector<8x256xf32> -> vector<8x256xf32>
    %c10_i32_96 = arith.constant 10 : i32
    %215 = tpu.dynamic_rotate %157 by %c10_i32_96 dim 1 : vector<4x256xf32>, i32 -> vector<4x256xf32>
    %216 = vector.extract_strided_slice %209 {offsets = [1, 0, 0], sizes = [1, 8, 4], strides = [1, 1, 1]} : vector<9x8x4xf32> to vector<1x8x4xf32>
    %217 = vector.shape_cast %216 : vector<1x8x4xf32> to vector<8x4xf32>
    %cst_97 = arith.constant dense<0.000000e+00> : vector<8x256xf32>
    %218 = tpu.matmul %217, %215, %cst_97 {dimension_numbers = #tpu.dot_dimension_numbers<[1], [0], [0], [1], [0, 0, 1, 1], [], []>} : vector<8x4xf32>, vector<4x256xf32>, vector<8x256xf32> -> vector<8x256xf32>
    %219 = arith.addf %214, %218 : vector<8x256xf32>
    %c9_i32_98 = arith.constant 9 : i32
    %220 = tpu.dynamic_rotate %157 by %c9_i32_98 dim 1 : vector<4x256xf32>, i32 -> vector<4x256xf32>
    %221 = vector.extract_strided_slice %209 {offsets = [2, 0, 0], sizes = [1, 8, 4], strides = [1, 1, 1]} : vector<9x8x4xf32> to vector<1x8x4xf32>
    %222 = vector.shape_cast %221 : vector<1x8x4xf32> to vector<8x4xf32>
    %cst_99 = arith.constant dense<0.000000e+00> : vector<8x256xf32>
    %223 = tpu.matmul %222, %220, %cst_99 {dimension_numbers = #tpu.dot_dimension_numbers<[1], [0], [0], [1], [0, 0, 1, 1], [], []>} : vector<8x4xf32>, vector<4x256xf32>, vector<8x256xf32> -> vector<8x256xf32>
    %224 = arith.addf %219, %223 : vector<8x256xf32>
    %c1_i32_100 = arith.constant 1 : i32
    %225 = tpu.dynamic_rotate %157 by %c1_i32_100 dim 1 : vector<4x256xf32>, i32 -> vector<4x256xf32>
    %226 = vector.extract_strided_slice %209 {offsets = [3, 0, 0], sizes = [1, 8, 4], strides = [1, 1, 1]} : vector<9x8x4xf32> to vector<1x8x4xf32>
    %227 = vector.shape_cast %226 : vector<1x8x4xf32> to vector<8x4xf32>
    %cst_101 = arith.constant dense<0.000000e+00> : vector<8x256xf32>
    %228 = tpu.matmul %227, %225, %cst_101 {dimension_numbers = #tpu.dot_dimension_numbers<[1], [0], [0], [1], [0, 0, 1, 1], [], []>} : vector<8x4xf32>, vector<4x256xf32>, vector<8x256xf32> -> vector<8x256xf32>
    %229 = arith.addf %224, %228 : vector<8x256xf32>
    %230 = vector.extract_strided_slice %209 {offsets = [4, 0, 0], sizes = [1, 8, 4], strides = [1, 1, 1]} : vector<9x8x4xf32> to vector<1x8x4xf32>
    %231 = vector.shape_cast %230 : vector<1x8x4xf32> to vector<8x4xf32>
    %cst_102 = arith.constant dense<0.000000e+00> : vector<8x256xf32>
    %232 = tpu.matmul %231, %157, %cst_102 {dimension_numbers = #tpu.dot_dimension_numbers<[1], [0], [0], [1], [0, 0, 1, 1], [], []>} : vector<8x4xf32>, vector<4x256xf32>, vector<8x256xf32> -> vector<8x256xf32>
    %233 = arith.addf %229, %232 : vector<8x256xf32>
    %c255_i32_103 = arith.constant 255 : i32
    %234 = tpu.dynamic_rotate %157 by %c255_i32_103 dim 1 : vector<4x256xf32>, i32 -> vector<4x256xf32>
    %235 = vector.extract_strided_slice %209 {offsets = [5, 0, 0], sizes = [1, 8, 4], strides = [1, 1, 1]} : vector<9x8x4xf32> to vector<1x8x4xf32>
    %236 = vector.shape_cast %235 : vector<1x8x4xf32> to vector<8x4xf32>
    %cst_104 = arith.constant dense<0.000000e+00> : vector<8x256xf32>
    %237 = tpu.matmul %236, %234, %cst_104 {dimension_numbers = #tpu.dot_dimension_numbers<[1], [0], [0], [1], [0, 0, 1, 1], [], []>} : vector<8x4xf32>, vector<4x256xf32>, vector<8x256xf32> -> vector<8x256xf32>
    %238 = arith.addf %233, %237 : vector<8x256xf32>
    %c247_i32_105 = arith.constant 247 : i32
    %239 = tpu.dynamic_rotate %157 by %c247_i32_105 dim 1 : vector<4x256xf32>, i32 -> vector<4x256xf32>
    %240 = vector.extract_strided_slice %209 {offsets = [6, 0, 0], sizes = [1, 8, 4], strides = [1, 1, 1]} : vector<9x8x4xf32> to vector<1x8x4xf32>
    %241 = vector.shape_cast %240 : vector<1x8x4xf32> to vector<8x4xf32>
    %cst_106 = arith.constant dense<0.000000e+00> : vector<8x256xf32>
    %242 = tpu.matmul %241, %239, %cst_106 {dimension_numbers = #tpu.dot_dimension_numbers<[1], [0], [0], [1], [0, 0, 1, 1], [], []>} : vector<8x4xf32>, vector<4x256xf32>, vector<8x256xf32> -> vector<8x256xf32>
    %243 = arith.addf %238, %242 : vector<8x256xf32>
    %c246_i32_107 = arith.constant 246 : i32
    %244 = tpu.dynamic_rotate %157 by %c246_i32_107 dim 1 : vector<4x256xf32>, i32 -> vector<4x256xf32>
    %245 = vector.extract_strided_slice %209 {offsets = [7, 0, 0], sizes = [1, 8, 4], strides = [1, 1, 1]} : vector<9x8x4xf32> to vector<1x8x4xf32>
    %246 = vector.shape_cast %245 : vector<1x8x4xf32> to vector<8x4xf32>
    %cst_108 = arith.constant dense<0.000000e+00> : vector<8x256xf32>
    %247 = tpu.matmul %246, %244, %cst_108 {dimension_numbers = #tpu.dot_dimension_numbers<[1], [0], [0], [1], [0, 0, 1, 1], [], []>} : vector<8x4xf32>, vector<4x256xf32>, vector<8x256xf32> -> vector<8x256xf32>
    %248 = arith.addf %243, %247 : vector<8x256xf32>
    %c245_i32_109 = arith.constant 245 : i32
    %249 = tpu.dynamic_rotate %157 by %c245_i32_109 dim 1 : vector<4x256xf32>, i32 -> vector<4x256xf32>
    %250 = vector.extract_strided_slice %209 {offsets = [8, 0, 0], sizes = [1, 8, 4], strides = [1, 1, 1]} : vector<9x8x4xf32> to vector<1x8x4xf32>
    %251 = vector.shape_cast %250 : vector<1x8x4xf32> to vector<8x4xf32>
    %cst_110 = arith.constant dense<0.000000e+00> : vector<8x256xf32>
    %252 = tpu.matmul %251, %249, %cst_110 {dimension_numbers = #tpu.dot_dimension_numbers<[1], [0], [0], [1], [0, 0, 1, 1], [], []>} : vector<8x4xf32>, vector<4x256xf32>, vector<8x256xf32> -> vector<8x256xf32>
    %253 = arith.addf %248, %252 : vector<8x256xf32>
    %cst_111 = arith.constant dense<0.000000e+00> : vector<8x128xf32>
    %254 = tpu.matmul %253, %4, %cst_111 {dimension_numbers = #tpu.dot_dimension_numbers<[1], [0], [0], [1], [0, 0, 1, 1], [], []>} : vector<8x256xf32>, vector<256x128xf32>, vector<8x128xf32> -> vector<8x128xf32>
    %255 = arith.addf %254, %210 : vector<8x128xf32>
    %256 = vector.broadcast %1 : vector<1x128xf32> to vector<8x128xf32>
    %257 = arith.mulf %255, %256 : vector<8x128xf32>
    %c0_112 = arith.constant 0 : index
    %c0_113 = arith.constant 0 : index
    %c0_114 = arith.constant 0 : index
    %258 = vector.load %arg7[%c0_112, %c0_113, %c0_114] : memref<9x8x8xf32, #tpu.memory_space<vmem>>, vector<9x8x8xf32>
    %c0_115 = arith.constant 0 : index
    %c0_116 = arith.constant 0 : index
    %259 = vector.load %arg6[%c0_115, %c0_116] : memref<8x128xf32, #tpu.memory_space<vmem>>, vector<8x128xf32>
    %c7_i32 = arith.constant 7 : i32
    %260 = tpu.dynamic_rotate %208 by %c7_i32 dim 1 : vector<8x128xf32>, i32 -> vector<8x128xf32>
    %261 = vector.extract_strided_slice %258 {offsets = [0, 0, 0], sizes = [1, 8, 8], strides = [1, 1, 1]} : vector<9x8x8xf32> to vector<1x8x8xf32>
    %262 = vector.shape_cast %261 : vector<1x8x8xf32> to vector<8x8xf32>
    %cst_117 = arith.constant dense<0.000000e+00> : vector<8x128xf32>
    %263 = tpu.matmul %262, %260, %cst_117 {dimension_numbers = #tpu.dot_dimension_numbers<[1], [0], [0], [1], [0, 0, 1, 1], [], []>} : vector<8x8xf32>, vector<8x128xf32>, vector<8x128xf32> -> vector<8x128xf32>
    %c6_i32 = arith.constant 6 : i32
    %264 = tpu.dynamic_rotate %208 by %c6_i32 dim 1 : vector<8x128xf32>, i32 -> vector<8x128xf32>
    %265 = vector.extract_strided_slice %258 {offsets = [1, 0, 0], sizes = [1, 8, 8], strides = [1, 1, 1]} : vector<9x8x8xf32> to vector<1x8x8xf32>
    %266 = vector.shape_cast %265 : vector<1x8x8xf32> to vector<8x8xf32>
    %cst_118 = arith.constant dense<0.000000e+00> : vector<8x128xf32>
    %267 = tpu.matmul %266, %264, %cst_118 {dimension_numbers = #tpu.dot_dimension_numbers<[1], [0], [0], [1], [0, 0, 1, 1], [], []>} : vector<8x8xf32>, vector<8x128xf32>, vector<8x128xf32> -> vector<8x128xf32>
    %268 = arith.addf %263, %267 : vector<8x128xf32>
    %c5_i32 = arith.constant 5 : i32
    %269 = tpu.dynamic_rotate %208 by %c5_i32 dim 1 : vector<8x128xf32>, i32 -> vector<8x128xf32>
    %270 = vector.extract_strided_slice %258 {offsets = [2, 0, 0], sizes = [1, 8, 8], strides = [1, 1, 1]} : vector<9x8x8xf32> to vector<1x8x8xf32>
    %271 = vector.shape_cast %270 : vector<1x8x8xf32> to vector<8x8xf32>
    %cst_119 = arith.constant dense<0.000000e+00> : vector<8x128xf32>
    %272 = tpu.matmul %271, %269, %cst_119 {dimension_numbers = #tpu.dot_dimension_numbers<[1], [0], [0], [1], [0, 0, 1, 1], [], []>} : vector<8x8xf32>, vector<8x128xf32>, vector<8x128xf32> -> vector<8x128xf32>
    %273 = arith.addf %268, %272 : vector<8x128xf32>
    %c1_i32_120 = arith.constant 1 : i32
    %274 = tpu.dynamic_rotate %208 by %c1_i32_120 dim 1 : vector<8x128xf32>, i32 -> vector<8x128xf32>
    %275 = vector.extract_strided_slice %258 {offsets = [3, 0, 0], sizes = [1, 8, 8], strides = [1, 1, 1]} : vector<9x8x8xf32> to vector<1x8x8xf32>
    %276 = vector.shape_cast %275 : vector<1x8x8xf32> to vector<8x8xf32>
    %cst_121 = arith.constant dense<0.000000e+00> : vector<8x128xf32>
    %277 = tpu.matmul %276, %274, %cst_121 {dimension_numbers = #tpu.dot_dimension_numbers<[1], [0], [0], [1], [0, 0, 1, 1], [], []>} : vector<8x8xf32>, vector<8x128xf32>, vector<8x128xf32> -> vector<8x128xf32>
    %278 = arith.addf %273, %277 : vector<8x128xf32>
    %279 = vector.extract_strided_slice %258 {offsets = [4, 0, 0], sizes = [1, 8, 8], strides = [1, 1, 1]} : vector<9x8x8xf32> to vector<1x8x8xf32>
    %280 = vector.shape_cast %279 : vector<1x8x8xf32> to vector<8x8xf32>
    %cst_122 = arith.constant dense<0.000000e+00> : vector<8x128xf32>
    %281 = tpu.matmul %280, %208, %cst_122 {dimension_numbers = #tpu.dot_dimension_numbers<[1], [0], [0], [1], [0, 0, 1, 1], [], []>} : vector<8x8xf32>, vector<8x128xf32>, vector<8x128xf32> -> vector<8x128xf32>
    %282 = arith.addf %278, %281 : vector<8x128xf32>
    %c127_i32 = arith.constant 127 : i32
    %283 = tpu.dynamic_rotate %208 by %c127_i32 dim 1 : vector<8x128xf32>, i32 -> vector<8x128xf32>
    %284 = vector.extract_strided_slice %258 {offsets = [5, 0, 0], sizes = [1, 8, 8], strides = [1, 1, 1]} : vector<9x8x8xf32> to vector<1x8x8xf32>
    %285 = vector.shape_cast %284 : vector<1x8x8xf32> to vector<8x8xf32>
    %cst_123 = arith.constant dense<0.000000e+00> : vector<8x128xf32>
    %286 = tpu.matmul %285, %283, %cst_123 {dimension_numbers = #tpu.dot_dimension_numbers<[1], [0], [0], [1], [0, 0, 1, 1], [], []>} : vector<8x8xf32>, vector<8x128xf32>, vector<8x128xf32> -> vector<8x128xf32>
    %287 = arith.addf %282, %286 : vector<8x128xf32>
    %c123_i32 = arith.constant 123 : i32
    %288 = tpu.dynamic_rotate %208 by %c123_i32 dim 1 : vector<8x128xf32>, i32 -> vector<8x128xf32>
    %289 = vector.extract_strided_slice %258 {offsets = [6, 0, 0], sizes = [1, 8, 8], strides = [1, 1, 1]} : vector<9x8x8xf32> to vector<1x8x8xf32>
    %290 = vector.shape_cast %289 : vector<1x8x8xf32> to vector<8x8xf32>
    %cst_124 = arith.constant dense<0.000000e+00> : vector<8x128xf32>
    %291 = tpu.matmul %290, %288, %cst_124 {dimension_numbers = #tpu.dot_dimension_numbers<[1], [0], [0], [1], [0, 0, 1, 1], [], []>} : vector<8x8xf32>, vector<8x128xf32>, vector<8x128xf32> -> vector<8x128xf32>
    %292 = arith.addf %287, %291 : vector<8x128xf32>
    %c122_i32 = arith.constant 122 : i32
    %293 = tpu.dynamic_rotate %208 by %c122_i32 dim 1 : vector<8x128xf32>, i32 -> vector<8x128xf32>
    %294 = vector.extract_strided_slice %258 {offsets = [7, 0, 0], sizes = [1, 8, 8], strides = [1, 1, 1]} : vector<9x8x8xf32> to vector<1x8x8xf32>
    %295 = vector.shape_cast %294 : vector<1x8x8xf32> to vector<8x8xf32>
    %cst_125 = arith.constant dense<0.000000e+00> : vector<8x128xf32>
    %296 = tpu.matmul %295, %293, %cst_125 {dimension_numbers = #tpu.dot_dimension_numbers<[1], [0], [0], [1], [0, 0, 1, 1], [], []>} : vector<8x8xf32>, vector<8x128xf32>, vector<8x128xf32> -> vector<8x128xf32>
    %297 = arith.addf %292, %296 : vector<8x128xf32>
    %c121_i32 = arith.constant 121 : i32
    %298 = tpu.dynamic_rotate %208 by %c121_i32 dim 1 : vector<8x128xf32>, i32 -> vector<8x128xf32>
    %299 = vector.extract_strided_slice %258 {offsets = [8, 0, 0], sizes = [1, 8, 8], strides = [1, 1, 1]} : vector<9x8x8xf32> to vector<1x8x8xf32>
    %300 = vector.shape_cast %299 : vector<1x8x8xf32> to vector<8x8xf32>
    %cst_126 = arith.constant dense<0.000000e+00> : vector<8x128xf32>
    %301 = tpu.matmul %300, %298, %cst_126 {dimension_numbers = #tpu.dot_dimension_numbers<[1], [0], [0], [1], [0, 0, 1, 1], [], []>} : vector<8x8xf32>, vector<8x128xf32>, vector<8x128xf32> -> vector<8x128xf32>
    %302 = arith.addf %297, %301 : vector<8x128xf32>
    %303 = arith.addf %302, %259 : vector<8x128xf32>
    %304 = arith.addf %303, %257 : vector<8x128xf32>
    %cst_127 = arith.constant 0.000000e+00 : f32
    %305 = vector.broadcast %cst_127 : f32 to vector<8x128xf32>
    %306 = arith.maximumf %304, %305 : vector<8x128xf32>
    %307 = vector.broadcast %1 : vector<1x128xf32> to vector<8x128xf32>
    %308 = arith.mulf %306, %307 : vector<8x128xf32>
    %c0_128 = arith.constant 0 : index
    %c0_129 = arith.constant 0 : index
    %c0_130 = arith.constant 0 : index
    %309 = vector.load %arg20[%c0_128, %c0_129, %c0_130] : memref<9x8x8xf32, #tpu.memory_space<vmem>>, vector<9x8x8xf32>
    %c0_131 = arith.constant 0 : index
    %c0_132 = arith.constant 0 : index
    %310 = vector.load %arg19[%c0_131, %c0_132] : memref<8x128xf32, #tpu.memory_space<vmem>>, vector<8x128xf32>
    %c7_i32_133 = arith.constant 7 : i32
    %311 = tpu.dynamic_rotate %308 by %c7_i32_133 dim 1 : vector<8x128xf32>, i32 -> vector<8x128xf32>
    %312 = vector.extract_strided_slice %309 {offsets = [0, 0, 0], sizes = [1, 8, 8], strides = [1, 1, 1]} : vector<9x8x8xf32> to vector<1x8x8xf32>
    %313 = vector.shape_cast %312 : vector<1x8x8xf32> to vector<8x8xf32>
    %cst_134 = arith.constant dense<0.000000e+00> : vector<8x128xf32>
    %314 = tpu.matmul %313, %311, %cst_134 {dimension_numbers = #tpu.dot_dimension_numbers<[1], [0], [0], [1], [0, 0, 1, 1], [], []>} : vector<8x8xf32>, vector<8x128xf32>, vector<8x128xf32> -> vector<8x128xf32>
    %c6_i32_135 = arith.constant 6 : i32
    %315 = tpu.dynamic_rotate %308 by %c6_i32_135 dim 1 : vector<8x128xf32>, i32 -> vector<8x128xf32>
    %316 = vector.extract_strided_slice %309 {offsets = [1, 0, 0], sizes = [1, 8, 8], strides = [1, 1, 1]} : vector<9x8x8xf32> to vector<1x8x8xf32>
    %317 = vector.shape_cast %316 : vector<1x8x8xf32> to vector<8x8xf32>
    %cst_136 = arith.constant dense<0.000000e+00> : vector<8x128xf32>
    %318 = tpu.matmul %317, %315, %cst_136 {dimension_numbers = #tpu.dot_dimension_numbers<[1], [0], [0], [1], [0, 0, 1, 1], [], []>} : vector<8x8xf32>, vector<8x128xf32>, vector<8x128xf32> -> vector<8x128xf32>
    %319 = arith.addf %314, %318 : vector<8x128xf32>
    %c5_i32_137 = arith.constant 5 : i32
    %320 = tpu.dynamic_rotate %308 by %c5_i32_137 dim 1 : vector<8x128xf32>, i32 -> vector<8x128xf32>
    %321 = vector.extract_strided_slice %309 {offsets = [2, 0, 0], sizes = [1, 8, 8], strides = [1, 1, 1]} : vector<9x8x8xf32> to vector<1x8x8xf32>
    %322 = vector.shape_cast %321 : vector<1x8x8xf32> to vector<8x8xf32>
    %cst_138 = arith.constant dense<0.000000e+00> : vector<8x128xf32>
    %323 = tpu.matmul %322, %320, %cst_138 {dimension_numbers = #tpu.dot_dimension_numbers<[1], [0], [0], [1], [0, 0, 1, 1], [], []>} : vector<8x8xf32>, vector<8x128xf32>, vector<8x128xf32> -> vector<8x128xf32>
    %324 = arith.addf %319, %323 : vector<8x128xf32>
    %c1_i32_139 = arith.constant 1 : i32
    %325 = tpu.dynamic_rotate %308 by %c1_i32_139 dim 1 : vector<8x128xf32>, i32 -> vector<8x128xf32>
    %326 = vector.extract_strided_slice %309 {offsets = [3, 0, 0], sizes = [1, 8, 8], strides = [1, 1, 1]} : vector<9x8x8xf32> to vector<1x8x8xf32>
    %327 = vector.shape_cast %326 : vector<1x8x8xf32> to vector<8x8xf32>
    %cst_140 = arith.constant dense<0.000000e+00> : vector<8x128xf32>
    %328 = tpu.matmul %327, %325, %cst_140 {dimension_numbers = #tpu.dot_dimension_numbers<[1], [0], [0], [1], [0, 0, 1, 1], [], []>} : vector<8x8xf32>, vector<8x128xf32>, vector<8x128xf32> -> vector<8x128xf32>
    %329 = arith.addf %324, %328 : vector<8x128xf32>
    %330 = vector.extract_strided_slice %309 {offsets = [4, 0, 0], sizes = [1, 8, 8], strides = [1, 1, 1]} : vector<9x8x8xf32> to vector<1x8x8xf32>
    %331 = vector.shape_cast %330 : vector<1x8x8xf32> to vector<8x8xf32>
    %cst_141 = arith.constant dense<0.000000e+00> : vector<8x128xf32>
    %332 = tpu.matmul %331, %308, %cst_141 {dimension_numbers = #tpu.dot_dimension_numbers<[1], [0], [0], [1], [0, 0, 1, 1], [], []>} : vector<8x8xf32>, vector<8x128xf32>, vector<8x128xf32> -> vector<8x128xf32>
    %333 = arith.addf %329, %332 : vector<8x128xf32>
    %c127_i32_142 = arith.constant 127 : i32
    %334 = tpu.dynamic_rotate %308 by %c127_i32_142 dim 1 : vector<8x128xf32>, i32 -> vector<8x128xf32>
    %335 = vector.extract_strided_slice %309 {offsets = [5, 0, 0], sizes = [1, 8, 8], strides = [1, 1, 1]} : vector<9x8x8xf32> to vector<1x8x8xf32>
    %336 = vector.shape_cast %335 : vector<1x8x8xf32> to vector<8x8xf32>
    %cst_143 = arith.constant dense<0.000000e+00> : vector<8x128xf32>
    %337 = tpu.matmul %336, %334, %cst_143 {dimension_numbers = #tpu.dot_dimension_numbers<[1], [0], [0], [1], [0, 0, 1, 1], [], []>} : vector<8x8xf32>, vector<8x128xf32>, vector<8x128xf32> -> vector<8x128xf32>
    %338 = arith.addf %333, %337 : vector<8x128xf32>
    %c123_i32_144 = arith.constant 123 : i32
    %339 = tpu.dynamic_rotate %308 by %c123_i32_144 dim 1 : vector<8x128xf32>, i32 -> vector<8x128xf32>
    %340 = vector.extract_strided_slice %309 {offsets = [6, 0, 0], sizes = [1, 8, 8], strides = [1, 1, 1]} : vector<9x8x8xf32> to vector<1x8x8xf32>
    %341 = vector.shape_cast %340 : vector<1x8x8xf32> to vector<8x8xf32>
    %cst_145 = arith.constant dense<0.000000e+00> : vector<8x128xf32>
    %342 = tpu.matmul %341, %339, %cst_145 {dimension_numbers = #tpu.dot_dimension_numbers<[1], [0], [0], [1], [0, 0, 1, 1], [], []>} : vector<8x8xf32>, vector<8x128xf32>, vector<8x128xf32> -> vector<8x128xf32>
    %343 = arith.addf %338, %342 : vector<8x128xf32>
    %c122_i32_146 = arith.constant 122 : i32
    %344 = tpu.dynamic_rotate %308 by %c122_i32_146 dim 1 : vector<8x128xf32>, i32 -> vector<8x128xf32>
    %345 = vector.extract_strided_slice %309 {offsets = [7, 0, 0], sizes = [1, 8, 8], strides = [1, 1, 1]} : vector<9x8x8xf32> to vector<1x8x8xf32>
    %346 = vector.shape_cast %345 : vector<1x8x8xf32> to vector<8x8xf32>
    %cst_147 = arith.constant dense<0.000000e+00> : vector<8x128xf32>
    %347 = tpu.matmul %346, %344, %cst_147 {dimension_numbers = #tpu.dot_dimension_numbers<[1], [0], [0], [1], [0, 0, 1, 1], [], []>} : vector<8x8xf32>, vector<8x128xf32>, vector<8x128xf32> -> vector<8x128xf32>
    %348 = arith.addf %343, %347 : vector<8x128xf32>
    %c121_i32_148 = arith.constant 121 : i32
    %349 = tpu.dynamic_rotate %308 by %c121_i32_148 dim 1 : vector<8x128xf32>, i32 -> vector<8x128xf32>
    %350 = vector.extract_strided_slice %309 {offsets = [8, 0, 0], sizes = [1, 8, 8], strides = [1, 1, 1]} : vector<9x8x8xf32> to vector<1x8x8xf32>
    %351 = vector.shape_cast %350 : vector<1x8x8xf32> to vector<8x8xf32>
    %cst_149 = arith.constant dense<0.000000e+00> : vector<8x128xf32>
    %352 = tpu.matmul %351, %349, %cst_149 {dimension_numbers = #tpu.dot_dimension_numbers<[1], [0], [0], [1], [0, 0, 1, 1], [], []>} : vector<8x8xf32>, vector<8x128xf32>, vector<8x128xf32> -> vector<8x128xf32>
    %353 = arith.addf %348, %352 : vector<8x128xf32>
    %354 = arith.addf %353, %310 : vector<8x128xf32>
    %cst_150 = arith.constant 0.000000e+00 : f32
    %355 = vector.broadcast %cst_150 : f32 to vector<8x128xf32>
    %356 = arith.maximumf %354, %355 : vector<8x128xf32>
    %357 = vector.broadcast %1 : vector<1x128xf32> to vector<8x128xf32>
    %358 = arith.mulf %356, %357 : vector<8x128xf32>
    %c0_151 = arith.constant 0 : index
    %c0_152 = arith.constant 0 : index
    %c0_153 = arith.constant 0 : index
    %359 = vector.load %arg22[%c0_151, %c0_152, %c0_153] : memref<9x8x8xf32, #tpu.memory_space<vmem>>, vector<9x8x8xf32>
    %c0_154 = arith.constant 0 : index
    %c0_155 = arith.constant 0 : index
    %360 = vector.load %arg21[%c0_154, %c0_155] : memref<8x128xf32, #tpu.memory_space<vmem>>, vector<8x128xf32>
    %c7_i32_156 = arith.constant 7 : i32
    %361 = tpu.dynamic_rotate %358 by %c7_i32_156 dim 1 : vector<8x128xf32>, i32 -> vector<8x128xf32>
    %362 = vector.extract_strided_slice %359 {offsets = [0, 0, 0], sizes = [1, 8, 8], strides = [1, 1, 1]} : vector<9x8x8xf32> to vector<1x8x8xf32>
    %363 = vector.shape_cast %362 : vector<1x8x8xf32> to vector<8x8xf32>
    %cst_157 = arith.constant dense<0.000000e+00> : vector<8x128xf32>
    %364 = tpu.matmul %363, %361, %cst_157 {dimension_numbers = #tpu.dot_dimension_numbers<[1], [0], [0], [1], [0, 0, 1, 1], [], []>} : vector<8x8xf32>, vector<8x128xf32>, vector<8x128xf32> -> vector<8x128xf32>
    %c6_i32_158 = arith.constant 6 : i32
    %365 = tpu.dynamic_rotate %358 by %c6_i32_158 dim 1 : vector<8x128xf32>, i32 -> vector<8x128xf32>
    %366 = vector.extract_strided_slice %359 {offsets = [1, 0, 0], sizes = [1, 8, 8], strides = [1, 1, 1]} : vector<9x8x8xf32> to vector<1x8x8xf32>
    %367 = vector.shape_cast %366 : vector<1x8x8xf32> to vector<8x8xf32>
    %cst_159 = arith.constant dense<0.000000e+00> : vector<8x128xf32>
    %368 = tpu.matmul %367, %365, %cst_159 {dimension_numbers = #tpu.dot_dimension_numbers<[1], [0], [0], [1], [0, 0, 1, 1], [], []>} : vector<8x8xf32>, vector<8x128xf32>, vector<8x128xf32> -> vector<8x128xf32>
    %369 = arith.addf %364, %368 : vector<8x128xf32>
    %c5_i32_160 = arith.constant 5 : i32
    %370 = tpu.dynamic_rotate %358 by %c5_i32_160 dim 1 : vector<8x128xf32>, i32 -> vector<8x128xf32>
    %371 = vector.extract_strided_slice %359 {offsets = [2, 0, 0], sizes = [1, 8, 8], strides = [1, 1, 1]} : vector<9x8x8xf32> to vector<1x8x8xf32>
    %372 = vector.shape_cast %371 : vector<1x8x8xf32> to vector<8x8xf32>
    %cst_161 = arith.constant dense<0.000000e+00> : vector<8x128xf32>
    %373 = tpu.matmul %372, %370, %cst_161 {dimension_numbers = #tpu.dot_dimension_numbers<[1], [0], [0], [1], [0, 0, 1, 1], [], []>} : vector<8x8xf32>, vector<8x128xf32>, vector<8x128xf32> -> vector<8x128xf32>
    %374 = arith.addf %369, %373 : vector<8x128xf32>
    %c1_i32_162 = arith.constant 1 : i32
    %375 = tpu.dynamic_rotate %358 by %c1_i32_162 dim 1 : vector<8x128xf32>, i32 -> vector<8x128xf32>
    %376 = vector.extract_strided_slice %359 {offsets = [3, 0, 0], sizes = [1, 8, 8], strides = [1, 1, 1]} : vector<9x8x8xf32> to vector<1x8x8xf32>
    %377 = vector.shape_cast %376 : vector<1x8x8xf32> to vector<8x8xf32>
    %cst_163 = arith.constant dense<0.000000e+00> : vector<8x128xf32>
    %378 = tpu.matmul %377, %375, %cst_163 {dimension_numbers = #tpu.dot_dimension_numbers<[1], [0], [0], [1], [0, 0, 1, 1], [], []>} : vector<8x8xf32>, vector<8x128xf32>, vector<8x128xf32> -> vector<8x128xf32>
    %379 = arith.addf %374, %378 : vector<8x128xf32>
    %380 = vector.extract_strided_slice %359 {offsets = [4, 0, 0], sizes = [1, 8, 8], strides = [1, 1, 1]} : vector<9x8x8xf32> to vector<1x8x8xf32>
    %381 = vector.shape_cast %380 : vector<1x8x8xf32> to vector<8x8xf32>
    %cst_164 = arith.constant dense<0.000000e+00> : vector<8x128xf32>
    %382 = tpu.matmul %381, %358, %cst_164 {dimension_numbers = #tpu.dot_dimension_numbers<[1], [0], [0], [1], [0, 0, 1, 1], [], []>} : vector<8x8xf32>, vector<8x128xf32>, vector<8x128xf32> -> vector<8x128xf32>
    %383 = arith.addf %379, %382 : vector<8x128xf32>
    %c127_i32_165 = arith.constant 127 : i32
    %384 = tpu.dynamic_rotate %358 by %c127_i32_165 dim 1 : vector<8x128xf32>, i32 -> vector<8x128xf32>
    %385 = vector.extract_strided_slice %359 {offsets = [5, 0, 0], sizes = [1, 8, 8], strides = [1, 1, 1]} : vector<9x8x8xf32> to vector<1x8x8xf32>
    %386 = vector.shape_cast %385 : vector<1x8x8xf32> to vector<8x8xf32>
    %cst_166 = arith.constant dense<0.000000e+00> : vector<8x128xf32>
    %387 = tpu.matmul %386, %384, %cst_166 {dimension_numbers = #tpu.dot_dimension_numbers<[1], [0], [0], [1], [0, 0, 1, 1], [], []>} : vector<8x8xf32>, vector<8x128xf32>, vector<8x128xf32> -> vector<8x128xf32>
    %388 = arith.addf %383, %387 : vector<8x128xf32>
    %c123_i32_167 = arith.constant 123 : i32
    %389 = tpu.dynamic_rotate %358 by %c123_i32_167 dim 1 : vector<8x128xf32>, i32 -> vector<8x128xf32>
    %390 = vector.extract_strided_slice %359 {offsets = [6, 0, 0], sizes = [1, 8, 8], strides = [1, 1, 1]} : vector<9x8x8xf32> to vector<1x8x8xf32>
    %391 = vector.shape_cast %390 : vector<1x8x8xf32> to vector<8x8xf32>
    %cst_168 = arith.constant dense<0.000000e+00> : vector<8x128xf32>
    %392 = tpu.matmul %391, %389, %cst_168 {dimension_numbers = #tpu.dot_dimension_numbers<[1], [0], [0], [1], [0, 0, 1, 1], [], []>} : vector<8x8xf32>, vector<8x128xf32>, vector<8x128xf32> -> vector<8x128xf32>
    %393 = arith.addf %388, %392 : vector<8x128xf32>
    %c122_i32_169 = arith.constant 122 : i32
    %394 = tpu.dynamic_rotate %358 by %c122_i32_169 dim 1 : vector<8x128xf32>, i32 -> vector<8x128xf32>
    %395 = vector.extract_strided_slice %359 {offsets = [7, 0, 0], sizes = [1, 8, 8], strides = [1, 1, 1]} : vector<9x8x8xf32> to vector<1x8x8xf32>
    %396 = vector.shape_cast %395 : vector<1x8x8xf32> to vector<8x8xf32>
    %cst_170 = arith.constant dense<0.000000e+00> : vector<8x128xf32>
    %397 = tpu.matmul %396, %394, %cst_170 {dimension_numbers = #tpu.dot_dimension_numbers<[1], [0], [0], [1], [0, 0, 1, 1], [], []>} : vector<8x8xf32>, vector<8x128xf32>, vector<8x128xf32> -> vector<8x128xf32>
    %398 = arith.addf %393, %397 : vector<8x128xf32>
    %c121_i32_171 = arith.constant 121 : i32
    %399 = tpu.dynamic_rotate %358 by %c121_i32_171 dim 1 : vector<8x128xf32>, i32 -> vector<8x128xf32>
    %400 = vector.extract_strided_slice %359 {offsets = [8, 0, 0], sizes = [1, 8, 8], strides = [1, 1, 1]} : vector<9x8x8xf32> to vector<1x8x8xf32>
    %401 = vector.shape_cast %400 : vector<1x8x8xf32> to vector<8x8xf32>
    %cst_172 = arith.constant dense<0.000000e+00> : vector<8x128xf32>
    %402 = tpu.matmul %401, %399, %cst_172 {dimension_numbers = #tpu.dot_dimension_numbers<[1], [0], [0], [1], [0, 0, 1, 1], [], []>} : vector<8x8xf32>, vector<8x128xf32>, vector<8x128xf32> -> vector<8x128xf32>
    %403 = arith.addf %398, %402 : vector<8x128xf32>
    %404 = arith.addf %403, %360 : vector<8x128xf32>
    %405 = arith.addf %404, %308 : vector<8x128xf32>
    %cst_173 = arith.constant 0.000000e+00 : f32
    %406 = vector.broadcast %cst_173 : f32 to vector<8x128xf32>
    %407 = arith.maximumf %405, %406 : vector<8x128xf32>
    %408 = vector.broadcast %1 : vector<1x128xf32> to vector<8x128xf32>
    %409 = arith.mulf %407, %408 : vector<8x128xf32>
    %c0_174 = arith.constant 0 : index
    %c0_175 = arith.constant 0 : index
    %410 = vector.load %arg13[%c0_174, %c0_175] : memref<128x128xf32, #tpu.memory_space<vmem>>, vector<128x128xf32>
    %cst_176 = arith.constant dense<0.000000e+00> : vector<8x128xf32>
    %411 = tpu.matmul %409, %410, %cst_176 {dimension_numbers = #tpu.dot_dimension_numbers<[1], [0], [0], [1], [0, 0, 1, 1], [], []>} : vector<8x128xf32>, vector<128x128xf32>, vector<8x128xf32> -> vector<8x128xf32>
    %c0_177 = arith.constant 0 : index
    %c0_178 = arith.constant 0 : index
    %c0_179 = arith.constant 0 : index
    %412 = vector.load %arg24[%c0_177, %c0_178, %c0_179] : memref<9x8x8xf32, #tpu.memory_space<vmem>>, vector<9x8x8xf32>
    %c0_180 = arith.constant 0 : index
    %c0_181 = arith.constant 0 : index
    %413 = vector.load %arg23[%c0_180, %c0_181] : memref<8x128xf32, #tpu.memory_space<vmem>>, vector<8x128xf32>
    %c5_i32_182 = arith.constant 5 : i32
    %414 = tpu.dynamic_rotate %411 by %c5_i32_182 dim 1 : vector<8x128xf32>, i32 -> vector<8x128xf32>
    %415 = vector.extract_strided_slice %412 {offsets = [0, 0, 0], sizes = [1, 8, 8], strides = [1, 1, 1]} : vector<9x8x8xf32> to vector<1x8x8xf32>
    %416 = vector.shape_cast %415 : vector<1x8x8xf32> to vector<8x8xf32>
    %cst_183 = arith.constant dense<0.000000e+00> : vector<8x128xf32>
    %417 = tpu.matmul %416, %414, %cst_183 {dimension_numbers = #tpu.dot_dimension_numbers<[1], [0], [0], [1], [0, 0, 1, 1], [], []>} : vector<8x8xf32>, vector<8x128xf32>, vector<8x128xf32> -> vector<8x128xf32>
    %c4_i32 = arith.constant 4 : i32
    %418 = tpu.dynamic_rotate %411 by %c4_i32 dim 1 : vector<8x128xf32>, i32 -> vector<8x128xf32>
    %419 = vector.extract_strided_slice %412 {offsets = [1, 0, 0], sizes = [1, 8, 8], strides = [1, 1, 1]} : vector<9x8x8xf32> to vector<1x8x8xf32>
    %420 = vector.shape_cast %419 : vector<1x8x8xf32> to vector<8x8xf32>
    %cst_184 = arith.constant dense<0.000000e+00> : vector<8x128xf32>
    %421 = tpu.matmul %420, %418, %cst_184 {dimension_numbers = #tpu.dot_dimension_numbers<[1], [0], [0], [1], [0, 0, 1, 1], [], []>} : vector<8x8xf32>, vector<8x128xf32>, vector<8x128xf32> -> vector<8x128xf32>
    %422 = arith.addf %417, %421 : vector<8x128xf32>
    %c3_i32 = arith.constant 3 : i32
    %423 = tpu.dynamic_rotate %411 by %c3_i32 dim 1 : vector<8x128xf32>, i32 -> vector<8x128xf32>
    %424 = vector.extract_strided_slice %412 {offsets = [2, 0, 0], sizes = [1, 8, 8], strides = [1, 1, 1]} : vector<9x8x8xf32> to vector<1x8x8xf32>
    %425 = vector.shape_cast %424 : vector<1x8x8xf32> to vector<8x8xf32>
    %cst_185 = arith.constant dense<0.000000e+00> : vector<8x128xf32>
    %426 = tpu.matmul %425, %423, %cst_185 {dimension_numbers = #tpu.dot_dimension_numbers<[1], [0], [0], [1], [0, 0, 1, 1], [], []>} : vector<8x8xf32>, vector<8x128xf32>, vector<8x128xf32> -> vector<8x128xf32>
    %427 = arith.addf %422, %426 : vector<8x128xf32>
    %c1_i32_186 = arith.constant 1 : i32
    %428 = tpu.dynamic_rotate %411 by %c1_i32_186 dim 1 : vector<8x128xf32>, i32 -> vector<8x128xf32>
    %429 = vector.extract_strided_slice %412 {offsets = [3, 0, 0], sizes = [1, 8, 8], strides = [1, 1, 1]} : vector<9x8x8xf32> to vector<1x8x8xf32>
    %430 = vector.shape_cast %429 : vector<1x8x8xf32> to vector<8x8xf32>
    %cst_187 = arith.constant dense<0.000000e+00> : vector<8x128xf32>
    %431 = tpu.matmul %430, %428, %cst_187 {dimension_numbers = #tpu.dot_dimension_numbers<[1], [0], [0], [1], [0, 0, 1, 1], [], []>} : vector<8x8xf32>, vector<8x128xf32>, vector<8x128xf32> -> vector<8x128xf32>
    %432 = arith.addf %427, %431 : vector<8x128xf32>
    %433 = vector.extract_strided_slice %412 {offsets = [4, 0, 0], sizes = [1, 8, 8], strides = [1, 1, 1]} : vector<9x8x8xf32> to vector<1x8x8xf32>
    %434 = vector.shape_cast %433 : vector<1x8x8xf32> to vector<8x8xf32>
    %cst_188 = arith.constant dense<0.000000e+00> : vector<8x128xf32>
    %435 = tpu.matmul %434, %411, %cst_188 {dimension_numbers = #tpu.dot_dimension_numbers<[1], [0], [0], [1], [0, 0, 1, 1], [], []>} : vector<8x8xf32>, vector<8x128xf32>, vector<8x128xf32> -> vector<8x128xf32>
    %436 = arith.addf %432, %435 : vector<8x128xf32>
    %c127_i32_189 = arith.constant 127 : i32
    %437 = tpu.dynamic_rotate %411 by %c127_i32_189 dim 1 : vector<8x128xf32>, i32 -> vector<8x128xf32>
    %438 = vector.extract_strided_slice %412 {offsets = [5, 0, 0], sizes = [1, 8, 8], strides = [1, 1, 1]} : vector<9x8x8xf32> to vector<1x8x8xf32>
    %439 = vector.shape_cast %438 : vector<1x8x8xf32> to vector<8x8xf32>
    %cst_190 = arith.constant dense<0.000000e+00> : vector<8x128xf32>
    %440 = tpu.matmul %439, %437, %cst_190 {dimension_numbers = #tpu.dot_dimension_numbers<[1], [0], [0], [1], [0, 0, 1, 1], [], []>} : vector<8x8xf32>, vector<8x128xf32>, vector<8x128xf32> -> vector<8x128xf32>
    %441 = arith.addf %436, %440 : vector<8x128xf32>
    %c125_i32 = arith.constant 125 : i32
    %442 = tpu.dynamic_rotate %411 by %c125_i32 dim 1 : vector<8x128xf32>, i32 -> vector<8x128xf32>
    %443 = vector.extract_strided_slice %412 {offsets = [6, 0, 0], sizes = [1, 8, 8], strides = [1, 1, 1]} : vector<9x8x8xf32> to vector<1x8x8xf32>
    %444 = vector.shape_cast %443 : vector<1x8x8xf32> to vector<8x8xf32>
    %cst_191 = arith.constant dense<0.000000e+00> : vector<8x128xf32>
    %445 = tpu.matmul %444, %442, %cst_191 {dimension_numbers = #tpu.dot_dimension_numbers<[1], [0], [0], [1], [0, 0, 1, 1], [], []>} : vector<8x8xf32>, vector<8x128xf32>, vector<8x128xf32> -> vector<8x128xf32>
    %446 = arith.addf %441, %445 : vector<8x128xf32>
    %c124_i32 = arith.constant 124 : i32
    %447 = tpu.dynamic_rotate %411 by %c124_i32 dim 1 : vector<8x128xf32>, i32 -> vector<8x128xf32>
    %448 = vector.extract_strided_slice %412 {offsets = [7, 0, 0], sizes = [1, 8, 8], strides = [1, 1, 1]} : vector<9x8x8xf32> to vector<1x8x8xf32>
    %449 = vector.shape_cast %448 : vector<1x8x8xf32> to vector<8x8xf32>
    %cst_192 = arith.constant dense<0.000000e+00> : vector<8x128xf32>
    %450 = tpu.matmul %449, %447, %cst_192 {dimension_numbers = #tpu.dot_dimension_numbers<[1], [0], [0], [1], [0, 0, 1, 1], [], []>} : vector<8x8xf32>, vector<8x128xf32>, vector<8x128xf32> -> vector<8x128xf32>
    %451 = arith.addf %446, %450 : vector<8x128xf32>
    %c123_i32_193 = arith.constant 123 : i32
    %452 = tpu.dynamic_rotate %411 by %c123_i32_193 dim 1 : vector<8x128xf32>, i32 -> vector<8x128xf32>
    %453 = vector.extract_strided_slice %412 {offsets = [8, 0, 0], sizes = [1, 8, 8], strides = [1, 1, 1]} : vector<9x8x8xf32> to vector<1x8x8xf32>
    %454 = vector.shape_cast %453 : vector<1x8x8xf32> to vector<8x8xf32>
    %cst_194 = arith.constant dense<0.000000e+00> : vector<8x128xf32>
    %455 = tpu.matmul %454, %452, %cst_194 {dimension_numbers = #tpu.dot_dimension_numbers<[1], [0], [0], [1], [0, 0, 1, 1], [], []>} : vector<8x8xf32>, vector<8x128xf32>, vector<8x128xf32> -> vector<8x128xf32>
    %456 = arith.addf %451, %455 : vector<8x128xf32>
    %457 = arith.addf %456, %413 : vector<8x128xf32>
    %cst_195 = arith.constant 0.000000e+00 : f32
    %458 = vector.broadcast %cst_195 : f32 to vector<8x128xf32>
    %459 = arith.maximumf %457, %458 : vector<8x128xf32>
    %460 = vector.broadcast %2 : vector<1x128xf32> to vector<8x128xf32>
    %461 = arith.mulf %459, %460 : vector<8x128xf32>
    %c0_196 = arith.constant 0 : index
    %c0_197 = arith.constant 0 : index
    %c0_198 = arith.constant 0 : index
    %462 = vector.load %arg26[%c0_196, %c0_197, %c0_198] : memref<9x8x8xf32, #tpu.memory_space<vmem>>, vector<9x8x8xf32>
    %c0_199 = arith.constant 0 : index
    %c0_200 = arith.constant 0 : index
    %463 = vector.load %arg25[%c0_199, %c0_200] : memref<8x128xf32, #tpu.memory_space<vmem>>, vector<8x128xf32>
    %c5_i32_201 = arith.constant 5 : i32
    %464 = tpu.dynamic_rotate %461 by %c5_i32_201 dim 1 : vector<8x128xf32>, i32 -> vector<8x128xf32>
    %465 = vector.extract_strided_slice %462 {offsets = [0, 0, 0], sizes = [1, 8, 8], strides = [1, 1, 1]} : vector<9x8x8xf32> to vector<1x8x8xf32>
    %466 = vector.shape_cast %465 : vector<1x8x8xf32> to vector<8x8xf32>
    %cst_202 = arith.constant dense<0.000000e+00> : vector<8x128xf32>
    %467 = tpu.matmul %466, %464, %cst_202 {dimension_numbers = #tpu.dot_dimension_numbers<[1], [0], [0], [1], [0, 0, 1, 1], [], []>} : vector<8x8xf32>, vector<8x128xf32>, vector<8x128xf32> -> vector<8x128xf32>
    %c4_i32_203 = arith.constant 4 : i32
    %468 = tpu.dynamic_rotate %461 by %c4_i32_203 dim 1 : vector<8x128xf32>, i32 -> vector<8x128xf32>
    %469 = vector.extract_strided_slice %462 {offsets = [1, 0, 0], sizes = [1, 8, 8], strides = [1, 1, 1]} : vector<9x8x8xf32> to vector<1x8x8xf32>
    %470 = vector.shape_cast %469 : vector<1x8x8xf32> to vector<8x8xf32>
    %cst_204 = arith.constant dense<0.000000e+00> : vector<8x128xf32>
    %471 = tpu.matmul %470, %468, %cst_204 {dimension_numbers = #tpu.dot_dimension_numbers<[1], [0], [0], [1], [0, 0, 1, 1], [], []>} : vector<8x8xf32>, vector<8x128xf32>, vector<8x128xf32> -> vector<8x128xf32>
    %472 = arith.addf %467, %471 : vector<8x128xf32>
    %c3_i32_205 = arith.constant 3 : i32
    %473 = tpu.dynamic_rotate %461 by %c3_i32_205 dim 1 : vector<8x128xf32>, i32 -> vector<8x128xf32>
    %474 = vector.extract_strided_slice %462 {offsets = [2, 0, 0], sizes = [1, 8, 8], strides = [1, 1, 1]} : vector<9x8x8xf32> to vector<1x8x8xf32>
    %475 = vector.shape_cast %474 : vector<1x8x8xf32> to vector<8x8xf32>
    %cst_206 = arith.constant dense<0.000000e+00> : vector<8x128xf32>
    %476 = tpu.matmul %475, %473, %cst_206 {dimension_numbers = #tpu.dot_dimension_numbers<[1], [0], [0], [1], [0, 0, 1, 1], [], []>} : vector<8x8xf32>, vector<8x128xf32>, vector<8x128xf32> -> vector<8x128xf32>
    %477 = arith.addf %472, %476 : vector<8x128xf32>
    %c1_i32_207 = arith.constant 1 : i32
    %478 = tpu.dynamic_rotate %461 by %c1_i32_207 dim 1 : vector<8x128xf32>, i32 -> vector<8x128xf32>
    %479 = vector.extract_strided_slice %462 {offsets = [3, 0, 0], sizes = [1, 8, 8], strides = [1, 1, 1]} : vector<9x8x8xf32> to vector<1x8x8xf32>
    %480 = vector.shape_cast %479 : vector<1x8x8xf32> to vector<8x8xf32>
    %cst_208 = arith.constant dense<0.000000e+00> : vector<8x128xf32>
    %481 = tpu.matmul %480, %478, %cst_208 {dimension_numbers = #tpu.dot_dimension_numbers<[1], [0], [0], [1], [0, 0, 1, 1], [], []>} : vector<8x8xf32>, vector<8x128xf32>, vector<8x128xf32> -> vector<8x128xf32>
    %482 = arith.addf %477, %481 : vector<8x128xf32>
    %483 = vector.extract_strided_slice %462 {offsets = [4, 0, 0], sizes = [1, 8, 8], strides = [1, 1, 1]} : vector<9x8x8xf32> to vector<1x8x8xf32>
    %484 = vector.shape_cast %483 : vector<1x8x8xf32> to vector<8x8xf32>
    %cst_209 = arith.constant dense<0.000000e+00> : vector<8x128xf32>
    %485 = tpu.matmul %484, %461, %cst_209 {dimension_numbers = #tpu.dot_dimension_numbers<[1], [0], [0], [1], [0, 0, 1, 1], [], []>} : vector<8x8xf32>, vector<8x128xf32>, vector<8x128xf32> -> vector<8x128xf32>
    %486 = arith.addf %482, %485 : vector<8x128xf32>
    %c127_i32_210 = arith.constant 127 : i32
    %487 = tpu.dynamic_rotate %461 by %c127_i32_210 dim 1 : vector<8x128xf32>, i32 -> vector<8x128xf32>
    %488 = vector.extract_strided_slice %462 {offsets = [5, 0, 0], sizes = [1, 8, 8], strides = [1, 1, 1]} : vector<9x8x8xf32> to vector<1x8x8xf32>
    %489 = vector.shape_cast %488 : vector<1x8x8xf32> to vector<8x8xf32>
    %cst_211 = arith.constant dense<0.000000e+00> : vector<8x128xf32>
    %490 = tpu.matmul %489, %487, %cst_211 {dimension_numbers = #tpu.dot_dimension_numbers<[1], [0], [0], [1], [0, 0, 1, 1], [], []>} : vector<8x8xf32>, vector<8x128xf32>, vector<8x128xf32> -> vector<8x128xf32>
    %491 = arith.addf %486, %490 : vector<8x128xf32>
    %c125_i32_212 = arith.constant 125 : i32
    %492 = tpu.dynamic_rotate %461 by %c125_i32_212 dim 1 : vector<8x128xf32>, i32 -> vector<8x128xf32>
    %493 = vector.extract_strided_slice %462 {offsets = [6, 0, 0], sizes = [1, 8, 8], strides = [1, 1, 1]} : vector<9x8x8xf32> to vector<1x8x8xf32>
    %494 = vector.shape_cast %493 : vector<1x8x8xf32> to vector<8x8xf32>
    %cst_213 = arith.constant dense<0.000000e+00> : vector<8x128xf32>
    %495 = tpu.matmul %494, %492, %cst_213 {dimension_numbers = #tpu.dot_dimension_numbers<[1], [0], [0], [1], [0, 0, 1, 1], [], []>} : vector<8x8xf32>, vector<8x128xf32>, vector<8x128xf32> -> vector<8x128xf32>
    %496 = arith.addf %491, %495 : vector<8x128xf32>
    %c124_i32_214 = arith.constant 124 : i32
    %497 = tpu.dynamic_rotate %461 by %c124_i32_214 dim 1 : vector<8x128xf32>, i32 -> vector<8x128xf32>
    %498 = vector.extract_strided_slice %462 {offsets = [7, 0, 0], sizes = [1, 8, 8], strides = [1, 1, 1]} : vector<9x8x8xf32> to vector<1x8x8xf32>
    %499 = vector.shape_cast %498 : vector<1x8x8xf32> to vector<8x8xf32>
    %cst_215 = arith.constant dense<0.000000e+00> : vector<8x128xf32>
    %500 = tpu.matmul %499, %497, %cst_215 {dimension_numbers = #tpu.dot_dimension_numbers<[1], [0], [0], [1], [0, 0, 1, 1], [], []>} : vector<8x8xf32>, vector<8x128xf32>, vector<8x128xf32> -> vector<8x128xf32>
    %501 = arith.addf %496, %500 : vector<8x128xf32>
    %c123_i32_216 = arith.constant 123 : i32
    %502 = tpu.dynamic_rotate %461 by %c123_i32_216 dim 1 : vector<8x128xf32>, i32 -> vector<8x128xf32>
    %503 = vector.extract_strided_slice %462 {offsets = [8, 0, 0], sizes = [1, 8, 8], strides = [1, 1, 1]} : vector<9x8x8xf32> to vector<1x8x8xf32>
    %504 = vector.shape_cast %503 : vector<1x8x8xf32> to vector<8x8xf32>
    %cst_217 = arith.constant dense<0.000000e+00> : vector<8x128xf32>
    %505 = tpu.matmul %504, %502, %cst_217 {dimension_numbers = #tpu.dot_dimension_numbers<[1], [0], [0], [1], [0, 0, 1, 1], [], []>} : vector<8x8xf32>, vector<8x128xf32>, vector<8x128xf32> -> vector<8x128xf32>
    %506 = arith.addf %501, %505 : vector<8x128xf32>
    %507 = arith.addf %506, %463 : vector<8x128xf32>
    %508 = arith.addf %507, %411 : vector<8x128xf32>
    %cst_218 = arith.constant 0.000000e+00 : f32
    %509 = vector.broadcast %cst_218 : f32 to vector<8x128xf32>
    %510 = arith.maximumf %508, %509 : vector<8x128xf32>
    %511 = vector.broadcast %2 : vector<1x128xf32> to vector<8x128xf32>
    %512 = arith.mulf %510, %511 : vector<8x128xf32>
    %c0_219 = arith.constant 0 : index
    %c0_220 = arith.constant 0 : index
    %513 = vector.load %arg14[%c0_219, %c0_220] : memref<128x128xf32, #tpu.memory_space<vmem>>, vector<128x128xf32>
    %cst_221 = arith.constant dense<0.000000e+00> : vector<8x128xf32>
    %514 = tpu.matmul %512, %513, %cst_221 {dimension_numbers = #tpu.dot_dimension_numbers<[1], [0], [0], [1], [0, 0, 1, 1], [], []>} : vector<8x128xf32>, vector<128x128xf32>, vector<8x128xf32> -> vector<8x128xf32>
    %c0_222 = arith.constant 0 : index
    %c0_223 = arith.constant 0 : index
    %515 = vector.load %arg29[%c0_222, %c0_223] : memref<8x128xf32, #tpu.memory_space<vmem>>, vector<8x128xf32>
    tpu.vector_store %arg29[%c0_222, %c0_223], %514 {strides = array<i32>} : memref<8x128xf32, #tpu.memory_space<vmem>>, vector<8x128xf32>,
    return
  }
  func.func @transform_0(%arg0: i32) -> (i32, i32) {
    %c0_i32 = arith.constant 0 : i32
    %c0_i32_0 = arith.constant 0 : i32
    %c0_i32_1 = arith.constant 0 : i32
    return %c0_i32, %c0_i32_0 : i32, i32
  }
  func.func @transform_1(%arg0: i32) -> (i32, i32) {
    %c0_i32 = arith.constant 0 : i32
    %c0_i32_0 = arith.constant 0 : i32
    %c0_i32_1 = arith.constant 0 : i32
    return %c0_i32, %c0_i32_0 : i32, i32
  }
  func.func @transform_2(%arg0: i32) -> (i32, i32) {
    %c0_i32 = arith.constant 0 : i32
    %c0_i32_0 = arith.constant 0 : i32
    %c0_i32_1 = arith.constant 0 : i32
    return %c0_i32, %c0_i32_0 : i32, i32
  }
  func.func @transform_3(%arg0: i32) -> (i32, i32) {
    %c0_i32 = arith.constant 0 : i32
    %c0_i32_0 = arith.constant 0 : i32
    %c0_i32_1 = arith.constant 0 : i32
    return %c0_i32, %c0_i32_0 : i32, i32
  }
  func.func @transform_4(%arg0: i32) -> (i32, i32, i32) {
    %c0_i32 = arith.constant 0 : i32
    %c0_i32_0 = arith.constant 0 : i32
    %c0_i32_1 = arith.constant 0 : i32
    %c0_i32_2 = arith.constant 0 : i32
    return %c0_i32, %c0_i32_0, %c0_i32_1 : i32, i32, i32
  }
  func.func @transform_5(%arg0: i32) -> (i32, i32) {
    %c0_i32 = arith.constant 0 : i32
    %c0_i32_0 = arith.constant 0 : i32
    %c0_i32_1 = arith.constant 0 : i32
    return %c0_i32, %c0_i32_0 : i32, i32
  }
  func.func @transform_6(%arg0: i32) -> (i32, i32, i32) {
    %c0_i32 = arith.constant 0 : i32
    %c0_i32_0 = arith.constant 0 : i32
    %c0_i32_1 = arith.constant 0 : i32
    %c0_i32_2 = arith.constant 0 : i32
    return %c0_i32, %c0_i32_0, %c0_i32_1 : i32, i32, i32
  }
  func.func @transform_7(%arg0: i32) -> (i32, i32) {
    %c0_i32 = arith.constant 0 : i32
    %c0_i32_0 = arith.constant 0 : i32
    %c0_i32_1 = arith.constant 0 : i32
    return %c0_i32, %c0_i32_0 : i32, i32
  }
  func.func @transform_8(%arg0: i32) -> (i32, i32, i32) {
    %c0_i32 = arith.constant 0 : i32
    %c0_i32_0 = arith.constant 0 : i32
    %c0_i32_1 = arith.constant 0 : i32
    %c0_i32_2 = arith.constant 0 : i32
    return %c0_i32, %c0_i32_0, %c0_i32_1 : i32, i32, i32
  }
  func.func @transform_9(%arg0: i32) -> (i32, i32) {
    %c0_i32 = arith.constant 0 : i32
    %c0_i32_0 = arith.constant 0 : i32
    %c0_i32_1 = arith.constant 0 : i32
    return %c0_i32, %c0_i32_0 : i32, i32
  }
  func.func @transform_10(%arg0: i32) -> (i32, i32) {
    %c0_i32 = arith.constant 0 : i32
    %c0_i32_0 = arith.constant 0 : i32
    %c0_i32_1 = arith.constant 0 : i32
    return %c0_i32, %c0_i32_0 : i32, i32
  }
  func.func @transform_11(%arg0: i32) -> (i32, i32) {
    %c0_i32 = arith.constant 0 : i32
    %c0_i32_0 = arith.constant 0 : i32
    %c0_i32_1 = arith.constant 0 : i32
    return %c0_i32, %c0_i32_0 : i32, i32
  }
  func.func @transform_12(%arg0: i32) -> (i32, i32) {
    %c0_i32 = arith.constant 0 : i32
    %c0_i32_0 = arith.constant 0 : i32
    %c0_i32_1 = arith.constant 0 : i32
    return %c0_i32, %c0_i32_0 : i32, i32
  }
  func.func @transform_13(%arg0: i32) -> (i32, i32) {
    %c0_i32 = arith.constant 0 : i32
    %c0_i32_0 = arith.constant 0 : i32
    %c0_i32_1 = arith.constant 0 : i32
    return %c0_i32, %c0_i32_0 : i32, i32
  }
  func.func @transform_14(%arg0: i32) -> (i32, i32) {
    %c0_i32 = arith.constant 0 : i32
    %c0_i32_0 = arith.constant 0 : i32
    %c0_i32_1 = arith.constant 0 : i32
    return %c0_i32, %c0_i32_0 : i32, i32
  }
  func.func @transform_15(%arg0: i32) -> (i32, i32, i32) {
    %c0_i32 = arith.constant 0 : i32
    %c0_i32_0 = arith.constant 0 : i32
    %c0_i32_1 = arith.constant 0 : i32
    %c0_i32_2 = arith.constant 0 : i32
    return %c0_i32, %c0_i32_0, %c0_i32_1 : i32, i32, i32
  }
  func.func @transform_16(%arg0: i32) -> (i32, i32) {
    %c0_i32 = arith.constant 0 : i32
    %c0_i32_0 = arith.constant 0 : i32
    %c0_i32_1 = arith.constant 0 : i32
    return %c0_i32, %c0_i32_0 : i32, i32
  }
  func.func @transform_17(%arg0: i32) -> (i32, i32, i32) {
    %c0_i32 = arith.constant 0 : i32
    %c0_i32_0 = arith.constant 0 : i32
    %c0_i32_1 = arith.constant 0 : i32
    %c0_i32_2 = arith.constant 0 : i32
    return %c0_i32, %c0_i32_0, %c0_i32_1 : i32, i32, i32
  }
  func.func @transform_18(%arg0: i32) -> (i32, i32) {
    %c0_i32 = arith.constant 0 : i32
    %c0_i32_0 = arith.constant 0 : i32
    %c0_i32_1 = arith.constant 0 : i32
    return %c0_i32, %c0_i32_0 : i32, i32
  }
  func.func @transform_19(%arg0: i32) -> (i32, i32, i32) {
    %c0_i32 = arith.constant 0 : i32
    %c0_i32_0 = arith.constant 0 : i32
    %c0_i32_1 = arith.constant 0 : i32
    %c0_i32_2 = arith.constant 0 : i32
    return %c0_i32, %c0_i32_0, %c0_i32_1 : i32, i32, i32
  }
  func.func @transform_20(%arg0: i32) -> (i32, i32) {
    %c0_i32 = arith.constant 0 : i32
    %c0_i32_0 = arith.constant 0 : i32
    %c0_i32_1 = arith.constant 0 : i32
    return %c0_i32, %c0_i32_0 : i32, i32
  }
  func.func @transform_21(%arg0: i32) -> (i32, i32, i32) {
    %c0_i32 = arith.constant 0 : i32
    %c0_i32_0 = arith.constant 0 : i32
    %c0_i32_1 = arith.constant 0 : i32
    %c0_i32_2 = arith.constant 0 : i32
    return %c0_i32, %c0_i32_0, %c0_i32_1 : i32, i32, i32
  }
  func.func @transform_22(%arg0: i32) -> (i32, i32) {
    %c0_i32 = arith.constant 0 : i32
    %c0_i32_0 = arith.constant 0 : i32
    %c0_i32_1 = arith.constant 0 : i32
    return %c0_i32, %c0_i32_0 : i32, i32
  }
  func.func @transform_23(%arg0: i32) -> (i32, i32, i32) {
    %c0_i32 = arith.constant 0 : i32
    %c0_i32_0 = arith.constant 0 : i32
    %c0_i32_1 = arith.constant 0 : i32
    %c0_i32_2 = arith.constant 0 : i32
    return %c0_i32, %c0_i32_0, %c0_i32_1 : i32, i32, i32
  }
  func.func @transform_24(%arg0: i32) -> (i32, i32) {
    %c0_i32 = arith.constant 0 : i32
    %c0_i32_0 = arith.constant 0 : i32
    %c0_i32_1 = arith.constant 0 : i32
    return %c0_i32, %c0_i32_0 : i32, i32
  }
  func.func @transform_25(%arg0: i32) -> (i32, i32, i32) {
    %c0_i32 = arith.constant 0 : i32
    %c0_i32_0 = arith.constant 0 : i32
    %c0_i32_1 = arith.constant 0 : i32
    %c0_i32_2 = arith.constant 0 : i32
    return %c0_i32, %c0_i32_0, %c0_i32_1 : i32, i32, i32
  }
  func.func @transform_26(%arg0: i32) -> (i32, i32) {
    %c0_i32 = arith.constant 0 : i32
    %c0_i32_0 = arith.constant 0 : i32
    %c0_i32_1 = arith.constant 0 : i32
    return %c0_i32, %c0_i32_0 : i32, i32
  }
  func.func @transform_27(%arg0: i32) -> (i32, i32, i32) {
    %c0_i32 = arith.constant 0 : i32
    %c0_i32_0 = arith.constant 0 : i32
    %c0_i32_1 = arith.constant 0 : i32
    %c0_i32_2 = arith.constant 0 : i32
    return %c0_i32, %c0_i32_0, %c0_i32_1 : i32, i32, i32
  }
  func.func @transform_28(%arg0: i32) -> (i32, i32) {
    %c0_i32 = arith.constant 0 : i32
    %c0_i32_0 = arith.constant 0 : i32
    %c0_i32_1 = arith.constant 0 : i32
    return %c0_i32, %c0_i32_0 : i32, i32
  }
}

</mosaic_0001>

<bundles_post_ra>
// kernel: forward.1
= control target key start
LH: loop header
LB: loop body
LE: loop exit
PB: predicated region body
PF: predicated region fallthrough
CT: control target
= control target key end

     0   :  { %s13909_s0 = inlined_call_operand.vmem [shape: f32[4,768], index: 0, kind: input, shape index: {}]   ;;  %s13910_s1 = inlined_call_operand.vmem [shape: f32[256,128], index: 1, kind: input, shape index: {}]   ;;  %s13911_s2 = inlined_call_operand.vmem [shape: f32[768,256], index: 2, kind: input, shape index: {}]   ;;  %s13912_s3 = inlined_call_operand.hbm [shape: f32[8,128], index: 3, kind: input, shape index: {}]   ;;  %s13913_s4 = inlined_call_operand.vmem [shape: f32[9,8,4], index: 4, kind: input, shape index: {}]   ;;  %s13914_s5 = inlined_call_operand.hbm [shape: f32[8,128], index: 5, kind: input, shape index: {}]   ;;  %s13915_s6 = inlined_call_operand.vmem [shape: f32[9,8,8], index: 6, kind: input, shape index: {}]   ;;  %s13916_s7 = inlined_call_operand.hbm [shape: f32[8,128], index: 7, kind: input, shape index: {}]   ;;  %s13917_s8 = inlined_call_operand.vmem [shape: f32[9,8,4], index: 8, kind: input, shape index: {}]   ;;  %s13918_s9 = inlined_call_operand.vmem [shape: f32[1,256], index: 9, kind: input, shape index: {}]   ;;  %s13919_s10 = inlined_call_operand.hbm [shape: f32[1,128], index: 10, kind: input, shape index: {}]   ;;  %s13920_s11 = inlined_call_operand.hbm [shape: f32[1,128], index: 11, kind: input, shape index: {}]   ;;  %s13921_s12 = inlined_call_operand.vmem [shape: f32[128,128], index: 12, kind: input, shape index: {}]   ;;  %s13922_s13 = inlined_call_operand.vmem [shape: f32[128,128], index: 13, kind: input, shape index: {}]   ;;  %s13923_s14 = inlined_call_operand.hbm [shape: f32[4,256], index: 14, kind: input, shape index: {}]   ;;  %s13924_s15 = inlined_call_operand.vmem [shape: f32[9,4,4], index: 15, kind: input, shape index: {}]   ;;  %s13925_s16 = inlined_call_operand.hbm [shape: f32[4,256], index: 16, kind: input, shape index: {}]   ;;  %s13926_s17 = inlined_call_operand.vmem [shape: f32[9,4,4], index: 17, kind: input, shape index: {}]   ;;  %s13927_s18 = inlined_call_operand.hbm [shape: f32[8,128], index: 18, kind: input, shape index: {}]   ;;  %s13928_s19 = inlined_call_operand.vmem [shape: f32[9,8,8], index: 19, kind: input, shape index: {}]   ;;  %s13929_s20 = inlined_call_operand.hbm [shape: f32[8,128], index: 20, kind: input, shape index: {}]   ;;  %s13930_s21 = inlined_call_operand.vmem [shape: f32[9,8,8], index: 21, kind: input, shape index: {}]   ;;  %s13931_s22 = inlined_call_operand.hbm [shape: f32[8,128], index: 22, kind: input, shape index: {}]   ;;  %s13932_s23 = inlined_call_operand.vmem [shape: f32[9,8,8], index: 23, kind: input, shape index: {}]   ;;  %s13933_s24 = inlined_call_operand.hbm [shape: f32[8,128], index: 24, kind: input, shape index: {}]   ;;  %s13934_s25 = inlined_call_operand.vmem [shape: f32[9,8,8], index: 25, kind: input, shape index: {}]   ;;  %s13935_s26 = inlined_call_operand.hbm [shape: f32[4,256], index: 26, kind: input, shape index: {}]   ;;  %s13936_s27 = inlined_call_operand.vmem [shape: f32[9,4,4], index: 27, kind: input, shape index: {}]   ;;  %s13937_s28 = inlined_call_operand.vmem [shape: f32[8,128], index: 28, kind: output, shape index: {}]  }
   0x1   :  { %13950 = sst [smem:[#allocation28_spill]] %s13909_s0 }
   0x2   :  { %13951 = sst [smem:[#allocation29_spill]] %s13910_s1 }
   0x3   :  { %13952 = sst [smem:[#allocation30_spill]] %s13911_s2 }
   0x4   :  { %13953 = sst [smem:[#allocation31_spill]] %s13912_s3 }
   0x5   :  { %13954 = sst [smem:[#allocation32_spill]] %s13913_s4 }
   0x6   :  { %13955 = sst [smem:[#allocation33_spill]] %s13914_s5 }
   0x7   :  { %13956 = sst [smem:[#allocation34_spill]] %s13915_s6 }
   0x8   :  { %13957 = sst [smem:[#allocation35_spill]] %s13916_s7 }
   0x9   :  { %13958 = sst [smem:[#allocation36_spill]] %s13917_s8 }
   0xa   :  { %13959 = sst [smem:[#allocation37_spill]] %s13918_s9 }
   0xb   :  { %13960 = sst [smem:[#allocation38_spill]] %s13919_s10 }
   0xc   :  { %13961 = sst [smem:[#allocation39_spill]] %s13920_s11 }
   0xd   :  { %13962 = sst [smem:[#allocation40_spill]] %s13921_s12 }
   0xe   :  { %33 = vsyncpa [#allocation3], 0 }
   0xf   :  { %34 = vsyncpa [#allocation5], 0 }
  0x10   :  { %35 = vsyncpa [#allocation8], 0 }
  0x11   :  { %36 = vsyncpa [#allocation11], 0 }
  0x12   :  { %37 = vsyncpa [#allocation14], 0 }
  0x13   :  { %38 = vsyncpa [#allocation17], 0 }
  0x14   :  { %39 = vsyncpa [#allocation20], 0  ;;  %s11376_s8 = smov [#allocation4]   ;;  %s11377_s9 = smov [#allocation7]  }
  0x15   :  { %s64_s5 = sshll.u32 %s11376_s8, 4  ;;  %s90_s30 = sshll.u32 %s11377_s9, 4  ;;  %s65_s5 = int_to_ptr.vmem [resolvable:$true] %s64_s5  ;;  %s91_s30 = int_to_ptr.vmem [resolvable:$true] %s90_s30 }
  0x16   :  { %s13963_s10 = sld [smem:[#allocation33_spill]] }
  0x1c   :  { %s11098_s0 = scalar_lea.hbm %s13963_s10, 128 }
  0x1d   :  { %p11099_p0 = scmp.ne.s32.totalorder %s13963_s10, %s11098_s0  ;;  %p11102_p1 = scmp.lt.u32.totalorder %s11098_s0, %s13963_s10 }
  0x1f   :  { %p11104_p2 = pnand %p11102_p1, %p11099_p0 }
  0x21   :  { %11107 = shalt.err (!%p11104_p2)
}
  0x22   :  { %s11108_s12 = scalar_lea.vmem %s65_s5, 128  ;;  %p11113_p4 = scmp.lt.s32.totalorder %s65_s5, %s65_s5 }
  0x23   :  { %p11109_p3 = scmp.ne.s32.totalorder %s65_s5, %s11108_s12  ;;  %p11114_p5 = scmp.lt.s32.totalorder %s11108_s12, %s11108_s12 }
  0x25   :  { %p11115_p6 = por %p11114_p5, %p11113_p4 }
  0x27   :  { %p11116_p7 = pnand %p11115_p6, %p11109_p3 }
  0x29   :  { %11119 = shalt.err (!%p11116_p7)
}
  0x2a   :  { %67 = dma.hbm_to_vmem [thread:$0]  %s13963_s10, 128, %s65_s5, [#allocation5]  }
  0x2b   :  { %s13964_s3 = sld [smem:[#allocation38_spill]] }
  0x31   :  { %s11120_s6 = scalar_lea.hbm %s13964_s3, 16 }
  0x32   :  { %p11121_p8 = scmp.ne.s32.totalorder %s13964_s3, %s11120_s6  ;;  %p11124_p9 = scmp.lt.u32.totalorder %s11120_s6, %s13964_s3 }
  0x34   :  { %p11126_p10 = pnand %p11124_p9, %p11121_p8 }
  0x36   :  { %11129 = shalt.err (!%p11126_p10)
}
  0x37   :  { %s11130_s7 = scalar_lea.vmem %s91_s30, 16  ;;  %s11134_s12 = scalar_lea.vmem %s91_s30, 32 }
  0x38   :  { %p11131_p11 = scmp.ne.s32.totalorder %s91_s30, %s11130_s7  ;;  %p11135_p12 = scmp.lt.s32.totalorder %s91_s30, %s91_s30 }
  0x39   :  { %p11136_p13 = scmp.lt.s32.totalorder %s11134_s12, %s11130_s7 }
  0x3b   :  { %p11137_p0 = por %p11136_p13, %p11135_p12 }
  0x3d   :  { %p11138_p1 = pnand %p11137_p0, %p11131_p11 }
  0x3f   :  { %11141 = shalt.err (!%p11138_p1)
}
  0x40   :  { %93 = dma.hbm_to_vmem [thread:$0]  %s13964_s3, 16, %s91_s30, [#allocation8]  }
  0x41   :  { %s11378_s1 = smov [#allocation10]   ;;  %s11379_s8 = smov [#allocation13]  }
  0x42   :  { %s114_s4 = sshll.u32 %s11378_s1, 4  ;;  %s138_s9 = sshll.u32 %s11379_s8, 4  ;;  %s115_s4 = int_to_ptr.vmem [resolvable:$true] %s114_s4  ;;  %s139_s9 = int_to_ptr.vmem [resolvable:$true] %s138_s9 }
  0x43   :  { %s11142_s29 = scalar_lea.hbm %s13923_s14, 128 }
  0x44   :  { %p11143_p2 = scmp.ne.s32.totalorder %s13923_s14, %s11142_s29  ;;  %p11146_p3 = scmp.lt.u32.totalorder %s11142_s29, %s13923_s14 }
  0x46   :  { %p11148_p4 = pnand %p11146_p3, %p11143_p2 }
  0x48   :  { %11151 = shalt.err (!%p11148_p4)
}
  0x49   :  { %s11152_s30 = scalar_lea.vmem %s115_s4, 128  ;;  %p11157_p6 = scmp.lt.s32.totalorder %s115_s4, %s115_s4 }
  0x4a   :  { %p11153_p5 = scmp.ne.s32.totalorder %s115_s4, %s11152_s30  ;;  %p11158_p7 = scmp.lt.s32.totalorder %s11152_s30, %s11152_s30 }
  0x4c   :  { %p11159_p8 = por %p11158_p7, %p11157_p6 }
  0x4e   :  { %p11160_p9 = pnand %p11159_p8, %p11153_p5 }
  0x50   :  { %11163 = shalt.err (!%p11160_p9)
}
  0x51   :  { %117 = dma.hbm_to_vmem [thread:$0]  %s13923_s14, 128, %s115_s4, [#allocation11]  }
  0x52   :  { %s11164_s8 = scalar_lea.hbm %s13927_s18, 128 }
  0x53   :  { %p11165_p10 = scmp.ne.s32.totalorder %s13927_s18, %s11164_s8  ;;  %p11168_p11 = scmp.lt.u32.totalorder %s11164_s8, %s13927_s18 }
  0x55   :  { %p11170_p12 = pnand %p11168_p11, %p11165_p10 }
  0x57   :  { %11173 = shalt.err (!%p11170_p12)
}
  0x58   :  { %s11174_s2 = scalar_lea.vmem %s139_s9, 128  ;;  %p11179_p0 = scmp.lt.s32.totalorder %s139_s9, %s139_s9 }
  0x59   :  { %p11175_p13 = scmp.ne.s32.totalorder %s139_s9, %s11174_s2  ;;  %p11180_p1 = scmp.lt.s32.totalorder %s11174_s2, %s11174_s2 }
  0x5b   :  { %p11181_p2 = por %p11180_p1, %p11179_p0 }
  0x5d   :  { %p11182_p3 = pnand %p11181_p2, %p11175_p13 }
  0x5f   :  { %11185 = shalt.err (!%p11182_p3)
}
  0x60   :  { %141 = dma.hbm_to_vmem [thread:$0]  %s13927_s18, 128, %s139_s9, [#allocation14]  }
  0x61   :  { %s11380_s7 = smov [#allocation16]   ;;  %s11381_s30 = smov [#allocation2]  }
  0x62   :  { %s162_s12 = sshll.u32 %s11380_s7, 4  ;;  %s52_s3 = sshll.u32 %s11381_s30, 4  ;;  %s163_s12 = int_to_ptr.vmem [resolvable:$true] %s162_s12  ;;  %s53_s3 = int_to_ptr.vmem [resolvable:$true] %s52_s3 }
  0x63   :  { %s11186_s1 = scalar_lea.hbm %s13931_s22, 128 }
  0x64   :  { %p11187_p4 = scmp.ne.s32.totalorder %s13931_s22, %s11186_s1  ;;  %p11190_p5 = scmp.lt.u32.totalorder %s11186_s1, %s13931_s22 }
  0x66   :  { %p11192_p6 = pnand %p11190_p5, %p11187_p4 }
  0x68   :  { %11195 = shalt.err (!%p11192_p6)
}
  0x69   :  { %s11196_s18 = scalar_lea.vmem %s163_s12, 128  ;;  %p11201_p8 = scmp.lt.s32.totalorder %s163_s12, %s163_s12 }
  0x6a   :  { %p11197_p7 = scmp.ne.s32.totalorder %s163_s12, %s11196_s18  ;;  %p11202_p9 = scmp.lt.s32.totalorder %s11196_s18, %s11196_s18 }
  0x6c   :  { %p11203_p10 = por %p11202_p9, %p11201_p8 }
  0x6e   :  { %p11204_p11 = pnand %p11203_p10, %p11197_p7 }
  0x70   :  { %11207 = shalt.err (!%p11204_p11)
}
  0x71   :  { %165 = dma.hbm_to_vmem [thread:$0]  %s13931_s22, 128, %s163_s12, [#allocation17]  }
  0x72   :  { %s13965_s4 = sld [smem:[#allocation31_spill]] }
  0x78   :  { %s11208_s7 = scalar_lea.hbm %s13965_s4, 128 }
  0x79   :  { %p11209_p12 = scmp.ne.s32.totalorder %s13965_s4, %s11208_s7  ;;  %p11212_p13 = scmp.lt.u32.totalorder %s11208_s7, %s13965_s4 }
  0x7b   :  { %p11214_p0 = pnand %p11212_p13, %p11209_p12 }
  0x7d   :  { %11217 = shalt.err (!%p11214_p0)
}
  0x7e   :  { %s11218_s8 = scalar_lea.vmem %s53_s3, 128  ;;  %p11223_p2 = scmp.lt.s32.totalorder %s53_s3, %s53_s3 }
  0x7f   :  { %p11219_p1 = scmp.ne.s32.totalorder %s53_s3, %s11218_s8  ;;  %p11224_p3 = scmp.lt.s32.totalorder %s11218_s8, %s11218_s8 }
  0x81   :  { %p11225_p4 = por %p11224_p3, %p11223_p2 }
  0x83   :  { %p11226_p5 = pnand %p11225_p4, %p11219_p1 }
  0x85   :  { %11229 = shalt.err (!%p11226_p5)
}
  0x86   :  { %55 = dma.hbm_to_vmem [thread:$0]  %s13965_s4, 128, %s53_s3, [#allocation3]  }
  0x87   :  { %s11382_s6 = smov [#allocation6]   ;;  %s11383_s29 = smov [#allocation9]  }
  0x88   :  { %s76_s11 = sshll.u32 %s11382_s6, 4  ;;  %s100_s18 = sshll.u32 %s11383_s29, 4  ;;  %s77_s11 = int_to_ptr.vmem [resolvable:$true] %s76_s11  ;;  %s101_s18 = int_to_ptr.vmem [resolvable:$true] %s100_s18 }
  0x89   :  { %s13966_s2 = sld [smem:[#allocation35_spill]] }
  0x8f   :  { %s11230_s14 = scalar_lea.hbm %s13966_s2, 128 }
  0x90   :  { %p11231_p6 = scmp.ne.s32.totalorder %s13966_s2, %s11230_s14  ;;  %p11234_p7 = scmp.lt.u32.totalorder %s11230_s14, %s13966_s2 }
  0x92   :  { %p11236_p8 = pnand %p11234_p7, %p11231_p6 }
  0x94   :  { %11239 = shalt.err (!%p11236_p8)
}
  0x95   :  { %s11240_s3 = scalar_lea.vmem %s77_s11, 128  ;;  %p11245_p10 = scmp.lt.s32.totalorder %s77_s11, %s77_s11 }
  0x96   :  { %p11241_p9 = scmp.ne.s32.totalorder %s77_s11, %s11240_s3  ;;  %p11246_p11 = scmp.lt.s32.totalorder %s11240_s3, %s11240_s3 }
  0x98   :  { %p11247_p12 = por %p11246_p11, %p11245_p10 }
  0x9a   :  { %p11248_p13 = pnand %p11247_p12, %p11241_p9 }
  0x9c   :  { %11251 = shalt.err (!%p11248_p13)
}
  0x9d   :  { %79 = dma.hbm_to_vmem [thread:$0]  %s13966_s2, 128, %s77_s11, [#allocation5]  }
  0x9e   :  { %s13967_s12 = sld [smem:[#allocation39_spill]] }
  0xa4   :  { %s11252_s6 = scalar_lea.hbm %s13967_s12, 16 }
  0xa5   :  { %p11253_p0 = scmp.ne.s32.totalorder %s13967_s12, %s11252_s6  ;;  %p11256_p1 = scmp.lt.u32.totalorder %s11252_s6, %s13967_s12 }
  0xa7   :  { %p11258_p2 = pnand %p11256_p1, %p11253_p0 }
  0xa9   :  { %11261 = shalt.err (!%p11258_p2)
}
  0xaa   :  { %s11262_s7 = scalar_lea.vmem %s101_s18, 16  ;;  %s11266_s30 = scalar_lea.vmem %s101_s18, 32 }
  0xab   :  { %p11263_p3 = scmp.ne.s32.totalorder %s101_s18, %s11262_s7  ;;  %p11267_p4 = scmp.lt.s32.totalorder %s101_s18, %s101_s18 }
  0xac   :  { %p11268_p5 = scmp.lt.s32.totalorder %s11266_s30, %s11262_s7 }
  0xae   :  { %p11269_p6 = por %p11268_p5, %p11267_p4 }
  0xb0   :  { %p11270_p7 = pnand %p11269_p6, %p11263_p3 }
  0xb2   :  { %11273 = shalt.err (!%p11270_p7)
}
  0xb3   :  { %103 = dma.hbm_to_vmem [thread:$0]  %s13967_s12, 16, %s101_s18, [#allocation8]  }
  0xb4   :  { %s11384_s5 = smov [#allocation12]   ;;  %s11385_s3 = smov [#allocation15]  }
  0xb5   :  { %s126_s10 = sshll.u32 %s11384_s5, 4  ;;  %s150_s4 = sshll.u32 %s11385_s3, 4  ;;  %s127_s10 = int_to_ptr.vmem [resolvable:$true] %s126_s10  ;;  %s151_s4 = int_to_ptr.vmem [resolvable:$true] %s150_s4 }
  0xb6   :  { %s11274_s22 = scalar_lea.hbm %s13925_s16, 128 }
  0xb7   :  { %p11275_p8 = scmp.ne.s32.totalorder %s13925_s16, %s11274_s22  ;;  %p11278_p9 = scmp.lt.u32.totalorder %s11274_s22, %s13925_s16 }
  0xb9   :  { %p11280_p10 = pnand %p11278_p9, %p11275_p8 }
  0xbb   :  { %11283 = shalt.err (!%p11280_p10)
}
  0xbc   :  { %s11284_s18 = scalar_lea.vmem %s127_s10, 128  ;;  %p11289_p12 = scmp.lt.s32.totalorder %s127_s10, %s127_s10 }
  0xbd   :  { %p11285_p11 = scmp.ne.s32.totalorder %s127_s10, %s11284_s18  ;;  %p11290_p13 = scmp.lt.s32.totalorder %s11284_s18, %s11284_s18 }
  0xbf   :  { %p11291_p0 = por %p11290_p13, %p11289_p12 }
  0xc1   :  { %p11292_p1 = pnand %p11291_p0, %p11285_p11 }
  0xc3   :  { %11295 = shalt.err (!%p11292_p1)
}
  0xc4   :  { %129 = dma.hbm_to_vmem [thread:$0]  %s13925_s16, 128, %s127_s10, [#allocation11]  }
  0xc5   :  { %s11296_s11 = scalar_lea.hbm %s13929_s20, 128 }
  0xc6   :  { %p11297_p2 = scmp.ne.s32.totalorder %s13929_s20, %s11296_s11  ;;  %p11300_p3 = scmp.lt.u32.totalorder %s11296_s11, %s13929_s20 }
  0xc8   :  { %p11302_p4 = pnand %p11300_p3, %p11297_p2 }
  0xca   :  { %11305 = shalt.err (!%p11302_p4)
}
  0xcb   :  { %s11306_s8 = scalar_lea.vmem %s151_s4, 128  ;;  %p11311_p6 = scmp.lt.s32.totalorder %s151_s4, %s151_s4 }
  0xcc   :  { %p11307_p5 = scmp.ne.s32.totalorder %s151_s4, %s11306_s8  ;;  %p11312_p7 = scmp.lt.s32.totalorder %s11306_s8, %s11306_s8 }
  0xce   :  { %p11313_p8 = por %p11312_p7, %p11311_p6 }
  0xd0   :  { %p11314_p9 = pnand %p11313_p8, %p11307_p5 }
  0xd2   :  { %11317 = shalt.err (!%p11314_p9)
}
  0xd3   :  { %153 = dma.hbm_to_vmem [thread:$0]  %s13929_s20, 128, %s151_s4, [#allocation14]  }
  0xd4   :  { %s11386_s22 = smov [#allocation18]   ;;  %s11387_s29 = smov [#allocation19]  }
  0xd5   :  { %s174_s6 = sshll.u32 %s11386_s22, 4  ;;  %s186_s9 = sshll.u32 %s11387_s29, 4  ;;  %s175_s6 = int_to_ptr.vmem [resolvable:$true] %s174_s6  ;;  %s187_s9 = int_to_ptr.vmem [resolvable:$true] %s186_s9 }
  0xd6   :  { %s11318_s12 = scalar_lea.hbm %s13933_s24, 128 }
  0xd7   :  { %p11319_p10 = scmp.ne.s32.totalorder %s13933_s24, %s11318_s12  ;;  %p11322_p11 = scmp.lt.u32.totalorder %s11318_s12, %s13933_s24 }
  0xd9   :  { %p11324_p12 = pnand %p11322_p11, %p11319_p10 }
  0xdb   :  { %11327 = shalt.err (!%p11324_p12)
}
  0xdc   :  { %s11328_s20 = scalar_lea.vmem %s175_s6, 128  ;;  %p11333_p0 = scmp.lt.s32.totalorder %s175_s6, %s175_s6 }
  0xdd   :  { %p11329_p13 = scmp.ne.s32.totalorder %s175_s6, %s11328_s20  ;;  %p11334_p1 = scmp.lt.s32.totalorder %s11328_s20, %s11328_s20 }
  0xdf   :  { %p11335_p2 = por %p11334_p1, %p11333_p0 }
  0xe1   :  { %p11336_p3 = pnand %p11335_p2, %p11329_p13 }
  0xe3   :  { %11339 = shalt.err (!%p11336_p3)
}
  0xe4   :  { %177 = dma.hbm_to_vmem [thread:$0]  %s13933_s24, 128, %s175_s6, [#allocation17]  }
  0xe5   :  { %s11340_s1 = scalar_lea.hbm %s13935_s26, 128 }
  0xe6   :  { %p11341_p4 = scmp.ne.s32.totalorder %s13935_s26, %s11340_s1  ;;  %p11344_p5 = scmp.lt.u32.totalorder %s11340_s1, %s13935_s26 }
  0xe8   :  { %p11346_p6 = pnand %p11344_p5, %p11341_p4 }
  0xea   :  { %11349 = shalt.err (!%p11346_p6)
}
  0xeb   :  { %s11350_s29 = scalar_lea.vmem %s187_s9, 128  ;;  %p11355_p8 = scmp.lt.s32.totalorder %s187_s9, %s187_s9 }
  0xec   :  { %p11351_p7 = scmp.ne.s32.totalorder %s187_s9, %s11350_s29  ;;  %p11356_p9 = scmp.lt.s32.totalorder %s11350_s29, %s11350_s29 }
  0xee   :  { %p11357_p10 = por %p11356_p9, %p11355_p8 }
  0xf0   :  { %p11358_p11 = pnand %p11357_p10, %p11351_p7 }
  0xf2   :  { %11361 = shalt.err (!%p11358_p11)
}
  0xf3   :  { %189 = dma.hbm_to_vmem [thread:$0]  %s13935_s26, 128, %s187_s9, [#allocation20]  }
  0xf4   :  { %11362 = dma.done.wait [#allocation3], 128  }
  0xf5   :  { %11363 = vsyncadd [#allocation3], 4294967168 }
  0xf6   :  { %11364 = dma.done.wait [#allocation5], 256  }
  0xf7   :  { %11365 = vsyncadd [#allocation5], 4294967040 }
  0xf8   :  { %11366 = dma.done.wait [#allocation8], 32  }
  0xf9   :  { %11367 = vsyncadd [#allocation8], 4294967264 }
  0xfa   :  { %11368 = dma.done.wait [#allocation11], 256  }
  0xfb   :  { %11369 = vsyncadd [#allocation11], 4294967040 }
  0xfc   :  { %11370 = dma.done.wait [#allocation14], 256  }
  0xfd   :  { %11371 = vsyncadd [#allocation14], 4294967040 }
  0xfe   :  { %11372 = dma.done.wait [#allocation17], 256  }
  0xff   :  { %11373 = vsyncadd [#allocation17], 4294967040 }
 0x100   :  { %11374 = dma.done.wait [#allocation20], 128  }
 0x101   :  { %11375 = vsyncadd [#allocation20], 4294967168  ;;  %v11388_v0 = vmov 0.0   ;;  %s13968_s0 = sld [smem:[#allocation28_spill]]  ;;  %s11389_s14 = smov 17   ;;  %v489_v7 = vlaneseq  ;;  %vm521_vm1 = vcmask 1043456  }
 0x102   :  { %1091 = vmatprep.mubr.f32.mxu0 %v11388_v0  ;;  %604 = vmatprep.mubr.f32.mxu1 %v11388_v0  ;;  %s11390_s11 = smov 1   ;;  %s11391_s20 = smov 127   ;;  %v11820_v16 = vld [vmem:[%s13936_s27 + $0x8] sm:$0xf]  ;;  %vm517_vm2 = vcmask 31744  }
 0x103   :  { %s11392_s4 = smov 111   ;;  %s11393_s2 = smov 18   ;;  %v11806_v8 = vand.u32 127, %v489_v7  ;;  %v11853_v26 = vld [vmem:[%s13936_s27 + $0xc] sm:$0xf] }
 0x104   :  { %s11394_s5 = smov 110   ;;  %s11395_s3 = smov 19   ;;  %v11877_v33 = vld [vmem:[%s13936_s27 + $0x10] sm:$0xf]  ;;  %v11906_v41 = vld [vmem:[%s13936_s27 + $0x14] sm:$0xf] }
 0x105   :  { %s11396_s1 = smov 109   ;;  %vm999_vm0 = vcmp.lt.s32.totalorder %v11806_v8, 17  ;;  %vm1258_vm3 = vcmp.lt.s32.totalorder %v11806_v8, 1  ;;  %vm1751_vm4 = vcmp.lt.s32.totalorder %v11806_v8, 127  ;;  %vm2010_vm5 = vcmp.lt.s32.totalorder %v11806_v8, 111  ;;  %s13970_s29 = sld [smem:[#allocation37_spill]] }
 0x106   :  { %vm510_vm6 = vcmp.lt.s32.totalorder %v11806_v8, 18  ;;  %v11934_v50 = vld [vmem:[%s13936_s27 + $0x18] sm:$0xf]  ;;  %v459_v51 = vld [vmem:[%s13936_s27 + $0x4] sm:$0xf]  ;;  %vm2269_vm7 = vcmp.lt.s32.totalorder %v11806_v8, 110 }
 0x107   :  { %v11709_v1 = vld [vmem:[%s13968_s0 + $0x10] sm:$0xff]  ;;  %v11714_v2 = vld [vmem:[%s13968_s0] sm:$0xff]  ;;  %v11727_v4 = vld [vmem:[%s13968_s0 + $0x8] sm:$0xff]  ;;  %vm491_vm8 = vcmp.lt.s32.totalorder %v11806_v8, 19  ;;  %vm2528_vm9 = vcmp.lt.s32.totalorder %v11806_v8, 109  ;;  %s11398_s24 = smov 11  }
 0x108   :  { %995 = vrot.lane.b32.xlu1 %v11709_v1, %s11389_s14  ;;  %987 = vrot.lane.b32.xlu0 %v11714_v2, %s11389_s14  ;;  %v11722_v3 = vcombine.high %v11714_v2, %v11714_v2  ;;  %v11735_v5 = vcombine.high %v11709_v1, %v11709_v1  ;;  %v11739_v6 = vcombine.high %v11727_v4, %v11727_v4  ;;  %s11399_s6 = smov 9   ;;  %s11400_s26 = smov 119   ;;  %vm3027_vm10 = vcmp.lt.s32.totalorder %v11806_v8, 10 }
 0x109   :  { %s11401_s9 = smov 118   ;;  %s11402_s0 = smov 117   ;;  %vm3020_vm11 = vcmp.lt.s32.totalorder %v11806_v8, 11  ;;  %vm3194_vm12 = vcmp.lt.s32.totalorder %v11806_v8, 9  ;;  %vm3541_vm13 = vcmp.lt.s32.totalorder %v11806_v8, 119  ;;  %vm3630_vm14 = vcmp.lt.s32.totalorder %v11806_v8, 118 }
 0x10a   :  { %vm3719_vm15 = vcmp.lt.s32.totalorder %v11806_v8, 117  ;;  %s13972_s7 = sld [smem:[#allocation32_spill]]  ;;  %s13973_s12 = sld [smem:[#allocation36_spill]] }
 0x10b   :  { %s11404_s8 = smov 7   ;;  %s11405_s16 = smov 6  }
 0x10c   :  { %1246 = vrot.lane.b32.xlu1 %v11714_v2, %s11390_s11  ;;  %989 = vrot.lane.b32.xlu0 %v11722_v3, %s11389_s14  ;;  %s11406_s10 = smov 5   ;;  %s11407_s22 = smov 123  }
 0x10d   :  { %s11409_s18 = smov 122  }
 0x110   :  { %997 = vrot.lane.b32.xlu1 %v11735_v5, %s11389_s14  ;;  %993 = vrot.lane.b32.xlu0 %v11739_v6, %s11389_s14 }
 0x114   :  { %1256 = vrot.lane.b32.xlu1 %v11735_v5, %s11390_s11  ;;  %1248 = vrot.lane.b32.xlu0 %v11722_v3, %s11390_s11 }
 0x118   :  { %1252 = vrot.lane.b32.xlu1 %v11739_v6, %s11390_s11  ;;  %1254 = vrot.lane.b32.xlu0 %v11709_v1, %s11390_s11 }
 0x11c   :  { %1743 = vrot.lane.b32.xlu1 %v11727_v4, %s11391_s20  ;;  %1741 = vrot.lane.b32.xlu0 %v11722_v3, %s11391_s20 }
 0x120   :  { %1749 = vrot.lane.b32.xlu1 %v11735_v5, %s11391_s20  ;;  %1739 = vrot.lane.b32.xlu0 %v11714_v2, %s11391_s20 }
 0x124   :  { %2000 = vrot.lane.b32.xlu1 %v11722_v3, %s11392_s4  ;;  %1747 = vrot.lane.b32.xlu0 %v11709_v1, %s11391_s20 }
 0x128   :  { %1998 = vrot.lane.b32.xlu1 %v11714_v2, %s11392_s4  ;;  %2002 = vrot.lane.b32.xlu0 %v11727_v4, %s11392_s4 }
 0x12c   :  { %500 = vrot.lane.b32.xlu1 %v11722_v3, %s11393_s2  ;;  %498 = vrot.lane.b32.xlu0 %v11714_v2, %s11393_s2 }
 0x130   :  { %508 = vrot.lane.b32.xlu1 %v11735_v5, %s11393_s2  ;;  %2008 = vrot.lane.b32.xlu0 %v11735_v5, %s11392_s4 }
 0x134   :  { %502 = vrot.lane.b32.xlu1 %v11727_v4, %s11393_s2  ;;  %2006 = vrot.lane.b32.xlu0 %v11709_v1, %s11392_s4 }
 0x138   :  { %2259 = vrot.lane.b32.xlu1 %v11722_v3, %s11394_s5  ;;  %504 = vrot.lane.b32.xlu0 %v11739_v6, %s11393_s2 }
 0x13c   :  { %2257 = vrot.lane.b32.xlu1 %v11714_v2, %s11394_s5  ;;  %2261 = vrot.lane.b32.xlu0 %v11727_v4, %s11394_s5 }
 0x140   :  { %2267 = vrot.lane.b32.xlu1 %v11735_v5, %s11394_s5  ;;  %506 = vrot.lane.b32.xlu0 %v11709_v1, %s11393_s2  ;;  %s13975_s2 = sld [smem:[#allocation40_spill]] }
 0x144   :  { %477 = vrot.lane.b32.xlu1 %v11714_v2, %s11395_s3  ;;  %2265 = vrot.lane.b32.xlu0 %v11709_v1, %s11394_s5 }
 0x148   :  { %2518 = vrot.lane.b32.xlu1 %v11722_v3, %s11396_s1  ;;  %479 = vrot.lane.b32.xlu0 %v11722_v3, %s11395_s3 }
 0x14c   :  { %487 = vrot.lane.b32.xlu1 %v11735_v5, %s11395_s3  ;;  %2520 = vrot.lane.b32.xlu0 %v11727_v4, %s11396_s1 }
 0x150   :  { %481 = vrot.lane.b32.xlu1 %v11727_v4, %s11395_s3  ;;  %2516 = vrot.lane.b32.xlu0 %v11714_v2, %s11396_s1 }
 0x154   :  { %485 = vrot.lane.b32.xlu1 %v11709_v1, %s11395_s3  ;;  %483 = vrot.lane.b32.xlu0 %v11739_v6, %s11395_s3 }
 0x158   :  { %1250 = vrot.lane.b32.xlu1 %v11727_v4, %s11390_s11  ;;  %991 = vrot.lane.b32.xlu0 %v11727_v4, %s11389_s14 }
 0x15c   :  { %2004 = vrot.lane.b32.xlu1 %v11739_v6, %s11392_s4  ;;  %1745 = vrot.lane.b32.xlu0 %v11739_v6, %s11391_s20 }
 0x160   :  { %2522 = vrot.lane.b32.xlu1 %v11739_v6, %s11396_s1  ;;  %2263 = vrot.lane.b32.xlu0 %v11739_v6, %s11394_s5 }
 0x164   :  { %2526 = vrot.lane.b32.xlu1 %v11735_v5, %s11396_s1  ;;  %2524 = vrot.lane.b32.xlu0 %v11709_v1, %s11396_s1  ;;  %s13969_s1 = sld [smem:[#allocation30_spill]] }
 0x17a   :  { %v996_v9 = vpop.permute.xlu1 %995  ;;  %v988_v10 = vpop.permute.xlu0 %987 }
 0x17e   :  { %v1247_v11 = vpop.permute.xlu1 %1246  ;;  %v11809_v12 = vpop.permute.xlu0 %989 }
 0x17f   :  { %v1004_v13 = vsel %vm999_vm0, %v988_v10, %v11809_v12 }
 0x180   :  { %9924 = vmatprep.subr.msk.mxu0 %vm521_vm1, %v1004_v13 }
 0x182   :  { %v998_v14 = vpop.permute.xlu1 %997  ;;  %v11815_v15 = vpop.permute.xlu0 %993 }
 0x183   :  { %v1005_v17 = vsel %vm999_vm0, %v998_v14, %v988_v10  ;;  %v1000_v18 = vsel %vm999_vm0, %v996_v9, %v998_v14  ;;  %v1001_v19 = vsel %vm999_vm0, %v11815_v15, %v996_v9 }
 0x184   :  { %9925 = vmatpush1.msk.msra.mxu0 %vm521_vm1, %v1005_v17 }
 0x185   :  { %9926 = vmatmul.mubr.msk.f32.vlgmr.msra.gmra.mrb[0].mxu0 %vm517_vm2, %v11820_v16  ;;  %9930 = vmatprep.subr.msk.mxu0 %vm521_vm1, %v1000_v18 }
 0x186   :  { %v1257_v20 = vpop.permute.xlu1 %1256  ;;  %9931 = vmatpush1.msk.msra.mxu0 %vm521_vm1, %v1001_v19  ;;  %v11835_v21 = vpop.permute.xlu0 %1248  ;;  %1233 = vmatprep.mubr.f32.mxu0 %v11388_v0 }
 0x187   :  { %v1264_v22 = vsel %vm1258_vm3, %v1257_v20, %v1247_v11  ;;  %v1263_v23 = vsel %vm1258_vm3, %v1247_v11, %v11835_v21 }
 0x188   :  { %9933 = vmatprep.subr.msk.mxu0 %vm521_vm1, %v1263_v23 }
 0x189   :  { %9932 = vmatmul.mubr.msk.f32.vlgmr.msra.gmra.mrb[2].mxu0 %vm517_vm2, %v11820_v16 }
 0x18a   :  { %9934 = vmatpush1.msk.msra.mxu0 %vm521_vm1, %v1264_v22  ;;  %v11847_v24 = vpop.permute.xlu1 %1252  ;;  %v1255_v25 = vpop.permute.xlu0 %1254  ;;  %1350 = vmatprep.mubr.f32.mxu0 %v11388_v0 }
 0x18b   :  { %v1260_v27 = vsel %vm1258_vm3, %v11847_v24, %v1255_v25  ;;  %v1259_v28 = vsel %vm1258_vm3, %v1255_v25, %v1257_v20  ;;  %v458_v25 = vld [vmem:[%s13936_s27] sm:$0xf] }
 0x18c   :  { %9939 = vmatprep.subr.msk.mxu0 %vm521_vm1, %v1259_v28 }
 0x18d   :  { %9935 = vmatmul.mubr.msk.f32.vlgmr.msra.gmra.mrb[0].mxu0 %vm517_vm2, %v11853_v26 }
 0x18e   :  { %9940 = vmatpush1.msk.msra.mxu0 %vm521_vm1, %v1260_v27  ;;  %v11864_v29 = vpop.permute.xlu1 %1743  ;;  %v1742_v30 = vpop.permute.xlu0 %1741  ;;  %1492 = vmatprep.mubr.f32.mxu0 %v11388_v0 }
 0x18f   :  { %9942 = vmatprep.subr.msk.mxu0 %vm521_vm1, %v11722_v3  ;;  %v1755_v35 = vsel %vm1751_vm4, %v1742_v30, %v11864_v29 }
 0x191   :  { %9941 = vmatmul.mubr.msk.f32.vlgmr.msra.gmra.mrb[2].mxu0 %vm517_vm2, %v11853_v26 }
 0x192   :  { %v1750_v31 = vpop.permute.xlu1 %1749  ;;  %v1740_v32 = vpop.permute.xlu0 %1739  ;;  %9943 = vmatpush1.msk.msra.mxu0 %vm521_vm1, %v11714_v2  ;;  %1584 = vmatprep.mubr.f32.mxu0 %v11388_v0  ;;  %v11977_v2 = vld [vmem:[%s13936_s27 + $0x1c] sm:$0xf] }
 0x193   :  { %9948 = vmatprep.subr.msk.mxu0 %vm521_vm1, %v11735_v5  ;;  %v1756_v37 = vsel %vm1751_vm4, %v1740_v32, %v1742_v30  ;;  %v1757_v39 = vsel %vm1751_vm4, %v1750_v31, %v1740_v32  ;;  %v12026_v32 = vld [vmem:[%s13936_s27 + $0x20] sm:$0xf] }
 0x195   :  { %9944 = vmatmul.mubr.msk.f32.vlgmr.msra.gmra.mrb[0].mxu0 %vm517_vm2, %v11877_v33 }
 0x196   :  { %9949 = vmatpush1.msk.msra.mxu0 %vm521_vm1, %v11709_v1  ;;  %v2001_v34 = vpop.permute.xlu1 %2000  ;;  %v11889_v36 = vpop.permute.xlu0 %1747  ;;  %1726 = vmatprep.mubr.f32.mxu0 %v11388_v0 }
 0x197   :  { %9951 = vmatprep.subr.msk.mxu0 %vm521_vm1, %v1755_v35  ;;  %v1752_v42 = vsel %vm1751_vm4, %v11889_v36, %v1750_v31 }
 0x199   :  { %9950 = vmatmul.mubr.msk.f32.vlgmr.msra.gmra.mrb[2].mxu0 %vm517_vm2, %v11877_v33 }
 0x19a   :  { %9952 = vmatpush1.msk.msra.mxu0 %vm521_vm1, %v1756_v37  ;;  %v1999_v38 = vpop.permute.xlu1 %1998  ;;  %v11900_v40 = vpop.permute.xlu0 %2002  ;;  %1843 = vmatprep.mubr.f32.mxu0 %v11388_v0 }
 0x19b   :  { %9957 = vmatprep.subr.msk.mxu0 %vm521_vm1, %v1757_v39  ;;  %v2014_v44 = vsel %vm2010_vm5, %v2001_v34, %v11900_v40  ;;  %v2015_v47 = vsel %vm2010_vm5, %v1999_v38, %v2001_v34 }
 0x19d   :  { %9953 = vmatmul.mubr.msk.f32.vlgmr.msra.gmra.mrb[0].mxu0 %vm517_vm2, %v11906_v41 }
 0x19e   :  { %9958 = vmatpush1.msk.msra.mxu0 %vm521_vm1, %v1752_v42  ;;  %v501_v43 = vpop.permute.xlu1 %500  ;;  %v499_v45 = vpop.permute.xlu0 %498  ;;  %1985 = vmatprep.mubr.f32.mxu0 %v11388_v0 }
 0x19f   :  { %9960 = vmatprep.subr.msk.mxu0 %vm521_vm1, %v2014_v44  ;;  %v515_v46 = vsel %vm510_vm6, %v499_v45, %v501_v43 }
 0x1a0   :  { %9906 = vmatprep.subr.msk.mxu1 %vm521_vm1, %v515_v46 }
 0x1a1   :  { %9959 = vmatmul.mubr.msk.f32.vlgmr.msra.gmra.mrb[2].mxu0 %vm517_vm2, %v11906_v41 }
 0x1a2   :  { %9961 = vmatpush1.msk.msra.mxu0 %vm521_vm1, %v2015_v47  ;;  %v509_v48 = vpop.permute.xlu1 %508  ;;  %v2009_v49 = vpop.permute.xlu0 %2008  ;;  %2102 = vmatprep.mubr.f32.mxu0 %v11388_v0 }
 0x1a3   :  { %v516_v52 = vsel %vm510_vm6, %v509_v48, %v499_v45  ;;  %v2016_v53 = vsel %vm2010_vm5, %v2009_v49, %v1999_v38 }
 0x1a4   :  { %9907 = vmatpush1.msk.msra.mxu1 %vm521_vm1, %v516_v52  ;;  %9966 = vmatprep.subr.msk.mxu0 %vm521_vm1, %v2016_v53 }
 0x1a5   :  { %9962 = vmatmul.mubr.msk.f32.vlgmr.msra.gmra.mrb[0].mxu0 %vm517_vm2, %v11934_v50  ;;  %9908 = vmatmul.mubr.msk.f32.vlgmr.msra.gmra.mrb[0].mxu1 %vm517_vm2, %v459_v51 }
 0x1a6   :  { %v503_v54 = vpop.permute.xlu1 %502  ;;  %v11948_v55 = vpop.permute.xlu0 %2006  ;;  %2244 = vmatprep.mubr.f32.mxu0 %v11388_v0  ;;  %675 = vmatprep.mubr.f32.mxu1 %v11388_v0 }
 0x1a7   :  { %v2011_v56 = vsel %vm2010_vm5, %v11948_v55, %v2009_v49  ;;  %v514_v60 = vsel %vm510_vm6, %v501_v43, %v503_v54 }
 0x1a8   :  { %9967 = vmatpush1.msk.msra.mxu0 %vm521_vm1, %v2011_v56 }
 0x1a9   :  { %9968 = vmatmul.mubr.msk.f32.vlgmr.msra.gmra.mrb[2].mxu0 %vm517_vm2, %v11934_v50 }
 0x1aa   :  { %v2260_v57 = vpop.permute.xlu1 %2259  ;;  %v505_v58 = vpop.permute.xlu0 %504  ;;  %2361 = vmatprep.mubr.f32.mxu0 %v11388_v0 }
 0x1ab   :  { %v513_v59 = vsel %vm510_vm6, %v503_v54, %v505_v58 }
 0x1ac   :  { %9909 = vmatprep.subr.msk.mxu1 %vm521_vm1, %v513_v59  ;;  %v238_v59 = vld [vmem:[%s13969_s1 + $0x38] sm:$0xff] }
 0x1ad   :  { %9910 = vmatpush1.msk.msra.mxu1 %vm521_vm1, %v514_v60 }
 0x1ae   :  { %v2258_v61 = vpop.permute.xlu1 %2257  ;;  %v11966_v62 = vpop.permute.xlu0 %2261  ;;  %9911 = vmatmul.mubr.msk.f32.vlgmr.msra.gmra.mrb[2].mxu1 %vm517_vm2, %v459_v51 }
 0x1af   :  { %v2274_v63 = vsel %vm2269_vm7, %v2258_v61, %v2260_v57  ;;  %v2273_v1 = vsel %vm2269_vm7, %v2260_v57, %v11966_v62  ;;  %746 = vmatprep.mubr.f32.mxu1 %v11388_v0  ;;  %v233_v57 = vld [vmem:[%s13969_s1 + $0x10] sm:$0xff] }
 0x1b0   :  { %9969 = vmatprep.subr.msk.mxu0 %vm521_vm1, %v2273_v1  ;;  %v240_v1 = vld [vmem:[%s13969_s1 + $0x48] sm:$0xff] }
 0x1b1   :  { %9970 = vmatpush1.msk.msra.mxu0 %vm521_vm1, %v2274_v63  ;;  %v237_v63 = vld [vmem:[%s13969_s1 + $0x30] sm:$0xff] }
 0x1b2   :  { %v2268_v3 = vpop.permute.xlu1 %2267  ;;  %v507_v5 = vpop.permute.xlu0 %506  ;;  %9971 = vmatmul.mubr.msk.f32.vlgmr.msra.gmra.mrb[0].mxu0 %vm517_vm2, %v11977_v2 }
 0x1b3   :  { %v512_v9 = vsel %vm510_vm6, %v505_v58, %v507_v5  ;;  %v511_v10 = vsel %vm510_vm6, %v507_v5, %v509_v48  ;;  %v2275_v11 = vsel %vm2269_vm7, %v2268_v3, %v2258_v61  ;;  %2503 = vmatprep.mubr.f32.mxu0 %v11388_v0  ;;  %v236_v58 = vld [vmem:[%s13969_s1 + $0x28] sm:$0xff] }
 0x1b4   :  { %9912 = vmatprep.subr.msk.mxu1 %vm521_vm1, %v511_v10  ;;  %9975 = vmatprep.subr.msk.mxu0 %vm521_vm1, %v2275_v11  ;;  %v10635_v61 = vpack.c.bf16 %v238_v59, %v236_v58  ;;  %v241_v10 = vld [vmem:[%s13969_s1 + $0x50] sm:$0xff]  ;;  %v244_v11 = vld [vmem:[%s13969_s1 + $0x68] sm:$0xff]  ;;  %v278_v58 = vld [vmem:[%s13969_s1 + $0x178] sm:$0xff] }
 0x1b5   :  { %9913 = vmatpush1.msk.msra.mxu1 %vm521_vm1, %v512_v9  ;;  %v239_v9 = vld [vmem:[%s13969_s1 + $0x40] sm:$0xff] }
 0x1b6   :  { %v478_v13 = vpop.permute.xlu1 %477  ;;  %v11994_v14 = vpop.permute.xlu0 %2265  ;;  %9914 = vmatmul.mubr.msk.f32.vlgmr.msra.gmra.mrb[4].mxu1 %vm517_vm2, %v459_v51 }
 0x1b7   :  { %v2270_v17 = vsel %vm2269_vm7, %v11994_v14, %v2268_v3  ;;  %838 = vmatprep.mubr.f32.mxu1 %v11388_v0 }
 0x1b8   :  { %9976 = vmatpush1.msk.msra.mxu0 %vm521_vm1, %v2270_v17 }
 0x1b9   :  { %9977 = vmatmul.mubr.msk.f32.vlgmr.msra.gmra.mrb[2].mxu0 %vm517_vm2, %v11977_v2 }
 0x1ba   :  { %v2519_v18 = vpop.permute.xlu1 %2518  ;;  %v480_v19 = vpop.permute.xlu0 %479  ;;  %2620 = vmatprep.mubr.f32.mxu0 %v11388_v0 }
 0x1bb   :  { %v496_v20 = vsel %vm491_vm8, %v478_v13, %v480_v19 }
 0x1bc   :  { %9915 = vmatprep.subr.msk.mxu1 %vm521_vm1, %v496_v20  ;;  %v248_v20 = vld [vmem:[%s13969_s1 + $0x88] sm:$0xff] }
 0x1be   :  { %v488_v22 = vpop.permute.xlu1 %487  ;;  %v12010_v23 = vpop.permute.xlu0 %2520 }
 0x1bf   :  { %v497_v27 = vsel %vm491_vm8, %v488_v22, %v478_v13  ;;  %v2532_v28 = vsel %vm2528_vm9, %v2519_v18, %v12010_v23  ;;  %v246_v13 = vld [vmem:[%s13969_s1 + $0x78] sm:$0xff] }
 0x1c0   :  { %9916 = vmatpush1.msk.msra.mxu1 %vm521_vm1, %v497_v27  ;;  %9978 = vmatprep.subr.msk.mxu0 %vm521_vm1, %v2532_v28  ;;  %v10643_v17 = vpack.c.bf16 %v246_v13, %v244_v11  ;;  %v247_v27 = vld [vmem:[%s13969_s1 + $0x80] sm:$0xff]  ;;  %v249_v28 = vld [vmem:[%s13969_s1 + $0x90] sm:$0xff]  ;;  %v286_v11 = vld [vmem:[%s13969_s1 + $0x1b8] sm:$0xff] }
 0x1c1   :  { %9917 = vmatmul.mubr.msk.f32.vlgmr.msra.gmra.mrb[0].mxu1 %vm517_vm2, %v458_v25 }
 0x1c2   :  { %v482_v30 = vpop.permute.xlu1 %481  ;;  %v2517_v31 = vpop.permute.xlu0 %2516  ;;  %909 = vmatprep.mubr.f32.mxu1 %v11388_v0 }
 0x1c3   :  { %v2533_v34 = vsel %vm2528_vm9, %v2517_v31, %v2519_v18  ;;  %v495_v39 = vsel %vm491_vm8, %v480_v19, %v482_v30  ;;  %v243_v18 = vld [vmem:[%s13969_s1 + $0x60] sm:$0xff]  ;;  %v245_v19 = vld [vmem:[%s13969_s1 + $0x70] sm:$0xff] }
 0x1c4   :  { %9979 = vmatpush1.msk.msra.mxu0 %vm521_vm1, %v2533_v34 }
 0x1c5   :  { %9980 = vmatmul.mubr.msk.f32.vlgmr.msra.gmra.mrb[0].mxu0 %vm517_vm2, %v12026_v32 }
 0x1c6   :  { %v486_v35 = vpop.permute.xlu1 %485  ;;  %v484_v37 = vpop.permute.xlu0 %483  ;;  %2762 = vmatprep.mubr.f32.mxu0 %v11388_v0 }
 0x1c7   :  { %v494_v38 = vsel %vm491_vm8, %v482_v30, %v484_v37  ;;  %v493_v42 = vsel %vm491_vm8, %v484_v37, %v486_v35  ;;  %v492_v43 = vsel %vm491_vm8, %v486_v35, %v488_v22  ;;  %v250_v22 = vld [vmem:[%s13969_s1 + $0x98] sm:$0xff]  ;;  %v252_v30 = vld [vmem:[%s13969_s1 + $0xa8] sm:$0xff]  ;;  %v251_v35 = vld [vmem:[%s13969_s1 + $0xa0] sm:$0xff] }
 0x1c8   :  { %9918 = vmatprep.subr.msk.mxu1 %vm521_vm1, %v494_v38  ;;  %v253_v37 = vld [vmem:[%s13969_s1 + $0xb0] sm:$0xff]  ;;  %v256_v38 = vld [vmem:[%s13969_s1 + $0xc8] sm:$0xff] }
 0x1c9   :  { %9919 = vmatpush1.msk.msra.mxu1 %vm521_vm1, %v495_v39  ;;  %v258_v39 = vld [vmem:[%s13969_s1 + $0xd8] sm:$0xff] }
 0x1ca   :  { %v1251_v44 = vpop.permute.xlu1 %1250  ;;  %9920 = vmatmul.mubr.msk.f32.vlgmr.msra.gmra.mrb[2].mxu1 %vm517_vm2, %v458_v25  ;;  %9921 = vmatprep.subr.msk.mxu1 %vm521_vm1, %v492_v43  ;;  %v992_v45 = vpop.permute.xlu0 %991  ;;  %v10655_v43 = vpack.c.bf16 %v258_v39, %v256_v38  ;;  %v298_v38 = vld [vmem:[%s13969_s1 + $0x218] sm:$0xff] }
 0x1cb   :  { %v1002_v46 = vsel %vm999_vm0, %v992_v45, %v11815_v15  ;;  %9922 = vmatpush1.msk.msra.mxu1 %vm521_vm1, %v493_v42  ;;  %980 = vmatprep.mubr.f32.mxu1 %v11388_v0  ;;  %v1003_v47 = vsel %vm999_vm0, %v11809_v12, %v992_v45  ;;  %v1261_v51 = vsel %vm1258_vm3, %v1251_v44, %v11847_v24  ;;  %v257_v45 = vld [vmem:[%s13969_s1 + $0xd0] sm:$0xff]  ;;  %vm11403_vm0 = vmmov 0  }
 0x1cc   :  { %9927 = vmatprep.subr.msk.mxu1 %vm521_vm1, %v1002_v46  ;;  %v1262_v15 = vsel %vm1258_vm3, %v11835_v21, %v1251_v44  ;;  %v10653_v42 = vpack.c.bf16 %v253_v37, %v251_v35  ;;  %v255_v44 = vld [vmem:[%s13969_s1 + $0xc0] sm:$0xff]  ;;  %v260_v46 = vld [vmem:[%s13969_s1 + $0xe8] sm:$0xff]  ;;  %v293_v35 = vld [vmem:[%s13969_s1 + $0x1f0] sm:$0xff] }
 0x1cd   :  { %v296_v37 = vld [vmem:[%s13969_s1 + $0x208] sm:$0xff] }
 0x1ce   :  { %v2005_v48 = vpop.permute.xlu1 %2004  ;;  %9923 = vmatmul.mubr.msk.f32.vlgmr.msra.gmra.mrb[4].mxu1 %vm517_vm2, %v458_v25  ;;  %v1746_v49 = vpop.permute.xlu0 %1745  ;;  %v10647_v25 = vpack.c.bf16 %v250_v22, %v248_v20  ;;  %v290_v20 = vld [vmem:[%s13969_s1 + $0x1d8] sm:$0xff] }
 0x1cf   :  { %9928 = vmatpush1.msk.msra.mxu1 %vm521_vm1, %v1003_v47  ;;  %1162 = vmatprep.mubr.f32.mxu1 %v11388_v0  ;;  %v262_v47 = vld [vmem:[%s13969_s1 + $0xf8] sm:$0xff] }
 0x1d0   :  { %9936 = vmatprep.subr.msk.mxu1 %vm521_vm1, %v1261_v51  ;;  %v259_v51 = vld [vmem:[%s13969_s1 + $0xe0] sm:$0xff] }
 0x1d2   :  { %v2523_v52 = vpop.permute.xlu1 %2522  ;;  %9929 = vmatmul.mubr.msk.f32.vlgmr.msra.gmra.mrb[2].mxu1 %vm517_vm2, %v11820_v16  ;;  %v2264_v12 = vpop.permute.xlu0 %2263  ;;  %v1754_v16 = vsel %vm1751_vm4, %v11864_v29, %v1746_v49 }
 0x1d3   :  { %9937 = vmatpush1.msk.msra.mxu1 %vm521_vm1, %v1262_v15  ;;  %1421 = vmatprep.mubr.f32.mxu1 %v11388_v0  ;;  %v2271_v29 = vsel %vm2269_vm7, %v2264_v12, %v11994_v14  ;;  %v2531_v56 = vsel %vm2528_vm9, %v12010_v23, %v2523_v52  ;;  %v10641_v14 = vpack.c.bf16 %v241_v10, %v239_v9  ;;  %v261_v15 = vld [vmem:[%s13969_s1 + $0xf0] sm:$0xff]  ;;  %v284_v10 = vld [vmem:[%s13969_s1 + $0x1a8] sm:$0xff] }
 0x1d4   :  { %9945 = vmatprep.subr.msk.mxu1 %vm521_vm1, %v11739_v6  ;;  %v1753_v6 = vsel %vm1751_vm4, %v1746_v49, %v11889_v36  ;;  %v2272_v36 = vsel %vm2269_vm7, %v11966_v62, %v2264_v12  ;;  %v235_v62 = vld [vmem:[%s13969_s1 + $0x20] sm:$0xff]  ;;  %v10645_v23 = vpack.c.bf16 %v245_v19, %v243_v18  ;;  %v10659_v49 = vpack.c.bf16 %v262_v47, %v260_v46  ;;  %v266_v12 = vld [vmem:[%s13969_s1 + $0x118] sm:$0xff]  ;;  %v281_v9 = vld [vmem:[%s13969_s1 + $0x190] sm:$0xff] }
 0x1d5   :  { %v10637_v3 = vpack.c.bf16 %v237_v63, %v235_v62  ;;  %v277_v62 = vld [vmem:[%s13969_s1 + $0x170] sm:$0xff]  ;;  %v280_v63 = vld [vmem:[%s13969_s1 + $0x188] sm:$0xff] }
 0x1d6   :  { %v2527_v24 = vpop.permute.xlu1 %2526  ;;  %v2525_v53 = vpop.permute.xlu0 %2524  ;;  %v285_v18 = vld [vmem:[%s13969_s1 + $0x1b0] sm:$0xff]  ;;  %v288_v19 = vld [vmem:[%s13969_s1 + $0x1c8] sm:$0xff] }
 0x1d7   :  { %v2534_v54 = vsel %vm2528_vm9, %v2527_v24, %v2517_v31  ;;  %v2529_v21 = vsel %vm2528_vm9, %v2525_v53, %v2527_v24  ;;  %v254_v31 = vld [vmem:[%s13969_s1 + $0xb8] sm:$0xff]  ;;  %v10661_v24 = vpack.c.bf16 %v261_v15, %v259_v51  ;;  %v297_v46 = vld [vmem:[%s13969_s1 + $0x210] sm:$0xff] }
 0x1d8   :  { %9984 = vmatprep.subr.msk.mxu0 %vm521_vm1, %v2534_v54  ;;  %v10651_v34 = vpack.c.bf16 %v254_v31, %v252_v30  ;;  %v263_v54 = vld [vmem:[%s13969_s1 + $0x100] sm:$0xff]  ;;  %v294_v30 = vld [vmem:[%s13969_s1 + $0x1f8] sm:$0xff] }
 0x1d9   :  { %9985 = vmatpush1.msk.msra.mxu0 %vm521_vm1, %v2529_v21  ;;  %v265_v21 = vld [vmem:[%s13969_s1 + $0x110] sm:$0xff] }
 0x1da   :  { %9938 = vmatmul.mubr.msk.f32.vlgmr.msra.gmra.mrb[2].mxu1 %vm517_vm2, %v11853_v26  ;;  %9986 = vmatmul.mubr.msk.f32.vlgmr.msra.gmra.mrb[2].mxu0 %vm517_vm2, %v12026_v32  ;;  %v2012_v26 = vsel %vm2010_vm5, %v2005_v48, %v11948_v55 }
 0x1db   :  { %9946 = vmatpush1.msk.msra.mxu1 %vm521_vm1, %v11727_v4  ;;  %1655 = vmatprep.mubr.f32.mxu1 %v11388_v0  ;;  %v2013_v4 = vsel %vm2010_vm5, %v11900_v40, %v2005_v48  ;;  %v232_v40 = vld [vmem:[%s13969_s1 + $0x8] sm:$0xff]  ;;  %v10657_v48 = vpack.c.bf16 %v257_v45, %v255_v44  ;;  %v295_v45 = vld [vmem:[%s13969_s1 + $0x200] sm:$0xff] }
 0x1dc   :  { %9954 = vmatprep.subr.msk.mxu1 %vm521_vm1, %v1753_v6  ;;  %3103 = vmatprep.mubr.f32.mxu0 %v11388_v0  ;;  %v268_v6 = vld [vmem:[%s13969_s1 + $0x128] sm:$0xff] }
 0x1e2   :  { %9947 = vmatmul.mubr.msk.f32.vlgmr.msra.gmra.mrb[2].mxu1 %vm517_vm2, %v11877_v33  ;;  %v2530_v33 = vsel %vm2528_vm9, %v2523_v52, %v2525_v53  ;;  %v264_v52 = vld [vmem:[%s13969_s1 + $0x108] sm:$0xff] }
 0x1e3   :  { %9955 = vmatpush1.msk.msra.mxu1 %vm521_vm1, %v1754_v16  ;;  %1914 = vmatprep.mubr.f32.mxu1 %v11388_v0  ;;  %v10663_v53 = vpack.c.bf16 %v266_v12, %v264_v52  ;;  %v270_v16 = vld [vmem:[%s13969_s1 + $0x138] sm:$0xff]  ;;  %v10697_v12 = vpack.c.bf16 %v297_v46, %v295_v45 }
 0x1e4   :  { %9963 = vmatprep.subr.msk.mxu1 %vm521_vm1, %v2012_v26  ;;  %v10665_v26 = vpack.c.bf16 %v265_v21, %v263_v54  ;;  %v301_v54 = vld [vmem:[%s13969_s1 + $0x230] sm:$0xff]  ;;  %v304_v21 = vld [vmem:[%s13969_s1 + $0x248] sm:$0xff]  ;;  %v334_v45 = vld [vmem:[%s13969_s1 + $0x338] sm:$0xff] }
 0x1ea   :  { %9956 = vmatmul.mubr.msk.f32.vlgmr.msra.gmra.mrb[2].mxu1 %vm517_vm2, %v11906_v41  ;;  %v234_v41 = vld [vmem:[%s13969_s1 + $0x18] sm:$0xff] }
 0x1eb   :  { %9964 = vmatpush1.msk.msra.mxu1 %vm521_vm1, %v2013_v4  ;;  %2173 = vmatprep.mubr.f32.mxu1 %v11388_v0  ;;  %v10631_v55 = vpack.c.bf16 %v234_v41, %v232_v40  ;;  %v10667_v4 = vpack.c.bf16 %v270_v16, %v268_v6  ;;  %v274_v40 = vld [vmem:[%s13969_s1 + $0x158] sm:$0xff] }
 0x1ec   :  { %9972 = vmatprep.subr.msk.mxu1 %vm521_vm1, %v2271_v29  ;;  %v267_v29 = vld [vmem:[%s13969_s1 + $0x120] sm:$0xff]  ;;  %v306_v6 = vld [vmem:[%s13969_s1 + $0x258] sm:$0xff] }
 0x1f2   :  { %9965 = vmatmul.mubr.msk.f32.vlgmr.msra.gmra.mrb[2].mxu1 %vm517_vm2, %v11934_v50  ;;  %v231_v50 = vld [vmem:[%s13969_s1] sm:$0xff] }
 0x1f3   :  { %9973 = vmatpush1.msk.msra.mxu1 %vm521_vm1, %v2272_v36  ;;  %2432 = vmatprep.mubr.f32.mxu1 %v11388_v0  ;;  %v10633_v60 = vpack.c.bf16 %v233_v57, %v231_v50  ;;  %v272_v36 = vld [vmem:[%s13969_s1 + $0x148] sm:$0xff]  ;;  %v273_v50 = vld [vmem:[%s13969_s1 + $0x150] sm:$0xff] }
 0x1f4   :  { %9981 = vmatprep.subr.msk.mxu1 %vm521_vm1, %v2530_v33  ;;  %v269_v33 = vld [vmem:[%s13969_s1 + $0x130] sm:$0xff]  ;;  %v276_v57 = vld [vmem:[%s13969_s1 + $0x168] sm:$0xff] }
 0x1f5   :  { %v10669_v41 = vpack.c.bf16 %v269_v33, %v267_v29  ;;  %v305_v29 = vld [vmem:[%s13969_s1 + $0x250] sm:$0xff]  ;;  %v308_v33 = vld [vmem:[%s13969_s1 + $0x268] sm:$0xff] }
 0x1fa   :  { %9974 = vmatmul.mubr.msk.f32.vlgmr.msra.gmra.mrb[2].mxu1 %vm517_vm2, %v11977_v2  ;;  %v242_v2 = vld [vmem:[%s13969_s1 + $0x58] sm:$0xff] }
 0x1fb   :  { %9982 = vmatpush1.msk.msra.mxu1 %vm521_vm1, %v2531_v56  ;;  %2691 = vmatprep.mubr.f32.mxu1 %v11388_v0  ;;  %v10639_v5 = vpack.c.bf16 %v242_v2, %v240_v1  ;;  %v271_v56 = vld [vmem:[%s13969_s1 + $0x140] sm:$0xff]  ;;  %v282_v1 = vld [vmem:[%s13969_s1 + $0x198] sm:$0xff] }
 0x1fc   :  { %10632 = vmatprep.subr.bf16.mxu1 %v10631_v55  ;;  %v10671_v55 = vpack.c.bf16 %v274_v40, %v272_v36  ;;  %v10673_v59 = vpack.c.bf16 %v273_v50, %v271_v56  ;;  %v310_v36 = vld [vmem:[%s13969_s1 + $0x278] sm:$0xff]  ;;  %v307_v50 = vld [vmem:[%s13969_s1 + $0x260] sm:$0xff] }
 0x1fd   :  { %v10707_v56 = vpack.c.bf16 %v310_v36, %v308_v33  ;;  %v346_v33 = vld [vmem:[%s13969_s1 + $0x398] sm:$0xff] }
 0x202   :  { %9983 = vmatmul.mubr.msk.f32.vlgmr.msra.gmra.mrb[2].mxu1 %vm517_vm2, %v12026_v32  ;;  %v10649_v32 = vpack.c.bf16 %v249_v28, %v247_v27  ;;  %v289_v27 = vld [vmem:[%s13969_s1 + $0x1d0] sm:$0xff]  ;;  %v292_v28 = vld [vmem:[%s13969_s1 + $0x1e8] sm:$0xff] }
 0x203   :  { %10634 = vmatpush1.bf16.msra.mxu1 %v10633_v60  ;;  %v10675_v60 = vpack.c.bf16 %v278_v58, %v276_v57  ;;  %v309_v57 = vld [vmem:[%s13969_s1 + $0x270] sm:$0xff]  ;;  %v312_v58 = vld [vmem:[%s13969_s1 + $0x288] sm:$0xff] }
 0x204   :  { %10636 = vmatprep.subr.bf16.mxu1 %v10635_v61  ;;  %v275_v61 = vld [vmem:[%s13969_s1 + $0x160] sm:$0xff] }
 0x205   :  { %v10677_v2 = vpack.c.bf16 %v277_v62, %v275_v61  ;;  %v311_v62 = vld [vmem:[%s13969_s1 + $0x280] sm:$0xff] }
 0x207   :  { %10638 = vmatpush1.bf16.msra.mxu1 %v10637_v3  ;;  %v10679_v3 = vpack.c.bf16 %v282_v1, %v280_v63  ;;  %v313_v63 = vld [vmem:[%s13969_s1 + $0x290] sm:$0xff]  ;;  %v316_v1 = vld [vmem:[%s13969_s1 + $0x2a8] sm:$0xff] }
 0x208   :  { %10640 = vmatprep.subr.bf16.mxu1 %v10639_v5  ;;  %v279_v5 = vld [vmem:[%s13969_s1 + $0x180] sm:$0xff] }
 0x209   :  { %v10681_v13 = vpack.c.bf16 %v281_v9, %v279_v5  ;;  %v315_v9 = vld [vmem:[%s13969_s1 + $0x2a0] sm:$0xff] }
 0x20b   :  { %10642 = vmatpush1.bf16.msra.mxu1 %v10641_v14  ;;  %v10683_v14 = vpack.c.bf16 %v286_v11, %v284_v10  ;;  %v317_v10 = vld [vmem:[%s13969_s1 + $0x2b0] sm:$0xff]  ;;  %v320_v11 = vld [vmem:[%s13969_s1 + $0x2c8] sm:$0xff] }
 0x20c   :  { %10644 = vmatprep.subr.bf16.mxu1 %v10643_v17  ;;  %v283_v17 = vld [vmem:[%s13969_s1 + $0x1a0] sm:$0xff] }
 0x20d   :  { %v10685_v22 = vpack.c.bf16 %v285_v18, %v283_v17 }
 0x20f   :  { %10646 = vmatpush1.bf16.msra.mxu1 %v10645_v23  ;;  %v10687_v23 = vpack.c.bf16 %v290_v20, %v288_v19  ;;  %v10717_v19 = vpack.c.bf16 %v317_v10, %v315_v9  ;;  %v358_v9 = vld [vmem:[%s13969_s1 + $0x3f8] sm:$0xff] }
 0x210   :  { %10648 = vmatprep.subr.bf16.mxu1 %v10647_v25  ;;  %v287_v25 = vld [vmem:[%s13969_s1 + $0x1c0] sm:$0xff] }
 0x211   :  { %v10689_v31 = vpack.c.bf16 %v289_v27, %v287_v25  ;;  %v321_v25 = vld [vmem:[%s13969_s1 + $0x2d0] sm:$0xff]  ;;  %v324_v27 = vld [vmem:[%s13969_s1 + $0x2e8] sm:$0xff] }
 0x213   :  { %10650 = vmatpush1.bf16.msra.mxu1 %v10649_v32  ;;  %v10691_v32 = vpack.c.bf16 %v294_v30, %v292_v28  ;;  %v326_v28 = vld [vmem:[%s13969_s1 + $0x2f8] sm:$0xff] }
 0x214   :  { %10652 = vmatprep.subr.bf16.mxu1 %v10651_v34  ;;  %v291_v34 = vld [vmem:[%s13969_s1 + $0x1e0] sm:$0xff] }
 0x215   :  { %v10693_v39 = vpack.c.bf16 %v293_v35, %v291_v34  ;;  %v325_v34 = vld [vmem:[%s13969_s1 + $0x2f0] sm:$0xff]  ;;  %v328_v35 = vld [vmem:[%s13969_s1 + $0x308] sm:$0xff] }
 0x217   :  { %10654 = vmatpush1.bf16.msra.mxu1 %v10653_v42  ;;  %v10695_v42 = vpack.c.bf16 %v298_v38, %v296_v37  ;;  %v330_v37 = vld [vmem:[%s13969_s1 + $0x318] sm:$0xff] }
 0x218   :  { %10656 = vmatprep.subr.bf16.mxu1 %v10655_v43 }
 0x21b   :  { %10658 = vmatpush1.bf16.msra.mxu1 %v10657_v48  ;;  %v300_v48 = vld [vmem:[%s13969_s1 + $0x228] sm:$0xff] }
 0x21c   :  { %10660 = vmatprep.subr.bf16.mxu1 %v10659_v49  ;;  %v302_v49 = vld [vmem:[%s13969_s1 + $0x238] sm:$0xff] }
 0x21f   :  { %10662 = vmatpush1.bf16.msra.mxu1 %v10661_v24  ;;  %v10699_v24 = vpack.c.bf16 %v302_v49, %v300_v48  ;;  %v331_v48 = vld [vmem:[%s13969_s1 + $0x320] sm:$0xff]  ;;  %v333_v49 = vld [vmem:[%s13969_s1 + $0x330] sm:$0xff] }
 0x220   :  { %10664 = vmatprep.subr.bf16.mxu1 %v10663_v53  ;;  %v299_v53 = vld [vmem:[%s13969_s1 + $0x220] sm:$0xff] }
 0x221   :  { %v10701_v16 = vpack.c.bf16 %v301_v54, %v299_v53  ;;  %v337_v53 = vld [vmem:[%s13969_s1 + $0x350] sm:$0xff]  ;;  %v340_v54 = vld [vmem:[%s13969_s1 + $0x368] sm:$0xff] }
 0x223   :  { %10666 = vmatpush1.bf16.msra.mxu1 %v10665_v26  ;;  %v10703_v26 = vpack.c.bf16 %v306_v6, %v304_v21  ;;  %v342_v21 = vld [vmem:[%s13969_s1 + $0x378] sm:$0xff] }
 0x224   :  { %10668 = vmatprep.subr.bf16.mxu1 %v10667_v4  ;;  %v303_v4 = vld [vmem:[%s13969_s1 + $0x240] sm:$0xff] }
 0x227   :  { %10670 = vmatpush1.bf16.msra.mxu1 %v10669_v41 }
 0x228   :  { %10672 = vmatprep.subr.bf16.mxu1 %v10671_v55  ;;  %v10705_v55 = vpack.c.bf16 %v305_v29, %v303_v4  ;;  %v341_v4 = vld [vmem:[%s13969_s1 + $0x370] sm:$0xff]  ;;  %v344_v29 = vld [vmem:[%s13969_s1 + $0x388] sm:$0xff] }
 0x22b   :  { %10674 = vmatpush1.bf16.msra.mxu1 %v10673_v59  ;;  %v314_v59 = vld [vmem:[%s13969_s1 + $0x298] sm:$0xff] }
 0x22c   :  { %10676 = vmatprep.subr.bf16.mxu1 %v10675_v60  ;;  %v10709_v60 = vpack.c.bf16 %v309_v57, %v307_v50  ;;  %v10711_v61 = vpack.c.bf16 %v314_v59, %v312_v58  ;;  %v350_v50 = vld [vmem:[%s13969_s1 + $0x3b8] sm:$0xff]  ;;  %v347_v59 = vld [vmem:[%s13969_s1 + $0x3a0] sm:$0xff] }
 0x22f   :  { %10678 = vmatpush1.bf16.msra.mxu1 %v10677_v2  ;;  %v318_v2 = vld [vmem:[%s13969_s1 + $0x2b8] sm:$0xff] }
 0x230   :  { %10680 = vmatprep.subr.bf16.mxu1 %v10679_v3  ;;  %v10713_v3 = vpack.c.bf16 %v313_v63, %v311_v62  ;;  %v10715_v5 = vpack.c.bf16 %v318_v2, %v316_v1  ;;  %v354_v62 = vld [vmem:[%s13969_s1 + $0x3d8] sm:$0xff]  ;;  %v351_v2 = vld [vmem:[%s13969_s1 + $0x3c0] sm:$0xff] }
 0x233   :  { %10682 = vmatpush1.bf16.msra.mxu1 %v10681_v13  ;;  %v322_v13 = vld [vmem:[%s13969_s1 + $0x2d8] sm:$0xff] }
 0x234   :  { %10684 = vmatprep.subr.bf16.mxu1 %v10683_v14 }
 0x237   :  { %10686 = vmatpush1.bf16.msra.mxu1 %v10685_v22  ;;  %v10719_v22 = vpack.c.bf16 %v322_v13, %v320_v11  ;;  %v355_v13 = vld [vmem:[%s13969_s1 + $0x3e0] sm:$0xff] }
 0x238   :  { %10688 = vmatprep.subr.bf16.mxu1 %v10687_v23  ;;  %v319_v23 = vld [vmem:[%s13969_s1 + $0x2c0] sm:$0xff] }
 0x239   :  { %v10721_v30 = vpack.c.bf16 %v321_v25, %v319_v23 }
 0x23b   :  { %10690 = vmatpush1.bf16.msra.mxu1 %v10689_v31  ;;  %v10723_v31 = vpack.c.bf16 %v326_v28, %v324_v27  ;;  %v359_v28 = vld [vmem:[%s13969_s1 + $0x400] sm:$0xff] }
 0x23c   :  { %10692 = vmatprep.subr.bf16.mxu1 %v10691_v32  ;;  %v323_v32 = vld [vmem:[%s13969_s1 + $0x2e0] sm:$0xff] }
 0x23d   :  { %v10725_v38 = vpack.c.bf16 %v325_v34, %v323_v32  ;;  %v366_v32 = vld [vmem:[%s13969_s1 + $0x438] sm:$0xff] }
 0x23f   :  { %10694 = vmatpush1.bf16.msra.mxu1 %v10693_v39  ;;  %v10727_v39 = vpack.c.bf16 %v330_v37, %v328_v35  ;;  %v363_v37 = vld [vmem:[%s13969_s1 + $0x420] sm:$0xff] }
 0x240   :  { %10696 = vmatprep.subr.bf16.mxu1 %v10695_v42  ;;  %v327_v42 = vld [vmem:[%s13969_s1 + $0x300] sm:$0xff] }
 0x294   :  { %v840_v43 = vpop.f32.mrb[0].mxu1 }
 0x295   :  { %v842_v44 = vpop.f32.mrb[1].mxu1 }
 0x298   :  { %v2622_v47 = vpop.f32.mrb[0].mxu0 }
 0x299   :  { %v10935_v51 = vadd.f32 %v2622_v47, %v840_v43  ;;  %v2624_v15 = vpop.f32.mrb[1].mxu0  ;;  %v329_v43 = vld [vmem:[%s13969_s1 + $0x310] sm:$0xff] }
 0x29a   :  { %v10936_v52 = vadd.f32 %v2624_v15, %v842_v44  ;;  %v332_v44 = vld [vmem:[%s13969_s1 + $0x328] sm:$0xff]  ;;  %v10729_v46 = vpack.c.bf16 %v329_v43, %v327_v42  ;;  %v338_v15 = vld [vmem:[%s13969_s1 + $0x358] sm:$0xff] }
 0x29b   :  { %v10731_v47 = vpack.c.bf16 %v334_v45, %v332_v44  ;;  %v370_v42 = vld [vmem:[%s13969_s1 + $0x458] sm:$0xff]  ;;  %v367_v45 = vld [vmem:[%s13969_s1 + $0x440] sm:$0xff] }
 0x29c   :  { %2842 = vmatprep.mubr.f32.mxu1 %v10936_v52  ;;  %v10733_v52 = vpack.c.bf16 %v333_v49, %v331_v48  ;;  %v374_v48 = vld [vmem:[%s13969_s1 + $0x478] sm:$0xff] }
 0x29d   :  { %2843 = vmatmul.mubr.f32.vlgmr.msra.gmra.mrb[6].mxu1 %v10935_v51  ;;  %v336_v51 = vld [vmem:[%s13969_s1 + $0x348] sm:$0xff] }
 0x29e   :  { %10698 = vmatpush1.bf16.msra.mxu1 %v10697_v12  ;;  %v10735_v12 = vpack.c.bf16 %v338_v15, %v336_v51  ;;  %v371_v51 = vld [vmem:[%s13969_s1 + $0x460] sm:$0xff]  ;;  %v373_v15 = vld [vmem:[%s13969_s1 + $0x470] sm:$0xff] }
 0x29f   :  { %10700 = vmatprep.subr.bf16.mxu1 %v10699_v24  ;;  %v335_v24 = vld [vmem:[%s13969_s1 + $0x340] sm:$0xff] }
 0x2a0   :  { %v10737_v6 = vpack.c.bf16 %v337_v53, %v335_v24  ;;  %v10773_v24 = vpack.c.bf16 %v373_v15, %v371_v51  ;;  %v411_v51 = vld [vmem:[%s13969_s1 + $0x5a0] sm:$0xff]  ;;  %v413_v15 = vld [vmem:[%s13969_s1 + $0x5b0] sm:$0xff] }
 0x2a1   :  { %v982_v40 = vpop.f32.mrb[4].mxu1 }
 0x2a2   :  { %10702 = vmatpush1.bf16.msra.mxu1 %v10701_v16  ;;  %v984_v41 = vpop.f32.mrb[5].mxu1  ;;  %v10739_v16 = vpack.c.bf16 %v342_v21, %v340_v54  ;;  %v375_v54 = vld [vmem:[%s13969_s1 + $0x480] sm:$0xff]  ;;  %v377_v21 = vld [vmem:[%s13969_s1 + $0x490] sm:$0xff] }
 0x2a3   :  { %10704 = vmatprep.subr.bf16.mxu1 %v10703_v26  ;;  %v339_v26 = vld [vmem:[%s13969_s1 + $0x360] sm:$0xff] }
 0x2a4   :  { %v10741_v36 = vpack.c.bf16 %v341_v4, %v339_v26  ;;  %v10777_v26 = vpack.c.bf16 %v377_v21, %v375_v54  ;;  %v415_v54 = vld [vmem:[%s13969_s1 + $0x5c0] sm:$0xff]  ;;  %v417_v21 = vld [vmem:[%s13969_s1 + $0x5d0] sm:$0xff] }
 0x2a6   :  { %10706 = vmatpush1.bf16.msra.mxu1 %v10705_v55  ;;  %v345_v55 = vld [vmem:[%s13969_s1 + $0x390] sm:$0xff] }
 0x2a7   :  { %10708 = vmatprep.subr.bf16.mxu1 %v10707_v56  ;;  %v348_v56 = vld [vmem:[%s13969_s1 + $0x3a8] sm:$0xff] }
 0x2a8   :  { %v10747_v58 = vpack.c.bf16 %v350_v50, %v348_v56  ;;  %v383_v56 = vld [vmem:[%s13969_s1 + $0x4c0] sm:$0xff]  ;;  %v385_v50 = vld [vmem:[%s13969_s1 + $0x4d0] sm:$0xff] }
 0x2aa   :  { %10710 = vmatpush1.bf16.msra.mxu1 %v10709_v60  ;;  %v349_v60 = vld [vmem:[%s13969_s1 + $0x3b0] sm:$0xff] }
 0x2ab   :  { %10712 = vmatprep.subr.bf16.mxu1 %v10711_v61  ;;  %v352_v61 = vld [vmem:[%s13969_s1 + $0x3c8] sm:$0xff]  ;;  %v10749_v63 = vpack.c.bf16 %v349_v60, %v347_v59  ;;  %v10785_v59 = vpack.c.bf16 %v385_v50, %v383_v56  ;;  %v228_v56 = vld [vmem:[%s13970_s29] sm:$0x3]  ;;  %s11408_s29 = smov 121  }
 0x2ac   :  { %v10751_v1 = vpack.c.bf16 %v354_v62, %v352_v61  ;;  %v387_v61 = vld [vmem:[%s13969_s1 + $0x4e0] sm:$0xff]  ;;  %v389_v62 = vld [vmem:[%s13969_s1 + $0x4f0] sm:$0xff] }
 0x2ad   :  { %v2764_v14 = vpop.f32.mrb[2].mxu0 }
 0x2ae   :  { %v12401_v17 = vadd.f32 %v2764_v14, %v982_v40  ;;  %10714 = vmatpush1.bf16.msra.mxu1 %v10713_v3  ;;  %v2766_v18 = vpop.f32.mrb[3].mxu0  ;;  %v10743_v40 = vpack.c.bf16 %v346_v33, %v344_v29  ;;  %v353_v3 = vld [vmem:[%s13969_s1 + $0x3d0] sm:$0xff]  ;;  %v379_v29 = vld [vmem:[%s13969_s1 + $0x4a0] sm:$0xff] }
 0x2af   :  { %v12403_v20 = vadd.f32 %v2766_v18, %v984_v41  ;;  %10716 = vmatprep.subr.bf16.mxu1 %v10715_v5  ;;  %v343_v41 = vld [vmem:[%s13969_s1 + $0x380] sm:$0xff]  ;;  %v356_v5 = vld [vmem:[%s13969_s1 + $0x3e8] sm:$0xff]  ;;  %v10753_v10 = vpack.c.bf16 %v353_v3, %v351_v2  ;;  %v357_v14 = vld [vmem:[%s13969_s1 + $0x3f0] sm:$0xff]  ;;  %v10789_v2 = vpack.c.bf16 %v389_v62, %v387_v61 }
 0x2b0   :  { %v10745_v57 = vpack.c.bf16 %v345_v55, %v343_v41  ;;  %v10755_v11 = vpack.c.bf16 %v358_v9, %v356_v5  ;;  %v360_v18 = vld [vmem:[%s13969_s1 + $0x408] sm:$0xff]  ;;  %v10757_v25 = vpack.c.bf16 %v357_v14, %v355_v13  ;;  %v381_v33 = vld [vmem:[%s13969_s1 + $0x4b0] sm:$0xff]  ;;  %v391_v5 = vld [vmem:[%s13969_s1 + $0x500] sm:$0xff] }
 0x2b1   :  { %v10781_v41 = vpack.c.bf16 %v381_v33, %v379_v29  ;;  %v393_v9 = vld [vmem:[%s13969_s1 + $0x510] sm:$0xff]  ;;  %v419_v29 = vld [vmem:[%s13969_s1 + $0x5e0] sm:$0xff] }
 0x2b2   :  { %10718 = vmatpush1.bf16.msra.mxu1 %v10717_v19  ;;  %v362_v19 = vld [vmem:[%s13969_s1 + $0x418] sm:$0xff]  ;;  %v10793_v13 = vpack.c.bf16 %v393_v9, %v391_v5  ;;  %v421_v33 = vld [vmem:[%s13969_s1 + $0x5f0] sm:$0xff] }
 0x2b3   :  { %10720 = vmatprep.subr.bf16.mxu1 %v10719_v22  ;;  %v10759_v27 = vpack.c.bf16 %v362_v19, %v360_v18  ;;  %v395_v18 = vld [vmem:[%s13969_s1 + $0x520] sm:$0xff]  ;;  %v397_v19 = vld [vmem:[%s13969_s1 + $0x530] sm:$0xff] }
 0x2b6   :  { %10722 = vmatpush1.bf16.msra.mxu1 %v10721_v30  ;;  %v361_v30 = vld [vmem:[%s13969_s1 + $0x410] sm:$0xff] }
 0x2b7   :  { %10724 = vmatprep.subr.bf16.mxu1 %v10723_v31  ;;  %v364_v31 = vld [vmem:[%s13969_s1 + $0x428] sm:$0xff]  ;;  %v10761_v34 = vpack.c.bf16 %v361_v30, %v359_v28  ;;  %v399_v28 = vld [vmem:[%s13969_s1 + $0x540] sm:$0xff]  ;;  %v401_v30 = vld [vmem:[%s13969_s1 + $0x550] sm:$0xff] }
 0x2b8   :  { %v10763_v35 = vpack.c.bf16 %v366_v32, %v364_v31  ;;  %v404_v31 = vld [vmem:[%s13969_s1 + $0x568] sm:$0xff]  ;;  %v406_v32 = vld [vmem:[%s13969_s1 + $0x578] sm:$0xff] }
 0x2ba   :  { %10726 = vmatpush1.bf16.msra.mxu1 %v10725_v38  ;;  %v365_v38 = vld [vmem:[%s13969_s1 + $0x430] sm:$0xff] }
 0x2bb   :  { %10728 = vmatprep.subr.bf16.mxu1 %v10727_v39  ;;  %v368_v39 = vld [vmem:[%s13969_s1 + $0x448] sm:$0xff]  ;;  %v10765_v43 = vpack.c.bf16 %v365_v38, %v363_v37  ;;  %v403_v37 = vld [vmem:[%s13969_s1 + $0x560] sm:$0xff]  ;;  %v405_v38 = vld [vmem:[%s13969_s1 + $0x570] sm:$0xff] }
 0x2bc   :  { %v10767_v44 = vpack.c.bf16 %v370_v42, %v368_v39  ;;  %v408_v39 = vld [vmem:[%s13969_s1 + $0x588] sm:$0xff]  ;;  %v410_v42 = vld [vmem:[%s13969_s1 + $0x598] sm:$0xff] }
 0x2be   :  { %10730 = vmatpush1.bf16.msra.mxu1 %v10729_v46  ;;  %v369_v46 = vld [vmem:[%s13969_s1 + $0x450] sm:$0xff] }
 0x2bf   :  { %10732 = vmatprep.subr.bf16.mxu1 %v10731_v47  ;;  %v372_v47 = vld [vmem:[%s13969_s1 + $0x468] sm:$0xff] }
 0x2c0   :  { %v10771_v49 = vpack.c.bf16 %v374_v48, %v372_v47  ;;  %v412_v47 = vld [vmem:[%s13969_s1 + $0x5a8] sm:$0xff]  ;;  %v414_v48 = vld [vmem:[%s13969_s1 + $0x5b8] sm:$0xff] }
 0x2c2   :  { %10734 = vmatpush1.bf16.msra.mxu1 %v10733_v52  ;;  %v376_v52 = vld [vmem:[%s13969_s1 + $0x488] sm:$0xff] }
 0x2c3   :  { %10736 = vmatprep.subr.bf16.mxu1 %v10735_v12  ;;  %v378_v12 = vld [vmem:[%s13969_s1 + $0x498] sm:$0xff] }
 0x2c4   :  { %v10775_v53 = vpack.c.bf16 %v378_v12, %v376_v52  ;;  %v416_v52 = vld [vmem:[%s13969_s1 + $0x5c8] sm:$0xff]  ;;  %v418_v12 = vld [vmem:[%s13969_s1 + $0x5d8] sm:$0xff] }
 0x2c6   :  { %10738 = vmatpush1.bf16.msra.mxu1 %v10737_v6  ;;  %v380_v6 = vld [vmem:[%s13969_s1 + $0x4a8] sm:$0xff] }
 0x2c7   :  { %10740 = vmatprep.subr.bf16.mxu1 %v10739_v16  ;;  %v382_v16 = vld [vmem:[%s13969_s1 + $0x4b8] sm:$0xff] }
 0x2c8   :  { %v10779_v4 = vpack.c.bf16 %v382_v16, %v380_v6  ;;  %v420_v6 = vld [vmem:[%s13969_s1 + $0x5e8] sm:$0xff]  ;;  %v422_v16 = vld [vmem:[%s13969_s1 + $0x5f8] sm:$0xff] }
 0x2ca   :  { %10742 = vmatpush1.bf16.msra.mxu1 %v10741_v36  ;;  %v384_v36 = vld [vmem:[%s13969_s1 + $0x4c8] sm:$0xff] }
 0x2cb   :  { %10744 = vmatprep.subr.bf16.mxu1 %v10743_v40  ;;  %v386_v40 = vld [vmem:[%s13969_s1 + $0x4d8] sm:$0xff] }
 0x2cc   :  { %v10783_v55 = vpack.c.bf16 %v386_v40, %v384_v36  ;;  %v10821_v36 = vpack.c.bf16 %v421_v33, %v419_v29  ;;  %v2995_v40 = vshrl.u32 %v489_v7, 7 }
 0x2ce   :  { %10746 = vmatpush1.bf16.msra.mxu1 %v10745_v57  ;;  %v388_v57 = vld [vmem:[%s13969_s1 + $0x4e8] sm:$0xff] }
 0x2cf   :  { %10748 = vmatprep.subr.bf16.mxu1 %v10747_v58  ;;  %v390_v58 = vld [vmem:[%s13969_s1 + $0x4f8] sm:$0xff] }
 0x2d0   :  { %v10787_v60 = vpack.c.bf16 %v390_v58, %v388_v57  ;;  %v3000_v57 = vsub.s32 1, %v2995_v40 }
 0x2d2   :  { %10750 = vmatpush1.bf16.msra.mxu1 %v10749_v63  ;;  %v392_v63 = vld [vmem:[%s13969_s1 + $0x508] sm:$0xff] }
 0x2d3   :  { %10752 = vmatprep.subr.bf16.mxu1 %v10751_v1  ;;  %v394_v1 = vld [vmem:[%s13969_s1 + $0x518] sm:$0xff] }
 0x2d4   :  { %v10791_v3 = vpack.c.bf16 %v394_v1, %v392_v63  ;;  %v12719_v63 = vrot.slane %v228_v56, %v3000_v57 }
 0x2d5   :  { %v2693_v22 = vpop.f32.mrb[2].mxu1 }
 0x2d6   :  { %10754 = vmatpush1.bf16.msra.mxu1 %v10753_v10  ;;  %v2695_v23 = vpop.f32.mrb[3].mxu1  ;;  %v396_v10 = vld [vmem:[%s13969_s1 + $0x528] sm:$0xff] }
 0x2d7   :  { %2913 = vmatprep.mubr.f32.mxu1 %v2695_v23  ;;  %10756 = vmatprep.subr.bf16.mxu1 %v10755_v11  ;;  %v398_v11 = vld [vmem:[%s13969_s1 + $0x538] sm:$0xff] }
 0x2d8   :  { %v10795_v14 = vpack.c.bf16 %v398_v11, %v396_v10  ;;  %v402_v23 = vld [vmem:[%s13969_s1 + $0x558] sm:$0xff]  ;;  %v3007_v11 = vld [vmem:[%s13924_s15 + $0x4] sm:$0xf] }
 0x2da   :  { %10758 = vmatpush1.bf16.msra.mxu1 %v10757_v25  ;;  %v10797_v25 = vpack.c.bf16 %v397_v19, %v395_v18 }
 0x2db   :  { %10760 = vmatprep.subr.bf16.mxu1 %v10759_v27 }
 0x2dd   :  { %2914 = vmatmul.mubr.f32.vlgmr.msra.gmra.mrb[6].mxu1 %v2693_v22  ;;  %v400_v22 = vld [vmem:[%s13969_s1 + $0x548] sm:$0xff] }
 0x2de   :  { %10762 = vmatpush1.bf16.msra.mxu1 %v10761_v34  ;;  %2984 = vmatprep.mubr.f32.mxu1 %v12403_v20  ;;  %v10769_v20 = vpack.c.bf16 %v369_v46, %v367_v45  ;;  %v10799_v27 = vpack.c.bf16 %v402_v23, %v400_v22  ;;  %v10801_v34 = vpack.c.bf16 %v401_v30, %v399_v28  ;;  %v407_v45 = vld [vmem:[%s13969_s1 + $0x580] sm:$0xff]  ;;  %v409_v46 = vld [vmem:[%s13969_s1 + $0x590] sm:$0xff]  ;;  %s11397_s1 = smov 10  }
 0x2df   :  { %10764 = vmatprep.subr.bf16.mxu1 %v10763_v35  ;;  %v10803_v35 = vpack.c.bf16 %v406_v32, %v404_v31 }
 0x2e2   :  { %10766 = vmatpush1.bf16.msra.mxu1 %v10765_v43  ;;  %v10805_v43 = vpack.c.bf16 %v405_v38, %v403_v37  ;;  %v3009_v37 = vld [vmem:[%s13924_s15 + $0xc] sm:$0xf] }
 0x2e3   :  { %10768 = vmatprep.subr.bf16.mxu1 %v10767_v44  ;;  %v10807_v44 = vpack.c.bf16 %v410_v42, %v408_v39 }
 0x2e6   :  { %10770 = vmatpush1.bf16.msra.mxu1 %v10769_v20  ;;  %v10809_v20 = vpack.c.bf16 %v409_v46, %v407_v45 }
 0x2e7   :  { %10772 = vmatprep.subr.bf16.mxu1 %v10771_v49  ;;  %v10811_v49 = vpack.c.bf16 %v414_v48, %v412_v47  ;;  %v3011_v48 = vld [vmem:[%s13924_s15 + $0x14] sm:$0xf] }
 0x2ea   :  { %10774 = vmatpush1.bf16.msra.mxu1 %v10773_v24  ;;  %v10813_v24 = vpack.c.bf16 %v413_v15, %v411_v51 }
 0x2eb   :  { %10776 = vmatprep.subr.bf16.mxu1 %v10775_v53  ;;  %v10815_v53 = vpack.c.bf16 %v418_v12, %v416_v52  ;;  %v3012_v52 = vld [vmem:[%s13924_s15 + $0x18] sm:$0xf] }
 0x2ee   :  { %10778 = vmatpush1.bf16.msra.mxu1 %v10777_v26  ;;  %v10817_v26 = vpack.c.bf16 %v417_v21, %v415_v54  ;;  %v3013_v21 = vld [vmem:[%s13924_s15 + $0x1c] sm:$0xf] }
 0x2ef   :  { %10780 = vmatprep.subr.bf16.mxu1 %v10779_v4  ;;  %v10819_v4 = vpack.c.bf16 %v422_v16, %v420_v6  ;;  %v3014_v16 = vld [vmem:[%s13924_s15 + $0x20] sm:$0xf] }
 0x2f2   :  { %10782 = vmatpush1.bf16.msra.mxu1 %v10781_v41  ;;  %v467_v41 = vld [vmem:[#allocation19] sm:$0xff] }
 0x2f3   :  { %10784 = vmatprep.subr.bf16.mxu1 %v10783_v55  ;;  %v2996_v55 = vsub.s32 0, %v2995_v40  ;;  %v2776_v50 = vcombine.high %v467_v41, %v467_v41 }
 0x2f6   :  { %10786 = vmatpush1.bf16.msra.mxu1 %v10785_v59 }
 0x2f7   :  { %10788 = vmatprep.subr.bf16.mxu1 %v10787_v60  ;;  %v12717_v60 = vrot.slane %v228_v56, %v2996_v55 }
 0x2fa   :  { %10790 = vmatpush1.bf16.msra.mxu1 %v10789_v2 }
 0x2fb   :  { %10792 = vmatprep.subr.bf16.mxu1 %v10791_v3 }
 0x2fe   :  { %10794 = vmatpush1.bf16.msra.mxu1 %v10793_v13 }
 0x2ff   :  { %10796 = vmatprep.subr.bf16.mxu1 %v10795_v14 }
 0x302   :  { %10798 = vmatpush1.bf16.msra.mxu1 %v10797_v25 }
 0x303   :  { %10800 = vmatprep.subr.bf16.mxu1 %v10799_v27  ;;  %v3006_v27 = vld [vmem:[%s13924_s15] sm:$0xf] }
 0x306   :  { %10802 = vmatpush1.bf16.msra.mxu1 %v10801_v34  ;;  %v3008_v34 = vld [vmem:[%s13924_s15 + $0x8] sm:$0xf] }
 0x307   :  { %10804 = vmatprep.subr.bf16.mxu1 %v10803_v35 }
 0x30a   :  { %10806 = vmatpush1.bf16.msra.mxu1 %v10805_v43  ;;  %v3010_v43 = vld [vmem:[%s13924_s15 + $0x10] sm:$0xf]  ;;  %s13974_s15 = sld [smem:[#allocation34_spill]] }
 0x30b   :  { %10808 = vmatprep.subr.bf16.mxu1 %v10807_v44 }
 0x30e   :  { %10810 = vmatpush1.bf16.msra.mxu1 %v10809_v20 }
 0x30f   :  { %10812 = vmatprep.subr.bf16.mxu1 %v10811_v49 }
 0x312   :  { %10814 = vmatpush1.bf16.msra.mxu1 %v10813_v24 }
 0x313   :  { %10816 = vmatprep.subr.bf16.mxu1 %v10815_v53 }
 0x316   :  { %10818 = vmatpush1.bf16.msra.mxu1 %v10817_v26  ;;  %v3015_v26 = vld [vmem:[#allocation10] sm:$0xff] }
 0x317   :  { %10820 = vmatprep.subr.bf16.mxu1 %v10819_v4  ;;  %v3805_v4 = vcombine.high %v3015_v26, %v3015_v26 }
 0x31a   :  { %10822 = vmatpush1.bf16.msra.mxu1 %v10821_v36 }
 0x31d   :  { %2985 = vmatmul.mubr.f32.vlgmr.msra.gmra.mrb[6].mxu1 %v12401_v17 }
 0x3f0   :  { %v2986_v58 = vpop.f32.mrb[6].mxu1 }
 0x3f1   :  { %v10939_v59 = vadd.f32 %v2986_v58, %v467_v41  ;;  %v2988_v61 = vpop.f32.mrb[7].mxu1 }
 0x3f2   :  { %v10940_v62 = vadd.f32 %v2988_v61, %v2776_v50 }
 0x3f3   :  { %v2991_v1 = vmax.f32 %v10939_v59, 0.0 }
 0x3f4   :  { %v2992_v17 = vmax.f32 %v10940_v62, 0.0  ;;  %v3814_v62 = vld [vmem:[%s13926_s17 + $0x4] sm:$0xf] }
 0x3f5   :  { %v12722_v7 = vmul.f32 %v12717_v60, %v2991_v1 }
 0x3f6   :  { %v12725_v2 = vmul.f32 %v12719_v63, %v2992_v17 }
 0x3f7   :  { %3023 = vrot.lane.b32.xlu0 %v12722_v7, %s11397_s1 }
 0x3f8   :  { %3025 = vrot.lane.b32.xlu1 %v12725_v2, %s11397_s1 }
 0x3fb   :  { %3016 = vrot.lane.b32.xlu0 %v12722_v7, %s11398_s24 }
 0x3fc   :  { %3018 = vrot.lane.b32.xlu1 %v12725_v2, %s11398_s24 }
 0x3ff   :  { %3190 = vrot.lane.b32.xlu0 %v12722_v7, %s11399_s6 }
 0x400   :  { %3192 = vrot.lane.b32.xlu1 %v12725_v2, %s11399_s6 }
 0x403   :  { %3279 = vrot.lane.b32.xlu0 %v12722_v7, %s11390_s11 }
 0x404   :  { %3281 = vrot.lane.b32.xlu1 %v12725_v2, %s11390_s11 }
 0x407   :  { %3449 = vrot.lane.b32.xlu0 %v12722_v7, %s11391_s20 }
 0x408   :  { %3451 = vrot.lane.b32.xlu1 %v12725_v2, %s11391_s20 }
 0x40b   :  { %3537 = vrot.lane.b32.xlu0 %v12722_v7, %s11400_s26 }
 0x40c   :  { %3539 = vrot.lane.b32.xlu1 %v12725_v2, %s11400_s26 }
 0x40f   :  { %3626 = vrot.lane.b32.xlu0 %v12722_v7, %s11401_s9 }
 0x410   :  { %3628 = vrot.lane.b32.xlu1 %v12725_v2, %s11401_s9 }
 0x413   :  { %3715 = vrot.lane.b32.xlu0 %v12722_v7, %s11402_s0 }
 0x414   :  { %3717 = vrot.lane.b32.xlu1 %v12725_v2, %s11402_s0 }
 0x469   :  { %v3024_v3 = vpop.permute.xlu0 %3023 }
 0x46a   :  { %v3026_v5 = vpop.permute.xlu1 %3025 }
 0x46b   :  { %v3028_v9 = vsel %vm3027_vm10, %v3024_v3, %v3026_v5  ;;  %v3029_v10 = vsel %vm3027_vm10, %v3026_v5, %v3024_v3 }
 0x46c   :  { %9987 = vmatprep.subr.msk.mxu0 %vm521_vm1, %v3028_v9 }
 0x46d   :  { %9988 = vmatpush1.msk.msra.mxu0 %vm521_vm1, %v3029_v10  ;;  %v3017_v13 = vpop.permute.xlu0 %3016 }
 0x46e   :  { %v3019_v14 = vpop.permute.xlu1 %3018  ;;  %9989 = vmatmul.mubr.msk.f32.vlgmr.msra.gmra.mrb[4].mxu0 %vm517_vm2, %v3007_v11 }
 0x46f   :  { %v3021_v18 = vsel %vm3020_vm11, %v3017_v13, %v3019_v14  ;;  %v3022_v19 = vsel %vm3020_vm11, %v3019_v14, %v3017_v13  ;;  %3183 = vmatprep.mubr.f32.mxu0 %v11388_v0  ;;  %v3813_v13 = vld [vmem:[%s13926_s17] sm:$0xf] }
 0x470   :  { %9990 = vmatprep.subr.msk.mxu0 %vm521_vm1, %v3021_v18 }
 0x471   :  { %9991 = vmatpush1.msk.msra.mxu0 %vm521_vm1, %v3022_v19  ;;  %v3191_v22 = vpop.permute.xlu0 %3190 }
 0x472   :  { %v3193_v23 = vpop.permute.xlu1 %3192 }
 0x473   :  { %v3195_v25 = vsel %vm3194_vm12, %v3191_v22, %v3193_v23  ;;  %v3196_v30 = vsel %vm3194_vm12, %v3193_v23, %v3191_v22  ;;  %v3815_v23 = vld [vmem:[%s13926_s17 + $0x8] sm:$0xf] }
 0x474   :  { %9993 = vmatprep.subr.msk.mxu0 %vm521_vm1, %v3195_v25 }
 0x475   :  { %v3280_v28 = vpop.permute.xlu0 %3279 }
 0x476   :  { %v3282_v31 = vpop.permute.xlu1 %3281  ;;  %9992 = vmatmul.mubr.msk.f32.vlgmr.msra.gmra.mrb[4].mxu0 %vm517_vm2, %v3006_v27  ;;  %v3816_v27 = vld [vmem:[%s13926_s17 + $0xc] sm:$0xf] }
 0x477   :  { %v3283_v32 = vsel %vm1258_vm3, %v3280_v28, %v3282_v31  ;;  %9994 = vmatpush1.msk.msra.mxu0 %vm521_vm1, %v3196_v30  ;;  %3270 = vmatprep.mubr.f32.mxu0 %v11388_v0  ;;  %v3284_v35 = vsel %vm1258_vm3, %v3282_v31, %v3280_v28 }
 0x478   :  { %9996 = vmatprep.subr.msk.mxu0 %vm521_vm1, %v3283_v32  ;;  %v3817_v32 = vld [vmem:[%s13926_s17 + $0x10] sm:$0xf] }
 0x479   :  { %v3450_v38 = vpop.permute.xlu0 %3449 }
 0x47a   :  { %v3452_v39 = vpop.permute.xlu1 %3451 }
 0x47b   :  { %v3454_v42 = vsel %vm1751_vm4, %v3452_v39, %v3450_v38  ;;  %v3453_v46 = vsel %vm1751_vm4, %v3450_v38, %v3452_v39  ;;  %v3818_v39 = vld [vmem:[%s13926_s17 + $0x14] sm:$0xf] }
 0x47d   :  { %v3538_v44 = vpop.permute.xlu0 %3537 }
 0x47e   :  { %9995 = vmatmul.mubr.msk.f32.vlgmr.msra.gmra.mrb[4].mxu0 %vm517_vm2, %v3008_v34  ;;  %v3540_v45 = vpop.permute.xlu1 %3539 }
 0x47f   :  { %9997 = vmatpush1.msk.msra.mxu0 %vm521_vm1, %v3284_v35  ;;  %3358 = vmatprep.mubr.f32.mxu0 %v11388_v0  ;;  %v3543_v47 = vsel %vm3541_vm13, %v3540_v45, %v3538_v44  ;;  %v3542_v51 = vsel %vm3541_vm13, %v3538_v44, %v3540_v45 }
 0x480   :  { %9999 = vmatprep.subr.msk.mxu0 %vm521_vm1, %v12725_v2 }
 0x481   :  { %v3627_v20 = vpop.permute.xlu0 %3626 }
 0x482   :  { %v3629_v49 = vpop.permute.xlu1 %3628 }
 0x483   :  { %v3632_v15 = vsel %vm3630_vm14, %v3629_v49, %v3627_v20  ;;  %v3631_v53 = vsel %vm3630_vm14, %v3627_v20, %v3629_v49 }
 0x485   :  { %v3716_v12 = vpop.permute.xlu0 %3715 }
 0x486   :  { %9998 = vmatmul.mubr.msk.f32.vlgmr.msra.gmra.mrb[4].mxu0 %vm517_vm2, %v3009_v37  ;;  %v3718_v24 = vpop.permute.xlu1 %3717 }
 0x487   :  { %10000 = vmatpush1.msk.msra.mxu0 %vm521_vm1, %v12722_v7  ;;  %3440 = vmatprep.mubr.f32.mxu0 %v11388_v0  ;;  %v3721_v54 = vsel %vm3719_vm15, %v3718_v24, %v3716_v12  ;;  %v3720_v6 = vsel %vm3719_vm15, %v3716_v12, %v3718_v24  ;;  %v3822_v12 = vld [vmem:[#allocation12] sm:$0xff] }
 0x488   :  { %10002 = vmatprep.subr.msk.mxu0 %vm521_vm1, %v3454_v42  ;;  %v4606_v24 = vcombine.high %v3822_v12, %v3822_v12 }
 0x48e   :  { %10001 = vmatmul.mubr.msk.f32.vlgmr.msra.gmra.mrb[4].mxu0 %vm517_vm2, %v3010_v43 }
 0x48f   :  { %10003 = vmatpush1.msk.msra.mxu0 %vm521_vm1, %v3453_v46  ;;  %3528 = vmatprep.mubr.f32.mxu0 %v11388_v0  ;;  %v3819_v46 = vld [vmem:[%s13926_s17 + $0x18] sm:$0xf] }
 0x490   :  { %10005 = vmatprep.subr.msk.mxu0 %vm521_vm1, %v3543_v47 }
 0x496   :  { %10004 = vmatmul.mubr.msk.f32.vlgmr.msra.gmra.mrb[4].mxu0 %vm517_vm2, %v3011_v48 }
 0x497   :  { %10006 = vmatpush1.msk.msra.mxu0 %vm521_vm1, %v3542_v51  ;;  %3617 = vmatprep.mubr.f32.mxu0 %v11388_v0  ;;  %v3820_v51 = vld [vmem:[%s13926_s17 + $0x1c] sm:$0xf] }
 0x498   :  { %10008 = vmatprep.subr.msk.mxu0 %vm521_vm1, %v3632_v15 }
 0x49e   :  { %10007 = vmatmul.mubr.msk.f32.vlgmr.msra.gmra.mrb[4].mxu0 %vm517_vm2, %v3012_v52  ;;  %v3821_v52 = vld [vmem:[%s13926_s17 + $0x20] sm:$0xf]  ;;  %s11413_s17 = smov 125  }
 0x49f   :  { %10009 = vmatpush1.msk.msra.mxu0 %vm521_vm1, %v3631_v53  ;;  %3706 = vmatprep.mubr.f32.mxu0 %v11388_v0 }
 0x4a0   :  { %10011 = vmatprep.subr.msk.mxu0 %vm521_vm1, %v3721_v54 }
 0x4a6   :  { %10010 = vmatmul.mubr.msk.f32.vlgmr.msra.gmra.mrb[4].mxu0 %vm517_vm2, %v3013_v21 }
 0x4a7   :  { %10012 = vmatpush1.msk.msra.mxu0 %vm521_vm1, %v3720_v6  ;;  %3795 = vmatprep.mubr.f32.mxu0 %v11388_v0 }
 0x4ae   :  { %10013 = vmatmul.mubr.msk.f32.vlgmr.msra.gmra.mrb[4].mxu0 %vm517_vm2, %v3014_v16 }
 0x4af   :  { %3908 = vmatprep.mubr.f32.mxu0 %v11388_v0 }
 0x581   :  { %v3797_v29 = vpop.f32.mrb[4].mxu0 }
 0x582   :  { %v3807_v33 = vadd.f32 %v3797_v29, %v3015_v26  ;;  %v3799_v36 = vpop.f32.mrb[5].mxu0 }
 0x583   :  { %v3808_v40 = vadd.f32 %v3805_v4, %v3799_v36 }
 0x584   :  { %v3809_v41 = vmax.f32 %v3807_v33, 0.0 }
 0x585   :  { %v3810_v55 = vmax.f32 %v3808_v40, 0.0 }
 0x586   :  { %v3811_v56 = vmul.f32 %v3809_v41, %v12717_v60 }
 0x587   :  { %v3812_v50 = vmul.f32 %v3810_v55, %v12719_v63 }
 0x588   :  { %3829 = vrot.lane.b32.xlu0 %v3811_v56, %s11397_s1 }
 0x589   :  { %3831 = vrot.lane.b32.xlu1 %v3812_v50, %s11397_s1 }
 0x58c   :  { %3823 = vrot.lane.b32.xlu0 %v3811_v56, %s11398_s24 }
 0x58d   :  { %3825 = vrot.lane.b32.xlu1 %v3812_v50, %s11398_s24 }
 0x590   :  { %3995 = vrot.lane.b32.xlu0 %v3811_v56, %s11399_s6 }
 0x591   :  { %3997 = vrot.lane.b32.xlu1 %v3812_v50, %s11399_s6 }
 0x594   :  { %4083 = vrot.lane.b32.xlu0 %v3811_v56, %s11390_s11 }
 0x595   :  { %4085 = vrot.lane.b32.xlu1 %v3812_v50, %s11390_s11 }
 0x598   :  { %4253 = vrot.lane.b32.xlu0 %v3811_v56, %s11391_s20 }
 0x599   :  { %4255 = vrot.lane.b32.xlu1 %v3812_v50, %s11391_s20 }
 0x59c   :  { %4341 = vrot.lane.b32.xlu0 %v3811_v56, %s11400_s26 }
 0x59d   :  { %4343 = vrot.lane.b32.xlu1 %v3812_v50, %s11400_s26 }
 0x5a0   :  { %4429 = vrot.lane.b32.xlu0 %v3811_v56, %s11401_s9 }
 0x5a1   :  { %4431 = vrot.lane.b32.xlu1 %v3812_v50, %s11401_s9 }
 0x5a4   :  { %4517 = vrot.lane.b32.xlu0 %v3811_v56, %s11402_s0 }
 0x5a5   :  { %4519 = vrot.lane.b32.xlu1 %v3812_v50, %s11402_s0 }
 0x5fa   :  { %v3830_v57 = vpop.permute.xlu0 %3829 }
 0x5fb   :  { %v3832_v58 = vpop.permute.xlu1 %3831 }
 0x5fc   :  { %v3833_v59 = vsel %vm3027_vm10, %v3830_v57, %v3832_v58  ;;  %v3834_v61 = vsel %vm3027_vm10, %v3832_v58, %v3830_v57 }
 0x5fd   :  { %10014 = vmatprep.subr.msk.mxu0 %vm521_vm1, %v3833_v59 }
 0x5fe   :  { %v3824_v1 = vpop.permute.xlu0 %3823  ;;  %10015 = vmatpush1.msk.msra.mxu0 %vm521_vm1, %v3834_v61 }
 0x5ff   :  { %10016 = vmatmul.mubr.msk.f32.vlgmr.msra.gmra.mrb[6].mxu0 %vm517_vm2, %v3814_v62  ;;  %v3826_v17 = vpop.permute.xlu1 %3825 }
 0x600   :  { %v3827_v3 = vsel %vm3020_vm11, %v3824_v1, %v3826_v17  ;;  %v3828_v5 = vsel %vm3020_vm11, %v3826_v17, %v3824_v1  ;;  %3988 = vmatprep.mubr.f32.mxu0 %v11388_v0 }
 0x601   :  { %10017 = vmatprep.subr.msk.mxu0 %vm521_vm1, %v3827_v3 }
 0x602   :  { %v3996_v9 = vpop.permute.xlu0 %3995  ;;  %10018 = vmatpush1.msk.msra.mxu0 %vm521_vm1, %v3828_v5 }
 0x603   :  { %v3998_v10 = vpop.permute.xlu1 %3997 }
 0x604   :  { %v3999_v11 = vsel %vm3194_vm12, %v3996_v9, %v3998_v10  ;;  %v4000_v18 = vsel %vm3194_vm12, %v3998_v10, %v3996_v9 }
 0x605   :  { %10020 = vmatprep.subr.msk.mxu0 %vm521_vm1, %v3999_v11 }
 0x606   :  { %v4084_v14 = vpop.permute.xlu0 %4083 }
 0x607   :  { %10019 = vmatmul.mubr.msk.f32.vlgmr.msra.gmra.mrb[6].mxu0 %vm517_vm2, %v3813_v13  ;;  %v4086_v19 = vpop.permute.xlu1 %4085 }
 0x608   :  { %10021 = vmatpush1.msk.msra.mxu0 %vm521_vm1, %v4000_v18  ;;  %v4087_v22 = vsel %vm1258_vm3, %v4084_v14, %v4086_v19  ;;  %4074 = vmatprep.mubr.f32.mxu0 %v11388_v0  ;;  %v4088_v25 = vsel %vm1258_vm3, %v4086_v19, %v4084_v14 }
 0x609   :  { %10023 = vmatprep.subr.msk.mxu0 %vm521_vm1, %v4087_v22 }
 0x60a   :  { %v4254_v28 = vpop.permute.xlu0 %4253 }
 0x60b   :  { %v4256_v30 = vpop.permute.xlu1 %4255 }
 0x60c   :  { %v4258_v31 = vsel %vm1751_vm4, %v4256_v30, %v4254_v28  ;;  %v4257_v37 = vsel %vm1751_vm4, %v4254_v28, %v4256_v30 }
 0x60e   :  { %v4342_v34 = vpop.permute.xlu0 %4341 }
 0x60f   :  { %10022 = vmatmul.mubr.msk.f32.vlgmr.msra.gmra.mrb[6].mxu0 %vm517_vm2, %v3815_v23  ;;  %v4344_v35 = vpop.permute.xlu1 %4343 }
 0x610   :  { %10024 = vmatpush1.msk.msra.mxu0 %vm521_vm1, %v4088_v25  ;;  %4162 = vmatprep.mubr.f32.mxu0 %v11388_v0  ;;  %v4346_v38 = vsel %vm3541_vm13, %v4344_v35, %v4342_v34  ;;  %v4345_v44 = vsel %vm3541_vm13, %v4342_v34, %v4344_v35 }
 0x611   :  { %10026 = vmatprep.subr.msk.mxu0 %vm521_vm1, %v3812_v50 }
 0x612   :  { %v4430_v42 = vpop.permute.xlu0 %4429 }
 0x613   :  { %v4432_v43 = vpop.permute.xlu1 %4431 }
 0x614   :  { %v4434_v45 = vsel %vm3630_vm14, %v4432_v43, %v4430_v42  ;;  %v4433_v20 = vsel %vm3630_vm14, %v4430_v42, %v4432_v43 }
 0x616   :  { %v4518_v47 = vpop.permute.xlu0 %4517 }
 0x617   :  { %10025 = vmatmul.mubr.msk.f32.vlgmr.msra.gmra.mrb[6].mxu0 %vm517_vm2, %v3816_v27  ;;  %v4520_v48 = vpop.permute.xlu1 %4519 }
 0x618   :  { %10027 = vmatpush1.msk.msra.mxu0 %vm521_vm1, %v3811_v56  ;;  %4244 = vmatprep.mubr.f32.mxu0 %v11388_v0  ;;  %v4522_v49 = vsel %vm3719_vm15, %v4520_v48, %v4518_v47  ;;  %v4521_v15 = vsel %vm3719_vm15, %v4518_v47, %v4520_v48 }
 0x619   :  { %10029 = vmatprep.subr.msk.mxu0 %vm521_vm1, %v4258_v31 }
 0x61f   :  { %10028 = vmatmul.mubr.msk.f32.vlgmr.msra.gmra.mrb[6].mxu0 %vm517_vm2, %v3817_v32 }
 0x620   :  { %10030 = vmatpush1.msk.msra.mxu0 %vm521_vm1, %v4257_v37  ;;  %4332 = vmatprep.mubr.f32.mxu0 %v11388_v0 }
 0x621   :  { %10032 = vmatprep.subr.msk.mxu0 %vm521_vm1, %v4346_v38 }
 0x627   :  { %10031 = vmatmul.mubr.msk.f32.vlgmr.msra.gmra.mrb[6].mxu0 %vm517_vm2, %v3818_v39 }
 0x628   :  { %10033 = vmatpush1.msk.msra.mxu0 %vm521_vm1, %v4345_v44  ;;  %4420 = vmatprep.mubr.f32.mxu0 %v11388_v0 }
 0x629   :  { %10035 = vmatprep.subr.msk.mxu0 %vm521_vm1, %v4434_v45 }
 0x62f   :  { %10034 = vmatmul.mubr.msk.f32.vlgmr.msra.gmra.mrb[6].mxu0 %vm517_vm2, %v3819_v46 }
 0x630   :  { %10036 = vmatpush1.msk.msra.mxu0 %vm521_vm1, %v4433_v20  ;;  %4508 = vmatprep.mubr.f32.mxu0 %v11388_v0 }
 0x631   :  { %10038 = vmatprep.subr.msk.mxu0 %vm521_vm1, %v4522_v49 }
 0x637   :  { %10037 = vmatmul.mubr.msk.f32.vlgmr.msra.gmra.mrb[6].mxu0 %vm517_vm2, %v3820_v51 }
 0x638   :  { %10039 = vmatpush1.msk.msra.mxu0 %vm521_vm1, %v4521_v15  ;;  %4596 = vmatprep.mubr.f32.mxu0 %v11388_v0 }
 0x63f   :  { %10040 = vmatmul.mubr.msk.f32.vlgmr.msra.gmra.mrb[6].mxu0 %vm517_vm2, %v3821_v52 }
 0x640   :  { %4711 = vmatprep.mubr.f32.mxu0 %v11388_v0 }
 0x712   :  { %v4598_v53 = vpop.f32.mrb[6].mxu0 }
 0x713   :  { %v4608_v54 = vadd.f32 %v4598_v53, %v3822_v12  ;;  %v4600_v21 = vpop.f32.mrb[7].mxu0  ;;  %v4617_v53 = vld [vmem:[%s13972_s7 + $0x8] sm:$0xff] }
 0x714   :  { %v4609_v6 = vadd.f32 %v4606_v24, %v4600_v21 }
 0x715   :  { %v4610_v16 = vadd.f32 %v4608_v54, %v12722_v7 }
 0x716   :  { %v4611_v26 = vadd.f32 %v4609_v6, %v12725_v2 }
 0x717   :  { %v4612_v4 = vmax.f32 %v4610_v16, 0.0 }
 0x718   :  { %v4613_v29 = vmax.f32 %v4611_v26, 0.0 }
 0x719   :  { %v12978_v33 = vmul.f32 %v4612_v4, %v12717_v60 }
 0x71a   :  { %v12981_v36 = vmul.f32 %v4613_v29, %v12719_v63 }
 0x71b   :  { %4632 = vrot.lane.b32.xlu0 %v12978_v33, %s11397_s1 }
 0x71c   :  { %4634 = vrot.lane.b32.xlu1 %v12981_v36, %s11397_s1  ;;  %s11414_s1 = smov 124  }
 0x71f   :  { %4626 = vrot.lane.b32.xlu0 %v12978_v33, %s11398_s24 }
 0x720   :  { %4628 = vrot.lane.b32.xlu1 %v12981_v36, %s11398_s24  ;;  %s13971_s24 = sld [smem:[#allocation29_spill]] }
 0x723   :  { %4798 = vrot.lane.b32.xlu0 %v12978_v33, %s11399_s6 }
 0x724   :  { %4800 = vrot.lane.b32.xlu1 %v12981_v36, %s11399_s6 }
 0x726   :  { %v439_v60 = vld [vmem:[%s13971_s24 + $0x80] sm:$0xff]  ;;  %v440_v63 = vld [vmem:[%s13971_s24 + $0x88] sm:$0xff]  ;;  %v441_v55 = vld [vmem:[%s13971_s24 + $0x90] sm:$0xff] }
 0x727   :  { %4886 = vrot.lane.b32.xlu0 %v12978_v33, %s11390_s11  ;;  %v13021_v7 = vpack.c.bf16 %v440_v63, %v439_v60  ;;  %v423_v2 = vld [vmem:[%s13971_s24] sm:$0xff]  ;;  %v424_v40 = vld [vmem:[%s13971_s24 + $0x8] sm:$0xff]  ;;  %v442_v56 = vld [vmem:[%s13971_s24 + $0x98] sm:$0xff] }
 0x728   :  { %4888 = vrot.lane.b32.xlu1 %v12981_v36, %s11390_s11  ;;  %v13030_v41 = vpack.c.bf16 %v424_v40, %v423_v2  ;;  %v13039_v50 = vpack.c.bf16 %v442_v56, %v441_v55  ;;  %v425_v57 = vld [vmem:[%s13971_s24 + $0x10] sm:$0xff]  ;;  %v426_v58 = vld [vmem:[%s13971_s24 + $0x18] sm:$0xff]  ;;  %v443_v61 = vld [vmem:[%s13971_s24 + $0xa0] sm:$0xff] }
 0x729   :  { %10856 = vmatprep.subr.bf16.mxu1 %v13021_v7  ;;  %v13047_v59 = vpack.c.bf16 %v426_v58, %v425_v57  ;;  %v444_v62 = vld [vmem:[%s13971_s24 + $0xa8] sm:$0xff]  ;;  %v427_v17 = vld [vmem:[%s13971_s24 + $0x20] sm:$0xff]  ;;  %v445_v9 = vld [vmem:[%s13971_s24 + $0xb0] sm:$0xff] }
 0x72a   :  { %10858 = vmatpush3.bf16.msra.mxu1 %v13030_v41  ;;  %v13057_v1 = vpack.c.bf16 %v444_v62, %v443_v61  ;;  %v428_v3 = vld [vmem:[%s13971_s24 + $0x28] sm:$0xff]  ;;  %v446_v10 = vld [vmem:[%s13971_s24 + $0xb8] sm:$0xff]  ;;  %v429_v13 = vld [vmem:[%s13971_s24 + $0x30] sm:$0xff] }
 0x72b   :  { %5056 = vrot.lane.b32.xlu0 %v12978_v33, %s11391_s20  ;;  %10860 = vmatprep.subr.bf16.mxu1 %v13039_v50  ;;  %v13065_v5 = vpack.c.bf16 %v428_v3, %v427_v17  ;;  %v13075_v11 = vpack.c.bf16 %v446_v10, %v445_v9  ;;  %v430_v14 = vld [vmem:[%s13971_s24 + $0x38] sm:$0xff]  ;;  %v447_v19 = vld [vmem:[%s13971_s24 + $0xc0] sm:$0xff]  ;;  %v448_v22 = vld [vmem:[%s13971_s24 + $0xc8] sm:$0xff] }
 0x72c   :  { %5058 = vrot.lane.b32.xlu1 %v12981_v36, %s11391_s20  ;;  %v13083_v18 = vpack.c.bf16 %v430_v14, %v429_v13  ;;  %v13093_v23 = vpack.c.bf16 %v448_v22, %v447_v19  ;;  %v431_v25 = vld [vmem:[%s13971_s24 + $0x40] sm:$0xff]  ;;  %v432_v27 = vld [vmem:[%s13971_s24 + $0x48] sm:$0xff]  ;;  %v449_v30 = vld [vmem:[%s13971_s24 + $0xd0] sm:$0xff] }
 0x72d   :  { %v13101_v28 = vpack.c.bf16 %v432_v27, %v431_v25  ;;  %v450_v31 = vld [vmem:[%s13971_s24 + $0xd8] sm:$0xff]  ;;  %v433_v34 = vld [vmem:[%s13971_s24 + $0x50] sm:$0xff]  ;;  %v451_v38 = vld [vmem:[%s13971_s24 + $0xe0] sm:$0xff] }
 0x72e   :  { %10862 = vmatpush3.bf16.msra.mxu1 %v13047_v59  ;;  %v13111_v32 = vpack.c.bf16 %v450_v31, %v449_v30  ;;  %v434_v35 = vld [vmem:[%s13971_s24 + $0x58] sm:$0xff]  ;;  %v452_v39 = vld [vmem:[%s13971_s24 + $0xe8] sm:$0xff]  ;;  %v435_v43 = vld [vmem:[%s13971_s24 + $0x60] sm:$0xff] }
 0x72f   :  { %5144 = vrot.lane.b32.xlu0 %v12978_v33, %s11400_s26  ;;  %10864 = vmatprep.subr.bf16.mxu1 %v13057_v1  ;;  %v13119_v37 = vpack.c.bf16 %v434_v35, %v433_v34  ;;  %v13129_v42 = vpack.c.bf16 %v452_v39, %v451_v38  ;;  %v436_v44 = vld [vmem:[%s13971_s24 + $0x68] sm:$0xff]  ;;  %v453_v46 = vld [vmem:[%s13971_s24 + $0xf0] sm:$0xff]  ;;  %v454_v47 = vld [vmem:[%s13971_s24 + $0xf8] sm:$0xff] }
 0x730   :  { %5146 = vrot.lane.b32.xlu1 %v12981_v36, %s11400_s26  ;;  %v13137_v45 = vpack.c.bf16 %v436_v44, %v435_v43  ;;  %v13147_v48 = vpack.c.bf16 %v454_v47, %v453_v46  ;;  %v437_v20 = vld [vmem:[%s13971_s24 + $0x70] sm:$0xff]  ;;  %v438_v49 = vld [vmem:[%s13971_s24 + $0x78] sm:$0xff]  ;;  %v4616_v60 = vld [vmem:[%s13972_s7] sm:$0xff] }
 0x731   :  { %v13155_v51 = vpack.c.bf16 %v438_v49, %v437_v20  ;;  %v4618_v56 = vld [vmem:[%s13972_s7 + $0x10] sm:$0xff]  ;;  %v4619_v58 = vld [vmem:[%s13972_s7 + $0x18] sm:$0xff]  ;;  %v4620_v3 = vld [vmem:[%s13972_s7 + $0x20] sm:$0xff] }
 0x732   :  { %10866 = vmatpush3.bf16.msra.mxu1 %v13065_v5  ;;  %v4621_v19 = vld [vmem:[%s13972_s7 + $0x28] sm:$0xff]  ;;  %v4622_v31 = vld [vmem:[%s13972_s7 + $0x30] sm:$0xff]  ;;  %v4623_v43 = vld [vmem:[%s13972_s7 + $0x38] sm:$0xff] }
 0x733   :  { %5232 = vrot.lane.b32.xlu0 %v12978_v33, %s11401_s9  ;;  %10868 = vmatprep.subr.bf16.mxu1 %v13075_v11  ;;  %v4624_v46 = vld [vmem:[%s13972_s7 + $0x40] sm:$0xff] }
 0x734   :  { %5234 = vrot.lane.b32.xlu1 %v12981_v36, %s11401_s9 }
 0x736   :  { %10870 = vmatpush3.bf16.msra.mxu1 %v13083_v18 }
 0x737   :  { %5320 = vrot.lane.b32.xlu0 %v12978_v33, %s11402_s0  ;;  %10872 = vmatprep.subr.bf16.mxu1 %v13093_v23 }
 0x738   :  { %5322 = vrot.lane.b32.xlu1 %v12981_v36, %s11402_s0 }
 0x73a   :  { %10874 = vmatpush3.bf16.msra.mxu1 %v13101_v28 }
 0x73b   :  { %10876 = vmatprep.subr.bf16.mxu1 %v13111_v32 }
 0x73e   :  { %10878 = vmatpush3.bf16.msra.mxu1 %v13119_v37 }
 0x73f   :  { %10880 = vmatprep.subr.bf16.mxu1 %v13129_v42 }
 0x742   :  { %10882 = vmatpush3.bf16.msra.mxu1 %v13137_v45 }
 0x743   :  { %10884 = vmatprep.subr.bf16.mxu1 %v13147_v48 }
 0x746   :  { %10886 = vmatpush3.bf16.msra.mxu1 %v13155_v51 }
 0x747   :  { %10356 = vmatprep.subr.mxu1 %v11388_v0 }
 0x78d   :  { %v4633_v15 = vpop.permute.xlu0 %4632 }
 0x78e   :  { %v4635_v52 = vpop.permute.xlu1 %4634 }
 0x78f   :  { %v13162_v12 = vsel %vm3027_vm10, %v4633_v15, %v4635_v52  ;;  %v13166_v24 = vsel %vm3027_vm10, %v4635_v52, %v4633_v15  ;;  %v6248_v15 = vld [vmem:[%s13974_s15 + $0x8] sm:$0xff] }
 0x790   :  { %10041 = vmatprep.subr.msk.mxu0 %vm521_vm1, %v13162_v12 }
 0x791   :  { %v4627_v54 = vpop.permute.xlu0 %4626  ;;  %10042 = vmatpush1.msk.msra.mxu0 %vm521_vm1, %v13166_v24 }
 0x792   :  { %10043 = vmatmul.mubr.msk.f32.vlgmr.msra.gmra.mrb[8].mxu0 %vm517_vm2, %v4617_v53  ;;  %v4629_v21 = vpop.permute.xlu1 %4628 }
 0x793   :  { %v13178_v6 = vsel %vm3020_vm11, %v4627_v54, %v4629_v21  ;;  %v13182_v16 = vsel %vm3020_vm11, %v4629_v21, %v4627_v54  ;;  %4791 = vmatprep.mubr.f32.mxu0 %v11388_v0  ;;  %v6249_v21 = vld [vmem:[%s13974_s15 + $0x10] sm:$0xff] }
 0x794   :  { %10044 = vmatprep.subr.msk.mxu0 %vm521_vm1, %v13178_v6 }
 0x795   :  { %v4799_v26 = vpop.permute.xlu0 %4798  ;;  %10045 = vmatpush1.msk.msra.mxu0 %vm521_vm1, %v13182_v16 }
 0x796   :  { %v4801_v4 = vpop.permute.xlu1 %4800 }
 0x797   :  { %v13191_v29 = vsel %vm3194_vm12, %v4799_v26, %v4801_v4  ;;  %v13200_v2 = vsel %vm3194_vm12, %v4801_v4, %v4799_v26  ;;  %v6250_v26 = vld [vmem:[%s13974_s15 + $0x18] sm:$0xff] }
 0x798   :  { %10047 = vmatprep.subr.msk.mxu0 %vm521_vm1, %v13191_v29 }
 0x799   :  { %v4887_v63 = vpop.permute.xlu0 %4886 }
 0x79a   :  { %10046 = vmatmul.mubr.msk.f32.vlgmr.msra.gmra.mrb[8].mxu0 %vm517_vm2, %v4616_v60  ;;  %v4889_v40 = vpop.permute.xlu1 %4888  ;;  %v6255_v60 = vld [vmem:[%s13974_s15 + $0x40] sm:$0xff] }
 0x79b   :  { %10048 = vmatpush1.msk.msra.mxu0 %vm521_vm1, %v13200_v2  ;;  %v13207_v55 = vsel %vm1258_vm3, %v4887_v63, %v4889_v40  ;;  %4877 = vmatprep.mubr.f32.mxu0 %v11388_v0  ;;  %v13217_v57 = vsel %vm1258_vm3, %v4889_v40, %v4887_v63  ;;  %v6252_v63 = vld [vmem:[%s13974_s15 + $0x28] sm:$0xff]  ;;  %v6254_v40 = vld [vmem:[%s13974_s15 + $0x38] sm:$0xff] }
 0x79c   :  { %10050 = vmatprep.subr.msk.mxu0 %vm521_vm1, %v13207_v55 }
 0x79d   :  { %v5057_v61 = vpop.permute.xlu0 %5056 }
 0x79e   :  { %v5059_v62 = vpop.permute.xlu1 %5058 }
 0x79f   :  { %v13231_v17 = vsel %vm1751_vm4, %v5059_v62, %v5057_v61  ;;  %v13243_v13 = vsel %vm1751_vm4, %v5057_v61, %v5059_v62 }
 0x7a1   :  { %v5145_v9 = vpop.permute.xlu0 %5144 }
 0x7a2   :  { %10049 = vmatmul.mubr.msk.f32.vlgmr.msra.gmra.mrb[8].mxu0 %vm517_vm2, %v4618_v56  ;;  %v5147_v10 = vpop.permute.xlu1 %5146 }
 0x7a3   :  { %10051 = vmatpush1.msk.msra.mxu0 %vm521_vm1, %v13217_v57  ;;  %4965 = vmatprep.mubr.f32.mxu0 %v11388_v0  ;;  %v13248_v14 = vsel %vm3541_vm13, %v5147_v10, %v5145_v9  ;;  %v13260_v27 = vsel %vm3541_vm13, %v5145_v9, %v5147_v10 }
 0x7a4   :  { %10053 = vmatprep.subr.msk.mxu0 %vm521_vm1, %v12981_v36 }
 0x7a5   :  { %v5233_v22 = vpop.permute.xlu0 %5232 }
 0x7a6   :  { %v5235_v25 = vpop.permute.xlu1 %5234 }
 0x7a7   :  { %v13265_v30 = vsel %vm3630_vm14, %v5235_v25, %v5233_v22  ;;  %v13277_v38 = vsel %vm3630_vm14, %v5233_v22, %v5235_v25 }
 0x7a9   :  { %v5321_v34 = vpop.permute.xlu0 %5320 }
 0x7aa   :  { %10052 = vmatmul.mubr.msk.f32.vlgmr.msra.gmra.mrb[8].mxu0 %vm517_vm2, %v4619_v58  ;;  %v5323_v35 = vpop.permute.xlu1 %5322 }
 0x7ab   :  { %10054 = vmatpush1.msk.msra.mxu0 %vm521_vm1, %v12978_v33  ;;  %5047 = vmatprep.mubr.f32.mxu0 %v11388_v0  ;;  %v13282_v39 = vsel %vm3719_vm15, %v5323_v35, %v5321_v34  ;;  %v13294_v44 = vsel %vm3719_vm15, %v5321_v34, %v5323_v35 }
 0x7ac   :  { %10056 = vmatprep.subr.msk.mxu0 %vm521_vm1, %v13231_v17 }
 0x7b2   :  { %10055 = vmatmul.mubr.msk.f32.vlgmr.msra.gmra.mrb[8].mxu0 %vm517_vm2, %v4620_v3 }
 0x7b3   :  { %10057 = vmatpush1.msk.msra.mxu0 %vm521_vm1, %v13243_v13  ;;  %5135 = vmatprep.mubr.f32.mxu0 %v11388_v0 }
 0x7b4   :  { %10059 = vmatprep.subr.msk.mxu0 %vm521_vm1, %v13248_v14 }
 0x7ba   :  { %10058 = vmatmul.mubr.msk.f32.vlgmr.msra.gmra.mrb[8].mxu0 %vm517_vm2, %v4621_v19 }
 0x7bb   :  { %10060 = vmatpush1.msk.msra.mxu0 %vm521_vm1, %v13260_v27  ;;  %5223 = vmatprep.mubr.f32.mxu0 %v11388_v0 }
 0x7bc   :  { %10062 = vmatprep.subr.msk.mxu0 %vm521_vm1, %v13265_v30 }
 0x7c2   :  { %10061 = vmatmul.mubr.msk.f32.vlgmr.msra.gmra.mrb[8].mxu0 %vm517_vm2, %v4622_v31 }
 0x7c3   :  { %10063 = vmatpush1.msk.msra.mxu0 %vm521_vm1, %v13277_v38  ;;  %5311 = vmatprep.mubr.f32.mxu0 %v11388_v0 }
 0x7c4   :  { %10065 = vmatprep.subr.msk.mxu0 %vm521_vm1, %v13282_v39 }
 0x7ca   :  { %10064 = vmatmul.mubr.msk.f32.vlgmr.msra.gmra.mrb[8].mxu0 %vm517_vm2, %v4623_v43 }
 0x7cb   :  { %10066 = vmatpush1.msk.msra.mxu0 %vm521_vm1, %v13294_v44  ;;  %5399 = vmatprep.mubr.f32.mxu0 %v11388_v0 }
 0x7cc   :  { %10824 = vmatprep.subr.bf16.mxu0 %v13021_v7 }
 0x7d2   :  { %10067 = vmatmul.mubr.msk.f32.vlgmr.msra.gmra.mrb[8].mxu0 %vm517_vm2, %v4624_v46  ;;  %v5495_v46 = vld [vmem:[#allocation6] sm:$0xff] }
 0x7d3   :  { %10826 = vmatpush3.bf16.msra.mxu0 %v13030_v41  ;;  %v5487_v41 = vld [vmem:[%s13973_s12 + $0x8] sm:$0xff] }
 0x7d4   :  { %10828 = vmatprep.subr.bf16.mxu0 %v13039_v50  ;;  %v5486_v50 = vld [vmem:[%s13973_s12] sm:$0xff] }
 0x7d7   :  { %10830 = vmatpush3.bf16.msra.mxu0 %v13047_v59  ;;  %v5488_v59 = vld [vmem:[%s13973_s12 + $0x10] sm:$0xff] }
 0x7d8   :  { %10832 = vmatprep.subr.bf16.mxu0 %v13057_v1  ;;  %v5489_v1 = vld [vmem:[%s13973_s12 + $0x18] sm:$0xff] }
 0x7db   :  { %10834 = vmatpush3.bf16.msra.mxu0 %v13065_v5  ;;  %v5490_v5 = vld [vmem:[%s13973_s12 + $0x20] sm:$0xff] }
 0x7dc   :  { %10836 = vmatprep.subr.bf16.mxu0 %v13075_v11  ;;  %v5493_v11 = vld [vmem:[%s13973_s12 + $0x38] sm:$0xff] }
 0x7df   :  { %10838 = vmatpush3.bf16.msra.mxu0 %v13083_v18  ;;  %v5494_v18 = vld [vmem:[%s13973_s12 + $0x40] sm:$0xff] }
 0x7e0   :  { %10840 = vmatprep.subr.bf16.mxu0 %v13093_v23 }
 0x7e3   :  { %10842 = vmatpush3.bf16.msra.mxu0 %v13101_v28  ;;  %v4625_v28 = vld [vmem:[#allocation2] sm:$0xff] }
 0x7e4   :  { %10844 = vmatprep.subr.bf16.mxu0 %v13111_v32 }
 0x7e7   :  { %10846 = vmatpush3.bf16.msra.mxu0 %v13119_v37 }
 0x7e8   :  { %10848 = vmatprep.subr.bf16.mxu0 %v13129_v42 }
 0x7eb   :  { %10850 = vmatpush3.bf16.msra.mxu0 %v13137_v45  ;;  %v13404_v45 = vld [vmem:[#allocation7] ss:$0 sm:$0xff] }
 0x7ec   :  { %10852 = vmatprep.subr.bf16.mxu0 %v13147_v48 }
 0x7ef   :  { %10854 = vmatpush3.bf16.msra.mxu0 %v13155_v51  ;;  %v6251_v51 = vld [vmem:[%s13974_s15 + $0x20] sm:$0xff] }
 0x7f0   :  { %10069 = vmatprep.subr.msk.mxu0 %vm521_vm1, %v13162_v12 }
 0x8a5   :  { %v5401_v8 = vpop.f32.mrb[8].mxu0 }
 0x8a6   :  { %v5403_v7 = vpop.f32.mrb[9].mxu0 }
 0x8a7   :  { %5472 = vmatprep.mubr.f32.mxu0 %v5403_v7 }
 0x8a8   :  { %5473 = vmatmul.mubr.f32.vlgmr.msra.gmra.mrb[10].mxu0 %v5401_v8 }
 0x8a9   :  { %10070 = vmatpush1.msk.msra.mxu0 %vm521_vm1, %v13166_v24  ;;  %5563 = vmatprep.mubr.f32.mxu0 %v11388_v0  ;;  %v6247_v24 = vld [vmem:[%s13974_s15] sm:$0xff] }
 0x8aa   :  { %10072 = vmatprep.subr.msk.mxu0 %vm521_vm1, %v13178_v6 }
 0x8ac   :  { %10071 = vmatmul.mubr.msk.f32.vlgmr.msra.gmra.mrb[12].mxu0 %vm517_vm2, %v5487_v41 }
 0x8ad   :  { %10073 = vmatpush1.msk.msra.mxu0 %vm521_vm1, %v13182_v16  ;;  %5637 = vmatprep.mubr.f32.mxu0 %v11388_v0  ;;  %v6253_v16 = vld [vmem:[%s13974_s15 + $0x30] sm:$0xff] }
 0x8ae   :  { %10075 = vmatprep.subr.msk.mxu0 %vm521_vm1, %v13191_v29 }
 0x8b4   :  { %10074 = vmatmul.mubr.msk.f32.vlgmr.msra.gmra.mrb[12].mxu0 %vm517_vm2, %v5486_v50 }
 0x8b5   :  { %10076 = vmatpush1.msk.msra.mxu0 %vm521_vm1, %v13200_v2  ;;  %5711 = vmatprep.mubr.f32.mxu0 %v11388_v0 }
 0x8b6   :  { %10078 = vmatprep.subr.msk.mxu0 %vm521_vm1, %v13207_v55 }
 0x8bc   :  { %10077 = vmatmul.mubr.msk.f32.vlgmr.msra.gmra.mrb[12].mxu0 %vm517_vm2, %v5488_v59 }
 0x8bd   :  { %10079 = vmatpush1.msk.msra.mxu0 %vm521_vm1, %v13217_v57  ;;  %5787 = vmatprep.mubr.f32.mxu0 %v11388_v0 }
 0x8be   :  { %10081 = vmatprep.subr.msk.mxu0 %vm521_vm1, %v12981_v36  ;;  %v5492_v36 = vld [vmem:[%s13973_s12 + $0x30] sm:$0xff] }
 0x8c4   :  { %10080 = vmatmul.mubr.msk.f32.vlgmr.msra.gmra.mrb[12].mxu0 %vm517_vm2, %v5489_v1  ;;  %v6256_v1 = vld [vmem:[#allocation4] sm:$0xff] }
 0x8c5   :  { %10082 = vmatpush1.msk.msra.mxu0 %vm521_vm1, %v12978_v33  ;;  %5863 = vmatprep.mubr.f32.mxu0 %v11388_v0  ;;  %v5491_v33 = vld [vmem:[%s13973_s12 + $0x28] sm:$0xff] }
 0x8c6   :  { %10084 = vmatprep.subr.msk.mxu0 %vm521_vm1, %v13231_v17 }
 0x8cc   :  { %10083 = vmatmul.mubr.msk.f32.vlgmr.msra.gmra.mrb[12].mxu0 %vm517_vm2, %v5490_v5 }
 0x8cd   :  { %10085 = vmatpush1.msk.msra.mxu0 %vm521_vm1, %v13243_v13  ;;  %5939 = vmatprep.mubr.f32.mxu0 %v11388_v0 }
 0x8ce   :  { %10087 = vmatprep.subr.msk.mxu0 %vm521_vm1, %v13248_v14 }
 0x8d4   :  { %10086 = vmatmul.mubr.msk.f32.vlgmr.msra.gmra.mrb[12].mxu0 %vm517_vm2, %v5491_v33 }
 0x8d5   :  { %10088 = vmatpush1.msk.msra.mxu0 %vm521_vm1, %v13260_v27  ;;  %6015 = vmatprep.mubr.f32.mxu0 %v11388_v0 }
 0x8d6   :  { %10090 = vmatprep.subr.msk.mxu0 %vm521_vm1, %v13265_v30 }
 0x8dc   :  { %10089 = vmatmul.mubr.msk.f32.vlgmr.msra.gmra.mrb[12].mxu0 %vm517_vm2, %v5492_v36 }
 0x8dd   :  { %10091 = vmatpush1.msk.msra.mxu0 %vm521_vm1, %v13277_v38  ;;  %6091 = vmatprep.mubr.f32.mxu0 %v11388_v0 }
 0x8de   :  { %10093 = vmatprep.subr.msk.mxu0 %vm521_vm1, %v13282_v39 }
 0x8e4   :  { %10092 = vmatmul.mubr.msk.f32.vlgmr.msra.gmra.mrb[12].mxu0 %vm517_vm2, %v5493_v11 }
 0x8e5   :  { %10094 = vmatpush1.msk.msra.mxu0 %vm521_vm1, %v13294_v44  ;;  %6167 = vmatprep.mubr.f32.mxu0 %v11388_v0  ;;  %vm6261_vm1 = vcmask 64512  }
 0x8e6   :  { %10336 = vmatprep.subr.mxu0 %v11388_v0 }
 0x8ec   :  { %10095 = vmatmul.mubr.msk.f32.vlgmr.msra.gmra.mrb[12].mxu0 %vm517_vm2, %v5494_v18 }
 0x8ed   :  { %10338 = vmatprep.mubr.msk.f32.mxu0 %vm11403_vm0, %v11388_v0 }
 0x97b   :  { %v10174_v23 = vpop.f32.mrb[10].mxu0 }
 0x97c   :  { %v10175_v32 = vpop.f32.mrb[11].mxu0 }
 0x97d   :  { %v10176_v37 = vadd.f32 %v10175_v32, %v10174_v23  ;;  %v6942_v32 = vld [vmem:[%s13928_s19] sm:$0xff] }
 0x97f   :  { %v5475_v42 = vadd.f32 %v10176_v37, %v4625_v28  ;;  %v6943_v28 = vld [vmem:[%s13928_s19 + $0x8] sm:$0xff] }
 0x981   :  { %v5478_v47 = vmax.f32 %v5475_v42, 0.0 }
 0x983   :  { %v5485_v48 = vmul.f32 %v13404_v45, %v5478_v47  ;;  %v6944_v47 = vld [vmem:[%s13928_s19 + $0x10] sm:$0xff] }
 0x985   :  { %6257 = vrot.lane.b32.xlu1 %v5485_v48, %s11404_s8  ;;  %6259 = vrot.lane.b32.xlu0 %v5485_v48, %s11405_s16 }
 0x989   :  { %6484 = vrot.lane.b32.xlu1 %v5485_v48, %s11390_s11  ;;  %6408 = vrot.lane.b32.xlu0 %v5485_v48, %s11406_s10 }
 0x98d   :  { %6710 = vrot.lane.b32.xlu1 %v5485_v48, %s11407_s22  ;;  %6634 = vrot.lane.b32.xlu0 %v5485_v48, %s11391_s20 }
 0x991   :  { %6862 = vrot.lane.b32.xlu1 %v5485_v48, %s11408_s29  ;;  %6786 = vrot.lane.b32.xlu0 %v5485_v48, %s11409_s18 }
 0x9bf   :  { %v6169_v20 = vpop.f32.mrb[12].mxu0 }
 0x9c0   :  { %v6171_v49 = vpop.f32.mrb[13].mxu0 }
 0x9c1   :  { %6240 = vmatprep.mubr.f32.mxu1 %v6171_v49  ;;  %v6945_v49 = vld [vmem:[%s13928_s19 + $0x18] sm:$0xff] }
 0x9c2   :  { %6241 = vmatmul.mubr.f32.vlgmr.msra.gmra.mrb[8].mxu1 %v6169_v20 }
 0x9c3   :  { %10357 = vmatpush3.msra.mxu1 %v5485_v48  ;;  %10358 = vmatprep.mubr.msk.f32.mxu1 %vm11403_vm0, %v11388_v0 }
 0x9c4   :  { %10366 = vmatprep.subr.mxu1 %v11388_v0 }
 0x9c6   :  { %10359 = vmatmul.mubr.msk.f32.vlgmr.msra.gmra.mrb[10].mxu1 %vm6261_vm1, %v6251_v51  ;;  %v6946_v51 = vld [vmem:[%s13928_s19 + $0x20] sm:$0xff] }
 0x9c7   :  { %10368 = vmatprep.mubr.msk.f32.mxu1 %vm11403_vm0, %v11388_v0 }
 0x9f7   :  { %v6258_v52 = vpop.permute.xlu1 %6257  ;;  %v6260_v12 = vpop.permute.xlu0 %6259 }
 0x9f8   :  { %10337 = vmatpush3.msra.mxu0 %v6260_v12  ;;  %v6947_v12 = vld [vmem:[%s13928_s19 + $0x28] sm:$0xff] }
 0x9f9   :  { %10339 = vmatmul.mubr.msk.f32.vlgmr.msra.gmra.mrb[14].mxu0 %vm6261_vm1, %v6248_v15  ;;  %10341 = vmatprep.subr.mxu0 %v11388_v0 }
 0x9fa   :  { %10342 = vmatpush3.msra.mxu0 %v6258_v52  ;;  %10343 = vmatprep.mubr.msk.f32.mxu0 %vm11403_vm0, %v11388_v0 }
 0x9fb   :  { %v6485_v53 = vpop.permute.xlu1 %6484  ;;  %v6409_v54 = vpop.permute.xlu0 %6408  ;;  %10346 = vmatprep.subr.mxu0 %v11388_v0 }
 0x9fd   :  { %10344 = vmatmul.mubr.msk.f32.vlgmr.msra.gmra.mrb[16].mxu0 %vm6261_vm1, %v6247_v24  ;;  %v6948_v24 = vld [vmem:[%s13928_s19 + $0x30] sm:$0xff] }
 0x9fe   :  { %10347 = vmatpush3.msra.mxu0 %v6409_v54  ;;  %10348 = vmatprep.mubr.msk.f32.mxu0 %vm11403_vm0, %v11388_v0 }
 0x9ff   :  { %v6711_v6 = vpop.permute.xlu1 %6710  ;;  %10351 = vmatprep.subr.mxu0 %v11388_v0  ;;  %v6635_v4 = vpop.permute.xlu0 %6634 }
 0xa00   :  { %10367 = vmatpush3.msra.mxu1 %v6711_v6  ;;  %v6950_v6 = vld [vmem:[%s13928_s19 + $0x40] sm:$0xff] }
 0xa01   :  { %10349 = vmatmul.mubr.msk.f32.vlgmr.msra.gmra.mrb[18].mxu0 %vm6261_vm1, %v6249_v21  ;;  %10376 = vmatprep.subr.mxu1 %v11388_v0  ;;  %v6949_v21 = vld [vmem:[%s13928_s19 + $0x38] sm:$0xff] }
 0xa02   :  { %10352 = vmatpush3.msra.mxu0 %v6485_v53  ;;  %10353 = vmatprep.mubr.msk.f32.mxu0 %vm11403_vm0, %v11388_v0 }
 0xa03   :  { %v6863_v29 = vpop.permute.xlu1 %6862  ;;  %10361 = vmatprep.subr.mxu0 %v11388_v0  ;;  %10369 = vmatmul.mubr.msk.f32.vlgmr.msra.gmra.mrb[12].mxu1 %vm6261_vm1, %v6253_v16  ;;  %v6787_v2 = vpop.permute.xlu0 %6786 }
 0xa04   :  { %10377 = vmatpush3.msra.mxu1 %v6863_v29  ;;  %10378 = vmatprep.mubr.msk.f32.mxu1 %vm11403_vm0, %v11388_v0 }
 0xa05   :  { %10354 = vmatmul.mubr.msk.f32.vlgmr.msra.gmra.mrb[20].mxu0 %vm6261_vm1, %v6250_v26  ;;  %10386 = vmatprep.subr.mxu1 %v11388_v0 }
 0xa06   :  { %10362 = vmatpush3.msra.mxu0 %v6635_v4  ;;  %10363 = vmatprep.mubr.msk.f32.mxu0 %vm11403_vm0, %v11388_v0 }
 0xa07   :  { %10371 = vmatprep.subr.mxu0 %v11388_v0  ;;  %10379 = vmatmul.mubr.msk.f32.vlgmr.msra.gmra.mrb[14].mxu1 %vm6261_vm1, %v6255_v60 }
 0xa08   :  { %10388 = vmatprep.mubr.msk.f32.mxu1 %vm11403_vm0, %v11388_v0 }
 0xa09   :  { %10364 = vmatmul.mubr.msk.f32.vlgmr.msra.gmra.mrb[22].mxu0 %vm6261_vm1, %v6252_v63 }
 0xa0a   :  { %10372 = vmatpush3.msra.mxu0 %v6787_v2  ;;  %10373 = vmatprep.mubr.msk.f32.mxu0 %vm11403_vm0, %v11388_v0 }
 0xa0b   :  { %10381 = vmatprep.subr.mxu0 %v11388_v0 }
 0xa0d   :  { %10374 = vmatmul.mubr.msk.f32.vlgmr.msra.gmra.mrb[24].mxu0 %vm6261_vm1, %v6254_v40 }
 0xa0e   :  { %10383 = vmatprep.mubr.msk.f32.mxu0 %vm11403_vm0, %v11388_v0 }
 0xa95   :  { %v10209_v55 = vpop.f32.mrb[8].mxu1 }
 0xa96   :  { %v10210_v56 = vpop.f32.mrb[9].mxu1 }
 0xa97   :  { %v10211_v57 = vadd.f32 %v10210_v56, %v10209_v55 }
 0xa99   :  { %v6629_v58 = vpop.f32.mrb[10].mxu1  ;;  %v6243_v41 = vadd.f32 %v10211_v57, %v5495_v46 }
 0xa9a   :  { %v10360_v61 = vpop.f32.mrb[11].mxu1 }
 0xa9b   :  { %v6246_v33 = vmul.f32 %v13404_v45, %v6243_v41 }
 0xacc   :  { %v6331_v62 = vpop.f32.mrb[14].mxu0 }
 0xacd   :  { %v10340_v17 = vpop.f32.mrb[15].mxu0 }
 0xad0   :  { %v6404_v3 = vpop.f32.mrb[16].mxu0 }
 0xad1   :  { %v6405_v9 = vadd.f32 %v6404_v3, %v6331_v62  ;;  %v10345_v10 = vpop.f32.mrb[17].mxu0 }
 0xad4   :  { %v6479_v13 = vpop.f32.mrb[18].mxu0 }
 0xad5   :  { %v6483_v14 = vadd.f32 %v6479_v13, %v6405_v9  ;;  %v10350_v19 = vpop.f32.mrb[19].mxu0 }
 0xad6   :  { %v6781_v22 = vpop.f32.mrb[12].mxu1 }
 0xad7   :  { %v10370_v25 = vpop.f32.mrb[13].mxu1 }
 0xad8   :  { %v6555_v27 = vpop.f32.mrb[20].mxu0 }
 0xad9   :  { %v6559_v30 = vadd.f32 %v6555_v27, %v6483_v14  ;;  %v10355_v31 = vpop.f32.mrb[21].mxu0  ;;  %v6951_v27 = vld [vmem:[#allocation13] sm:$0xff] }
 0xada   :  { %v6933_v34 = vpop.f32.mrb[14].mxu1 }
 0xadb   :  { %v6633_v35 = vadd.f32 %v6629_v58, %v6559_v30  ;;  %v10380_v38 = vpop.f32.mrb[15].mxu1 }
 0xadc   :  { %v6705_v39 = vpop.f32.mrb[22].mxu0 }
 0xadd   :  { %v6709_v43 = vadd.f32 %v6705_v39, %v6633_v35  ;;  %v10365_v44 = vpop.f32.mrb[23].mxu0 }
 0xade   :  { %v7635_v44 = vld [vmem:[%s13930_s21] sm:$0xff] }
 0xadf   :  { %v6785_v8 = vadd.f32 %v6781_v22, %v6709_v43  ;;  %v7636_v43 = vld [vmem:[%s13930_s21 + $0x8] sm:$0xff] }
 0xae0   :  { %v6857_v7 = vpop.f32.mrb[24].mxu0 }
 0xae1   :  { %v6861_v50 = vadd.f32 %v6857_v7, %v6785_v8  ;;  %v10375_v59 = vpop.f32.mrb[25].mxu0  ;;  %v7637_v7 = vld [vmem:[%s13930_s21 + $0x10] sm:$0xff] }
 0xae2   :  { %v7638_v59 = vld [vmem:[%s13930_s21 + $0x18] sm:$0xff] }
 0xae3   :  { %v6937_v5 = vadd.f32 %v6933_v34, %v6861_v50 }
 0xae5   :  { %v6938_v36 = vadd.f32 %v6937_v5, %v6256_v1  ;;  %v7639_v1 = vld [vmem:[%s13930_s21 + $0x20] sm:$0xff] }
 0xae7   :  { %v6939_v11 = vadd.f32 %v6938_v36, %v6246_v33  ;;  %v7640_v36 = vld [vmem:[%s13930_s21 + $0x28] sm:$0xff] }
 0xae9   :  { %v6940_v18 = vmax.f32 %v6939_v11, 0.0  ;;  %v8329_v11 = vld [vmem:[%s13975_s2] sm:$0xff] }
 0xaeb   :  { %v13482_v23 = vmul.f32 %v13404_v45, %v6940_v18  ;;  %v8330_v18 = vld [vmem:[%s13975_s2 + $0x8] sm:$0xff] }
 0xaed   :  { %6952 = vrot.lane.b32.xlu1 %v13482_v23, %s11404_s8  ;;  %6954 = vrot.lane.b32.xlu0 %v13482_v23, %s11405_s16 }
 0xaf1   :  { %7178 = vrot.lane.b32.xlu1 %v13482_v23, %s11390_s11  ;;  %7102 = vrot.lane.b32.xlu0 %v13482_v23, %s11406_s10 }
 0xaf5   :  { %7404 = vrot.lane.b32.xlu1 %v13482_v23, %s11407_s22  ;;  %7328 = vrot.lane.b32.xlu0 %v13482_v23, %s11391_s20 }
 0xaf9   :  { %7556 = vrot.lane.b32.xlu1 %v13482_v23, %s11408_s29  ;;  %7480 = vrot.lane.b32.xlu0 %v13482_v23, %s11409_s18 }
 0xb5f   :  { %v6953_v37 = vpop.permute.xlu1 %6952  ;;  %v6955_v42 = vpop.permute.xlu0 %6954 }
 0xb60   :  { %10382 = vmatpush3.msra.mxu0 %v6955_v42  ;;  %10387 = vmatpush3.msra.mxu1 %v6953_v37  ;;  %v7642_v42 = vld [vmem:[%s13930_s21 + $0x38] sm:$0xff] }
 0xb61   :  { %10384 = vmatmul.mubr.msk.f32.vlgmr.msra.gmra.mrb[26].mxu0 %vm6261_vm1, %v6943_v28  ;;  %10389 = vmatmul.mubr.msk.f32.vlgmr.msra.gmra.mrb[16].mxu1 %vm6261_vm1, %v6942_v32  ;;  %v7641_v28 = vld [vmem:[%s13930_s21 + $0x30] sm:$0xff] }
 0xb62   :  { %10396 = vmatprep.subr.mxu1 %v11388_v0  ;;  %10391 = vmatprep.subr.mxu0 %v11388_v0 }
 0xb63   :  { %v7179_v48 = vpop.permute.xlu1 %7178  ;;  %v7103_v20 = vpop.permute.xlu0 %7102  ;;  %10393 = vmatprep.mubr.msk.f32.mxu0 %vm11403_vm0, %v11388_v0  ;;  %10398 = vmatprep.mubr.msk.f32.mxu1 %vm11403_vm0, %v11388_v0 }
 0xb64   :  { %10392 = vmatpush3.msra.mxu0 %v7103_v20  ;;  %10397 = vmatpush3.msra.mxu1 %v7179_v48  ;;  %v7643_v48 = vld [vmem:[%s13930_s21 + $0x40] sm:$0xff]  ;;  %v11410_v20 = vmov 0.0|0.0  }
 0xb65   :  { %10394 = vmatmul.mubr.msk.f32.vlgmr.msra.gmra.mrb[28].mxu0 %vm6261_vm1, %v6944_v47  ;;  %10401 = vmatprep.subr.mxu0 %v11388_v0  ;;  %v10888_v47 = vpack.c.bf16 %v8330_v18, %v8329_v11 }
 0xb66   :  { %10399 = vmatmul.mubr.msk.f32.vlgmr.msra.gmra.mrb[18].mxu1 %vm6261_vm1, %v6945_v49  ;;  %10402 = vmatpush3.msra.mxu0 %v13482_v23  ;;  %v8331_v49 = vld [vmem:[%s13975_s2 + $0x10] sm:$0xff] }
 0xb67   :  { %10406 = vmatprep.subr.mxu1 %v11388_v0  ;;  %v7405_v15 = vpop.permute.xlu1 %7404  ;;  %v7329_v52 = vpop.permute.xlu0 %7328  ;;  %10403 = vmatprep.mubr.msk.f32.mxu0 %vm11403_vm0, %v11388_v0 }
 0xb68   :  { %10407 = vmatpush3.msra.mxu1 %v7329_v52  ;;  %10411 = vmatprep.subr.mxu0 %v11388_v0  ;;  %v8333_v52 = vld [vmem:[%s13975_s2 + $0x20] sm:$0xff] }
 0xb69   :  { %10404 = vmatmul.mubr.msk.f32.vlgmr.msra.gmra.mrb[30].mxu0 %vm6261_vm1, %v6946_v51  ;;  %10408 = vmatprep.mubr.msk.f32.mxu1 %vm11403_vm0, %v11388_v0  ;;  %v8332_v51 = vld [vmem:[%s13975_s2 + $0x18] sm:$0xff] }
 0xb6a   :  { %10412 = vmatpush3.msra.mxu0 %v7405_v15  ;;  %10409 = vmatmul.mubr.msk.f32.vlgmr.msra.gmra.mrb[20].mxu1 %vm6261_vm1, %v6947_v12  ;;  %v10891_v15 = vpack.c.bf16 %v8332_v51, %v8331_v49  ;;  %v8334_v12 = vld [vmem:[%s13975_s2 + $0x28] sm:$0xff]  ;;  %v8418_v49 = vld [vmem:[%s13932_s23 + $0x18] sm:$0xff]  ;;  %v8423_v51 = vld [vmem:[%s13932_s23 + $0x40] sm:$0xff] }
 0xb6b   :  { %v7557_v53 = vpop.permute.xlu1 %7556  ;;  %10416 = vmatprep.subr.mxu1 %v11388_v0  ;;  %v7481_v54 = vpop.permute.xlu0 %7480  ;;  %10413 = vmatprep.mubr.msk.f32.mxu0 %vm11403_vm0, %v11388_v0 }
 0xb6c   :  { %10417 = vmatpush3.msra.mxu1 %v7481_v54  ;;  %10421 = vmatprep.subr.mxu0 %v11388_v0  ;;  %v8336_v54 = vld [vmem:[%s13975_s2 + $0x38] sm:$0xff] }
 0xb6d   :  { %10414 = vmatmul.mubr.msk.f32.vlgmr.msra.gmra.mrb[32].mxu0 %vm6261_vm1, %v6948_v24  ;;  %10418 = vmatprep.mubr.msk.f32.mxu1 %vm11403_vm0, %v11388_v0  ;;  %v10894_v24 = vpack.c.bf16 %v8334_v12, %v8333_v52  ;;  %v8419_v52 = vld [vmem:[%s13932_s23 + $0x20] sm:$0xff] }
 0xb6e   :  { %10422 = vmatpush3.msra.mxu0 %v7557_v53  ;;  %10419 = vmatmul.mubr.msk.f32.vlgmr.msra.gmra.mrb[22].mxu1 %vm6261_vm1, %v6949_v21  ;;  %v8335_v53 = vld [vmem:[%s13975_s2 + $0x30] sm:$0xff] }
 0xb6f   :  { %10423 = vmatprep.mubr.msk.f32.mxu0 %vm11403_vm0, %v11388_v0  ;;  %10426 = vmatprep.subr.mxu1 %v11388_v0  ;;  %v10897_v21 = vpack.c.bf16 %v8336_v54, %v8335_v53  ;;  %v8421_v53 = vld [vmem:[%s13932_s23 + $0x30] sm:$0xff] }
 0xb70   :  { %10431 = vmatprep.subr.mxu0 %v11388_v0  ;;  %10428 = vmatprep.mubr.msk.f32.mxu1 %vm11403_vm0, %v11388_v0 }
 0xb71   :  { %10424 = vmatmul.mubr.msk.f32.vlgmr.msra.gmra.mrb[34].mxu0 %vm6261_vm1, %v6950_v6  ;;  %v8337_v6 = vld [vmem:[%s13975_s2 + $0x40] sm:$0xff] }
 0xb72   :  { %10433 = vmatprep.mubr.msk.f32.mxu0 %vm11403_vm0, %v11388_v0 }
 0xc34   :  { %v7025_v16 = vpop.f32.mrb[26].mxu0  ;;  %v7098_v26 = vpop.f32.mrb[16].mxu1 }
 0xc35   :  { %v7099_v4 = vadd.f32 %v7098_v26, %v7025_v16  ;;  %v10385_v29 = vpop.f32.mrb[27].mxu0  ;;  %v10390_v60 = vpop.f32.mrb[17].mxu1  ;;  %v8338_v16 = vld [vmem:[%s13975_s2 + $0x48] sm:$0xff] }
 0xc36   :  { %v10900_v26 = vpack.c.bf16 %v8338_v16, %v8337_v6  ;;  %v8340_v29 = vld [vmem:[%s13975_s2 + $0x58] sm:$0xff] }
 0xc38   :  { %v7173_v63 = vpop.f32.mrb[28].mxu0 }
 0xc39   :  { %v7177_v2 = vadd.f32 %v7173_v63, %v7099_v4  ;;  %v10395_v40 = vpop.f32.mrb[29].mxu0  ;;  %v7249_v55 = vpop.f32.mrb[18].mxu1  ;;  %v8339_v4 = vld [vmem:[%s13975_s2 + $0x50] sm:$0xff]  ;;  %v8341_v63 = vld [vmem:[%s13975_s2 + $0x60] sm:$0xff] }
 0xc3a   :  { %v10400_v56 = vpop.f32.mrb[19].mxu1  ;;  %v10903_v60 = vpack.c.bf16 %v8340_v29, %v8339_v4 }
 0xc3b   :  { %v7253_v57 = vadd.f32 %v7249_v55, %v7177_v2  ;;  %v8342_v2 = vld [vmem:[%s13975_s2 + $0x68] sm:$0xff]  ;;  %v8343_v55 = vld [vmem:[%s13975_s2 + $0x70] sm:$0xff]  ;;  %v8344_v56 = vld [vmem:[%s13975_s2 + $0x78] sm:$0xff]  ;;  %s11411_s2 = smov 4  }
 0xc3c   :  { %v7323_v58 = vpop.f32.mrb[30].mxu0  ;;  %v10906_v40 = vpack.c.bf16 %v8342_v2, %v8341_v63 }
 0xc3d   :  { %v7327_v61 = vadd.f32 %v7323_v58, %v7253_v57  ;;  %v10405_v62 = vpop.f32.mrb[31].mxu0  ;;  %v7399_v17 = vpop.f32.mrb[20].mxu1  ;;  %v10909_v57 = vpack.c.bf16 %v8344_v56, %v8343_v55 }
 0xc3e   :  { %v10410_v3 = vpop.f32.mrb[21].mxu1 }
 0xc3f   :  { %v7403_v9 = vadd.f32 %v7399_v17, %v7327_v61 }
 0xc40   :  { %v7475_v10 = vpop.f32.mrb[32].mxu0 }
 0xc41   :  { %v7479_v13 = vadd.f32 %v7475_v10, %v7403_v9  ;;  %v10415_v14 = vpop.f32.mrb[33].mxu0  ;;  %v7551_v19 = vpop.f32.mrb[22].mxu1 }
 0xc42   :  { %v10420_v22 = vpop.f32.mrb[23].mxu1 }
 0xc43   :  { %v7555_v25 = vadd.f32 %v7551_v19, %v7479_v13 }
 0xc44   :  { %v7627_v30 = vpop.f32.mrb[34].mxu0 }
 0xc45   :  { %v7631_v31 = vadd.f32 %v7627_v30, %v7555_v25  ;;  %v10425_v34 = vpop.f32.mrb[35].mxu0 }
 0xc47   :  { %v7632_v35 = vadd.f32 %v7631_v31, %v6951_v27 }
 0xc49   :  { %v7633_v38 = vmax.f32 %v7632_v35, 0.0 }
 0xc4b   :  { %v7634_v39 = vmul.f32 %v13404_v45, %v7633_v38 }
 0xc4d   :  { %7645 = vrot.lane.b32.xlu1 %v7634_v39, %s11404_s8  ;;  %7647 = vrot.lane.b32.xlu0 %v7634_v39, %s11405_s16 }
 0xc51   :  { %7871 = vrot.lane.b32.xlu1 %v7634_v39, %s11390_s11  ;;  %7795 = vrot.lane.b32.xlu0 %v7634_v39, %s11406_s10 }
 0xc55   :  { %8097 = vrot.lane.b32.xlu1 %v7634_v39, %s11407_s22  ;;  %8021 = vrot.lane.b32.xlu0 %v7634_v39, %s11391_s20 }
 0xc59   :  { %8249 = vrot.lane.b32.xlu1 %v7634_v39, %s11408_s29  ;;  %8173 = vrot.lane.b32.xlu0 %v7634_v39, %s11409_s18  ;;  %s11412_s18 = smov 3  }
 0xcbf   :  { %v7646_v46 = vpop.permute.xlu1 %7645  ;;  %v7648_v8 = vpop.permute.xlu0 %7647 }
 0xcc0   :  { %10427 = vmatpush3.msra.mxu1 %v7648_v8  ;;  %10432 = vmatpush3.msra.mxu0 %v7646_v46 }
 0xcc1   :  { %10429 = vmatmul.mubr.msk.f32.vlgmr.msra.gmra.mrb[24].mxu1 %vm6261_vm1, %v7636_v43  ;;  %10434 = vmatmul.mubr.msk.f32.vlgmr.msra.gmra.mrb[36].mxu0 %vm6261_vm1, %v7635_v44 }
 0xcc2   :  { %10441 = vmatprep.subr.mxu0 %v11388_v0  ;;  %10436 = vmatprep.subr.mxu1 %v11388_v0 }
 0xcc3   :  { %v7872_v41 = vpop.permute.xlu1 %7871  ;;  %v7796_v50 = vpop.permute.xlu0 %7795  ;;  %10438 = vmatprep.mubr.msk.f32.mxu1 %vm11403_vm0, %v11388_v0  ;;  %10443 = vmatprep.mubr.msk.f32.mxu0 %vm11403_vm0, %v11388_v0 }
 0xcc4   :  { %10437 = vmatpush3.msra.mxu1 %v7796_v50  ;;  %10442 = vmatpush3.msra.mxu0 %v7872_v41 }
 0xcc5   :  { %10439 = vmatmul.mubr.msk.f32.vlgmr.msra.gmra.mrb[26].mxu1 %vm6261_vm1, %v7637_v7  ;;  %10446 = vmatprep.subr.mxu1 %v11388_v0  ;;  %v7644_v7 = vld [vmem:[#allocation15] sm:$0xff] }
 0xcc6   :  { %10444 = vmatmul.mubr.msk.f32.vlgmr.msra.gmra.mrb[38].mxu0 %vm6261_vm1, %v7638_v59  ;;  %10447 = vmatpush3.msra.mxu1 %v7634_v39 }
 0xcc7   :  { %10451 = vmatprep.subr.mxu0 %v11388_v0  ;;  %v8098_v5 = vpop.permute.xlu1 %8097  ;;  %v8022_v33 = vpop.permute.xlu0 %8021  ;;  %10448 = vmatprep.mubr.msk.f32.mxu1 %vm11403_vm0, %v11388_v0 }
 0xcc8   :  { %10452 = vmatpush3.msra.mxu0 %v8022_v33  ;;  %10456 = vmatprep.subr.mxu1 %v11388_v0 }
 0xcc9   :  { %10449 = vmatmul.mubr.msk.f32.vlgmr.msra.gmra.mrb[28].mxu1 %vm6261_vm1, %v7639_v1  ;;  %10453 = vmatprep.mubr.msk.f32.mxu0 %vm11403_vm0, %v11388_v0 }
 0xcca   :  { %10457 = vmatpush3.msra.mxu1 %v8098_v5  ;;  %10454 = vmatmul.mubr.msk.f32.vlgmr.msra.gmra.mrb[40].mxu0 %vm6261_vm1, %v7640_v36 }
 0xccb   :  { %v8250_v32 = vpop.permute.xlu1 %8249  ;;  %10461 = vmatprep.subr.mxu0 %v11388_v0  ;;  %v8174_v37 = vpop.permute.xlu0 %8173  ;;  %10458 = vmatprep.mubr.msk.f32.mxu1 %vm11403_vm0, %v11388_v0 }
 0xccc   :  { %10462 = vmatpush3.msra.mxu0 %v8174_v37  ;;  %10466 = vmatprep.subr.mxu1 %v11388_v0 }
 0xccd   :  { %10459 = vmatmul.mubr.msk.f32.vlgmr.msra.gmra.mrb[30].mxu1 %vm6261_vm1, %v7641_v28  ;;  %10463 = vmatprep.mubr.msk.f32.mxu0 %vm11403_vm0, %v11388_v0 }
 0xcce   :  { %10467 = vmatpush3.msra.mxu1 %v8250_v32  ;;  %10464 = vmatmul.mubr.msk.f32.vlgmr.msra.gmra.mrb[42].mxu0 %vm6261_vm1, %v7642_v42  ;;  %v8415_v32 = vld [vmem:[%s13932_s23] sm:$0xff] }
 0xccf   :  { %10468 = vmatprep.mubr.msk.f32.mxu1 %vm11403_vm0, %v11388_v0  ;;  %10887 = vmatprep.subr.bf16.mxu0 %v11410_v20 }
 0xcd0   :  { %10889 = vmatpush3.bf16.msra.mxu0 %v10888_v47  ;;  %10503 = vmatprep.mubr.msk.f32.mxu0 %vm11403_vm0, %v11388_v0  ;;  %v8417_v47 = vld [vmem:[%s13932_s23 + $0x10] sm:$0xff] }
 0xcd1   :  { %10469 = vmatmul.mubr.msk.f32.vlgmr.msra.gmra.mrb[32].mxu1 %vm6261_vm1, %v7643_v48  ;;  %10890 = vmatprep.subr.bf16.mxu0 %v11410_v20 }
 0xcd2   :  { %10506 = vmatprep.subr.mxu1 %v11388_v0  ;;  %10508 = vmatprep.mubr.msk.f32.mxu1 %vm11403_vm0, %v11388_v0 }
 0xcd4   :  { %10892 = vmatpush3.bf16.msra.mxu0 %v10891_v15 }
 0xcd5   :  { %10893 = vmatprep.subr.bf16.mxu0 %v11410_v20 }
 0xcd8   :  { %10895 = vmatpush3.bf16.msra.mxu0 %v10894_v24  ;;  %v8420_v24 = vld [vmem:[%s13932_s23 + $0x28] sm:$0xff] }
 0xcd9   :  { %10896 = vmatprep.subr.bf16.mxu0 %v11410_v20 }
 0xcdc   :  { %10898 = vmatpush3.bf16.msra.mxu0 %v10897_v21  ;;  %v8422_v21 = vld [vmem:[%s13932_s23 + $0x38] sm:$0xff] }
 0xcdd   :  { %10899 = vmatprep.subr.bf16.mxu0 %v11410_v20 }
 0xce0   :  { %10901 = vmatpush3.bf16.msra.mxu0 %v10900_v26 }
 0xce1   :  { %10902 = vmatprep.subr.bf16.mxu0 %v11410_v20 }
 0xce4   :  { %10904 = vmatpush3.bf16.msra.mxu0 %v10903_v60 }
 0xce5   :  { %10905 = vmatprep.subr.bf16.mxu0 %v11410_v20 }
 0xce8   :  { %10907 = vmatpush3.bf16.msra.mxu0 %v10906_v40 }
 0xce9   :  { %10908 = vmatprep.subr.bf16.mxu0 %v11410_v20 }
 0xcec   :  { %10910 = vmatpush3.bf16.msra.mxu0 %v10909_v57 }
 0xced   :  { %10546 = vmatprep.subr.mxu0 %v11388_v0 }
 0xd94   :  { %v7718_v58 = vpop.f32.mrb[24].mxu1  ;;  %v7791_v61 = vpop.f32.mrb[36].mxu0 }
 0xd95   :  { %v7792_v62 = vadd.f32 %v7791_v61, %v7718_v58  ;;  %v10430_v17 = vpop.f32.mrb[25].mxu1  ;;  %v10435_v3 = vpop.f32.mrb[37].mxu0 }
 0xd98   :  { %v7866_v9 = vpop.f32.mrb[26].mxu1 }
 0xd99   :  { %v7870_v10 = vadd.f32 %v7866_v9, %v7792_v62  ;;  %v10440_v13 = vpop.f32.mrb[27].mxu1  ;;  %v7942_v14 = vpop.f32.mrb[38].mxu0 }
 0xd9a   :  { %v10445_v19 = vpop.f32.mrb[39].mxu0 }
 0xd9b   :  { %v7946_v22 = vadd.f32 %v7942_v14, %v7870_v10 }
 0xd9c   :  { %v8016_v25 = vpop.f32.mrb[28].mxu1 }
 0xd9d   :  { %v8020_v27 = vadd.f32 %v8016_v25, %v7946_v22  ;;  %v10450_v30 = vpop.f32.mrb[29].mxu1  ;;  %v8092_v31 = vpop.f32.mrb[40].mxu0 }
 0xd9e   :  { %v10455_v34 = vpop.f32.mrb[41].mxu0  ;;  %v8424_v30 = vld [vmem:[#allocation16] sm:$0xff] }
 0xd9f   :  { %v8096_v35 = vadd.f32 %v8092_v31, %v8020_v27 }
 0xda0   :  { %v8168_v38 = vpop.f32.mrb[30].mxu1 }
 0xda1   :  { %v8172_v39 = vadd.f32 %v8168_v38, %v8096_v35  ;;  %v10460_v43 = vpop.f32.mrb[31].mxu1  ;;  %v8244_v44 = vpop.f32.mrb[42].mxu0  ;;  %v13778_v35 = vld [vmem:[#allocation9] ss:$0 sm:$0xff] }
 0xda2   :  { %v10465_v46 = vpop.f32.mrb[43].mxu0  ;;  %v9115_v43 = vld [vmem:[%s13934_s25 + $0x8] sm:$0xff] }
 0xda3   :  { %v8248_v8 = vadd.f32 %v8244_v44, %v8172_v39  ;;  %v9114_v44 = vld [vmem:[%s13934_s25] sm:$0xff] }
 0xda4   :  { %v8320_v41 = vpop.f32.mrb[32].mxu1 }
 0xda5   :  { %v8324_v50 = vadd.f32 %v8320_v41, %v8248_v8  ;;  %v10470_v59 = vpop.f32.mrb[33].mxu1 }
 0xda6   :  { %v9117_v59 = vld [vmem:[%s13934_s25 + $0x18] sm:$0xff] }
 0xda7   :  { %v8325_v1 = vadd.f32 %v8324_v50, %v7644_v7  ;;  %v9116_v7 = vld [vmem:[%s13934_s25 + $0x10] sm:$0xff] }
 0xda9   :  { %v8326_v5 = vadd.f32 %v8325_v1, %v13482_v23  ;;  %v9118_v1 = vld [vmem:[%s13934_s25 + $0x20] sm:$0xff] }
 0xdab   :  { %v8327_v33 = vmax.f32 %v8326_v5, 0.0 }
 0xdad   :  { %v8328_v36 = vmul.f32 %v13404_v45, %v8327_v33  ;;  %v8416_v45 = vld [vmem:[%s13932_s23 + $0x8] sm:$0xff] }
 0xdaf   :  { %10504 = vmatmul.mubr.f32.vlgmr.msra.gmra.mrb[44].mxu0 %v8328_v36  ;;  %v9119_v36 = vld [vmem:[%s13934_s25 + $0x28] sm:$0xff] }
 0xdb0   :  { %10548 = vmatprep.mubr.msk.f32.mxu0 %vm11403_vm0, %v11388_v0 }
 0xe82   :  { %v13696_v11 = vpop.f32.mrb[44].mxu0 }
 0xe83   :  { %8425 = vrot.lane.b32.xlu1 %v13696_v11, %s11406_s10  ;;  %8427 = vrot.lane.b32.xlu0 %v13696_v11, %s11411_s2  ;;  %v10505_v18 = vpop.f32.mrb[45].mxu0 }
 0xe84   :  { %v9808_v18 = vld [vmem:[%s13922_s13] sm:$0xff] }
 0xe87   :  { %8651 = vrot.lane.b32.xlu1 %v13696_v11, %s11390_s11  ;;  %8575 = vrot.lane.b32.xlu0 %v13696_v11, %s11412_s18 }
 0xe8b   :  { %8877 = vrot.lane.b32.xlu1 %v13696_v11, %s11413_s17  ;;  %8801 = vrot.lane.b32.xlu0 %v13696_v11, %s11391_s20 }
 0xe8f   :  { %9029 = vrot.lane.b32.xlu1 %v13696_v11, %s11407_s22  ;;  %8953 = vrot.lane.b32.xlu0 %v13696_v11, %s11414_s1 }
 0xef5   :  { %v8426_v23 = vpop.permute.xlu1 %8425  ;;  %v8428_v28 = vpop.permute.xlu0 %8427 }
 0xef6   :  { %10507 = vmatpush3.msra.mxu1 %v8428_v28 }
 0xef7   :  { %10509 = vmatmul.mubr.msk.f32.vlgmr.msra.gmra.mrb[34].mxu1 %vm6261_vm1, %v8416_v45  ;;  %10511 = vmatprep.subr.mxu1 %v11388_v0  ;;  %v9809_v45 = vld [vmem:[%s13922_s13 + $0x8] sm:$0xff] }
 0xef8   :  { %10512 = vmatpush3.msra.mxu1 %v8426_v23  ;;  %10513 = vmatprep.mubr.msk.f32.mxu1 %vm11403_vm0, %v11388_v0  ;;  %v9120_v23 = vld [vmem:[%s13934_s25 + $0x30] sm:$0xff] }
 0xef9   :  { %v8652_v37 = vpop.permute.xlu1 %8651  ;;  %v8576_v42 = vpop.permute.xlu0 %8575  ;;  %10516 = vmatprep.subr.mxu1 %v11388_v0 }
 0xefb   :  { %10514 = vmatmul.mubr.msk.f32.vlgmr.msra.gmra.mrb[36].mxu1 %vm6261_vm1, %v8415_v32 }
 0xefc   :  { %10517 = vmatpush3.msra.mxu1 %v8576_v42  ;;  %10518 = vmatprep.mubr.msk.f32.mxu1 %vm11403_vm0, %v11388_v0  ;;  %v10912_v42 = vpack.c.bf16 %v9809_v45, %v9808_v18 }
 0xefd   :  { %v8878_v48 = vpop.permute.xlu1 %8877  ;;  %10521 = vmatprep.subr.mxu1 %v11388_v0  ;;  %v8802_v12 = vpop.permute.xlu0 %8801 }
 0xeff   :  { %10519 = vmatmul.mubr.msk.f32.vlgmr.msra.gmra.mrb[38].mxu1 %vm6261_vm1, %v8417_v47  ;;  %v9810_v47 = vld [vmem:[%s13922_s13 + $0x10] sm:$0xff] }
 0xf00   :  { %10522 = vmatpush3.msra.mxu1 %v8652_v37  ;;  %10523 = vmatprep.mubr.msk.f32.mxu1 %vm11403_vm0, %v11388_v0  ;;  %v9121_v37 = vld [vmem:[%s13934_s25 + $0x38] sm:$0xff] }
 0xf01   :  { %v9030_v15 = vpop.permute.xlu1 %9029  ;;  %10526 = vmatprep.subr.mxu1 %v11388_v0  ;;  %v8954_v54 = vpop.permute.xlu0 %8953 }
 0xf02   :  { %10547 = vmatpush3.msra.mxu0 %v9030_v15  ;;  %v9812_v15 = vld [vmem:[%s13922_s13 + $0x20] sm:$0xff] }
 0xf03   :  { %10524 = vmatmul.mubr.msk.f32.vlgmr.msra.gmra.mrb[40].mxu1 %vm6261_vm1, %v8418_v49  ;;  %10549 = vmatmul.mubr.msk.f32.vlgmr.msra.gmra.mrb[46].mxu0 %vm6261_vm1, %v8423_v51  ;;  %v9122_v49 = vld [vmem:[%s13934_s25 + $0x40] sm:$0xff] }
 0xf04   :  { %10527 = vmatpush3.msra.mxu1 %v13696_v11  ;;  %10528 = vmatprep.mubr.msk.f32.mxu1 %vm11403_vm0, %v11388_v0 }
 0xf05   :  { %10531 = vmatprep.subr.mxu1 %v11388_v0  ;;  %10556 = vmatprep.subr.mxu0 %v11388_v0 }
 0xf06   :  { %10558 = vmatprep.mubr.msk.f32.mxu0 %vm11403_vm0, %v11388_v0 }
 0xf07   :  { %10529 = vmatmul.mubr.msk.f32.vlgmr.msra.gmra.mrb[42].mxu1 %vm6261_vm1, %v8419_v52  ;;  %v9813_v52 = vld [vmem:[%s13922_s13 + $0x28] sm:$0xff] }
 0xf08   :  { %10532 = vmatpush3.msra.mxu1 %v8802_v12  ;;  %10533 = vmatprep.mubr.msk.f32.mxu1 %vm11403_vm0, %v11388_v0  ;;  %v10918_v12 = vpack.c.bf16 %v9813_v52, %v9812_v15 }
 0xf09   :  { %10536 = vmatprep.subr.mxu1 %v11388_v0 }
 0xf0b   :  { %10534 = vmatmul.mubr.msk.f32.vlgmr.msra.gmra.mrb[44].mxu1 %vm6261_vm1, %v8420_v24  ;;  %v9815_v24 = vld [vmem:[%s13922_s13 + $0x38] sm:$0xff] }
 0xf0c   :  { %10537 = vmatpush3.msra.mxu1 %v8878_v48  ;;  %10538 = vmatprep.mubr.msk.f32.mxu1 %vm11403_vm0, %v11388_v0  ;;  %v9811_v48 = vld [vmem:[%s13922_s13 + $0x18] sm:$0xff] }
 0xf0d   :  { %10541 = vmatprep.subr.mxu1 %v11388_v0  ;;  %v10915_v51 = vpack.c.bf16 %v9811_v48, %v9810_v47 }
 0xf0f   :  { %10539 = vmatmul.mubr.msk.f32.vlgmr.msra.gmra.mrb[46].mxu1 %vm6261_vm1, %v8421_v53 }
 0xf10   :  { %10542 = vmatpush3.msra.mxu1 %v8954_v54  ;;  %10543 = vmatprep.mubr.msk.f32.mxu1 %vm11403_vm0, %v11388_v0  ;;  %v9816_v54 = vld [vmem:[%s13922_s13 + $0x40] sm:$0xff] }
 0xf11   :  { %10551 = vmatprep.subr.mxu1 %v11388_v0 }
 0xf13   :  { %10544 = vmatmul.mubr.msk.f32.vlgmr.msra.gmra.mrb[48].mxu1 %vm6261_vm1, %v8422_v21  ;;  %v9817_v21 = vld [vmem:[%s13922_s13 + $0x48] sm:$0xff] }
 0xf14   :  { %10553 = vmatprep.mubr.msk.f32.mxu1 %vm11403_vm0, %v11388_v0 }
 0xfca   :  { %v8498_v6 = vpop.f32.mrb[34].mxu1 }
 0xfcb   :  { %v10510_v16 = vpop.f32.mrb[35].mxu1 }
 0xfcc   :  { %v9818_v16 = vld [vmem:[%s13922_s13 + $0x50] sm:$0xff] }
 0xfce   :  { %v8571_v26 = vpop.f32.mrb[36].mxu1 }
 0xfcf   :  { %v8572_v4 = vadd.f32 %v8571_v26, %v8498_v6  ;;  %v10515_v29 = vpop.f32.mrb[37].mxu1  ;;  %v10924_v6 = vpack.c.bf16 %v9817_v21, %v9816_v54  ;;  %v9819_v26 = vld [vmem:[%s13922_s13 + $0x58] sm:$0xff] }
 0xfd0   :  { %v9820_v29 = vld [vmem:[%s13922_s13 + $0x60] sm:$0xff] }
 0xfd2   :  { %v8646_v60 = vpop.f32.mrb[38].mxu1 }
 0xfd3   :  { %v8650_v63 = vadd.f32 %v8646_v60, %v8572_v4  ;;  %v10520_v2 = vpop.f32.mrb[39].mxu1  ;;  %v10927_v4 = vpack.c.bf16 %v9819_v26, %v9818_v16  ;;  %v9821_v60 = vld [vmem:[%s13922_s13 + $0x68] sm:$0xff] }
 0xfd4   :  { %v9822_v2 = vld [vmem:[%s13922_s13 + $0x70] sm:$0xff] }
 0xfd6   :  { %v8722_v40 = vpop.f32.mrb[40].mxu1  ;;  %v9100_v55 = vpop.f32.mrb[46].mxu0 }
 0xfd7   :  { %v8726_v56 = vadd.f32 %v8722_v40, %v8650_v63  ;;  %v10525_v57 = vpop.f32.mrb[41].mxu1  ;;  %v10550_v58 = vpop.f32.mrb[47].mxu0  ;;  %v10930_v63 = vpack.c.bf16 %v9821_v60, %v9820_v29  ;;  %v9823_v40 = vld [vmem:[%s13922_s13 + $0x78] sm:$0xff] }
 0xfda   :  { %v8796_v61 = vpop.f32.mrb[42].mxu1 }
 0xfdb   :  { %v8800_v62 = vadd.f32 %v8796_v61, %v8726_v56  ;;  %v10530_v17 = vpop.f32.mrb[43].mxu1 }
 0xfde   :  { %v8872_v3 = vpop.f32.mrb[44].mxu1 }
 0xfdf   :  { %v8876_v9 = vadd.f32 %v8872_v3, %v8800_v62  ;;  %v10535_v10 = vpop.f32.mrb[45].mxu1 }
 0xfe2   :  { %v8948_v13 = vpop.f32.mrb[46].mxu1 }
 0xfe3   :  { %v8952_v14 = vadd.f32 %v8948_v13, %v8876_v9  ;;  %v10540_v19 = vpop.f32.mrb[47].mxu1 }
 0xfe6   :  { %v9024_v22 = vpop.f32.mrb[48].mxu1 }
 0xfe7   :  { %v9028_v25 = vadd.f32 %v9024_v22, %v8952_v14  ;;  %v10545_v27 = vpop.f32.mrb[49].mxu1 }
 0xfe9   :  { %v9104_v31 = vadd.f32 %v9100_v55, %v9028_v25  ;;  %v10933_v55 = vpack.c.bf16 %v9823_v40, %v9822_v2 }
 0xfeb   :  { %v9105_v34 = vadd.f32 %v9104_v31, %v8424_v30 }
 0xfed   :  { %v9106_v38 = vmax.f32 %v9105_v34, 0.0 }
 0xfef   :  { %v9113_v39 = vmul.f32 %v13778_v35, %v9106_v38 }
 0xff1   :  { %9124 = vrot.lane.b32.xlu1 %v9113_v39, %s11406_s10  ;;  %9126 = vrot.lane.b32.xlu0 %v9113_v39, %s11411_s2 }
 0xff5   :  { %9350 = vrot.lane.b32.xlu1 %v9113_v39, %s11390_s11  ;;  %9274 = vrot.lane.b32.xlu0 %v9113_v39, %s11412_s18 }
 0xff9   :  { %9576 = vrot.lane.b32.xlu1 %v9113_v39, %s11413_s17  ;;  %9500 = vrot.lane.b32.xlu0 %v9113_v39, %s11391_s20 }
 0xffd   :  { %9728 = vrot.lane.b32.xlu1 %v9113_v39, %s11407_s22  ;;  %9652 = vrot.lane.b32.xlu0 %v9113_v39, %s11414_s1 }
0x1063   :  { %v9125_v46 = vpop.permute.xlu1 %9124  ;;  %v9127_v8 = vpop.permute.xlu0 %9126 }
0x1064   :  { %10552 = vmatpush3.msra.mxu1 %v9127_v8  ;;  %10557 = vmatpush3.msra.mxu0 %v9125_v46  ;;  %v9123_v46 = vld [vmem:[#allocation18] sm:$0xff] }
0x1065   :  { %10554 = vmatmul.mubr.msk.f32.vlgmr.msra.gmra.mrb[50].mxu1 %vm6261_vm1, %v9115_v43  ;;  %10559 = vmatmul.mubr.msk.f32.vlgmr.msra.gmra.mrb[48].mxu0 %vm6261_vm1, %v9114_v44 }
0x1066   :  { %10566 = vmatprep.subr.mxu0 %v11388_v0  ;;  %10561 = vmatprep.subr.mxu1 %v11388_v0 }
0x1067   :  { %v9351_v41 = vpop.permute.xlu1 %9350  ;;  %v9275_v50 = vpop.permute.xlu0 %9274  ;;  %10563 = vmatprep.mubr.msk.f32.mxu1 %vm11403_vm0, %v11388_v0  ;;  %10568 = vmatprep.mubr.msk.f32.mxu0 %vm11403_vm0, %v11388_v0 }
0x1068   :  { %10562 = vmatpush3.msra.mxu1 %v9275_v50  ;;  %10567 = vmatpush3.msra.mxu0 %v9351_v41 }
0x1069   :  { %10564 = vmatmul.mubr.msk.f32.vlgmr.msra.gmra.mrb[52].mxu1 %vm6261_vm1, %v9116_v7  ;;  %10571 = vmatprep.subr.mxu1 %v11388_v0 }
0x106a   :  { %10572 = vmatpush3.msra.mxu1 %v9113_v39  ;;  %10569 = vmatmul.mubr.msk.f32.vlgmr.msra.gmra.mrb[50].mxu0 %vm6261_vm1, %v9117_v59 }
0x106b   :  { %10576 = vmatprep.subr.mxu0 %v11388_v0  ;;  %v9577_v5 = vpop.permute.xlu1 %9576  ;;  %v9501_v33 = vpop.permute.xlu0 %9500  ;;  %10573 = vmatprep.mubr.msk.f32.mxu1 %vm11403_vm0, %v11388_v0 }
0x106c   :  { %10577 = vmatpush3.msra.mxu0 %v9501_v33  ;;  %10581 = vmatprep.subr.mxu1 %v11388_v0 }
0x106d   :  { %10574 = vmatmul.mubr.msk.f32.vlgmr.msra.gmra.mrb[54].mxu1 %vm6261_vm1, %v9118_v1  ;;  %10578 = vmatprep.mubr.msk.f32.mxu0 %vm11403_vm0, %v11388_v0 }
0x106e   :  { %10582 = vmatpush3.msra.mxu1 %v9577_v5  ;;  %10579 = vmatmul.mubr.msk.f32.vlgmr.msra.gmra.mrb[52].mxu0 %vm6261_vm1, %v9119_v36 }
0x106f   :  { %v9729_v28 = vpop.permute.xlu1 %9728  ;;  %10586 = vmatprep.subr.mxu0 %v11388_v0  ;;  %v9653_v32 = vpop.permute.xlu0 %9652  ;;  %10583 = vmatprep.mubr.msk.f32.mxu1 %vm11403_vm0, %v11388_v0 }
0x1070   :  { %10587 = vmatpush3.msra.mxu0 %v9653_v32  ;;  %10591 = vmatprep.subr.mxu1 %v11388_v0 }
0x1071   :  { %10584 = vmatmul.mubr.msk.f32.vlgmr.msra.gmra.mrb[56].mxu1 %vm6261_vm1, %v9120_v23  ;;  %10588 = vmatprep.mubr.msk.f32.mxu0 %vm11403_vm0, %v11388_v0 }
0x1072   :  { %10592 = vmatpush3.msra.mxu1 %v9729_v28  ;;  %10589 = vmatmul.mubr.msk.f32.vlgmr.msra.gmra.mrb[54].mxu0 %vm6261_vm1, %v9121_v37 }
0x1073   :  { %10593 = vmatprep.mubr.msk.f32.mxu1 %vm11403_vm0, %v11388_v0  ;;  %10911 = vmatprep.subr.bf16.mxu0 %v11410_v20 }
0x1074   :  { %10913 = vmatpush3.bf16.msra.mxu0 %v10912_v42  ;;  %10628 = vmatprep.mubr.msk.f32.mxu0 %vm11403_vm0, %v11388_v0  ;;  %v9814_v0 = vld [vmem:[%s13922_s13 + $0x30] sm:$0xff] }
0x1075   :  { %10594 = vmatmul.mubr.msk.f32.vlgmr.msra.gmra.mrb[58].mxu1 %vm6261_vm1, %v9122_v49  ;;  %10914 = vmatprep.subr.bf16.mxu0 %v11410_v20  ;;  %v10921_v53 = vpack.c.bf16 %v9815_v24, %v9814_v0 }
0x1078   :  { %10916 = vmatpush3.bf16.msra.mxu0 %v10915_v51 }
0x1079   :  { %10917 = vmatprep.subr.bf16.mxu0 %v11410_v20 }
0x107c   :  { %10919 = vmatpush3.bf16.msra.mxu0 %v10918_v12 }
0x107d   :  { %10920 = vmatprep.subr.bf16.mxu0 %v11410_v20 }
0x1080   :  { %10922 = vmatpush3.bf16.msra.mxu0 %v10921_v53 }
0x1081   :  { %10923 = vmatprep.subr.bf16.mxu0 %v11410_v20 }
0x1084   :  { %10925 = vmatpush3.bf16.msra.mxu0 %v10924_v6 }
0x1085   :  { %10926 = vmatprep.subr.bf16.mxu0 %v11410_v20 }
0x1088   :  { %10928 = vmatpush3.bf16.msra.mxu0 %v10927_v4 }
0x1089   :  { %10929 = vmatprep.subr.bf16.mxu0 %v11410_v20 }
0x108c   :  { %10931 = vmatpush3.bf16.msra.mxu0 %v10930_v63 }
0x108d   :  { %10932 = vmatprep.subr.bf16.mxu0 %v11410_v20 }
0x1090   :  { %10934 = vmatpush3.bf16.msra.mxu0 %v10933_v55 }
0x1138   :  { %v9197_v56 = vpop.f32.mrb[50].mxu1  ;;  %v9270_v57 = vpop.f32.mrb[48].mxu0 }
0x1139   :  { %v9271_v58 = vadd.f32 %v9270_v57, %v9197_v56  ;;  %v10555_v61 = vpop.f32.mrb[51].mxu1  ;;  %v10560_v62 = vpop.f32.mrb[49].mxu0 }
0x113c   :  { %v9345_v17 = vpop.f32.mrb[52].mxu1 }
0x113d   :  { %v9349_v3 = vadd.f32 %v9345_v17, %v9271_v58  ;;  %v9421_v9 = vpop.f32.mrb[50].mxu0  ;;  %v10565_v10 = vpop.f32.mrb[53].mxu1 }
0x113e   :  { %v10570_v20 = vpop.f32.mrb[51].mxu0 }
0x113f   :  { %v9425_v13 = vadd.f32 %v9421_v9, %v9349_v3 }
0x1140   :  { %v9495_v14 = vpop.f32.mrb[54].mxu1 }
0x1141   :  { %v9499_v19 = vadd.f32 %v9495_v14, %v9425_v13  ;;  %v9571_v22 = vpop.f32.mrb[52].mxu0  ;;  %v10575_v25 = vpop.f32.mrb[55].mxu1 }
0x1142   :  { %v10580_v27 = vpop.f32.mrb[53].mxu0 }
0x1143   :  { %v9575_v30 = vadd.f32 %v9571_v22, %v9499_v19 }
0x1144   :  { %v9647_v31 = vpop.f32.mrb[56].mxu1 }
0x1145   :  { %v9651_v34 = vadd.f32 %v9647_v31, %v9575_v30  ;;  %v9723_v38 = vpop.f32.mrb[54].mxu0  ;;  %v10585_v39 = vpop.f32.mrb[57].mxu1 }
0x1146   :  { %v10590_v43 = vpop.f32.mrb[55].mxu0 }
0x1147   :  { %v9727_v44 = vadd.f32 %v9723_v38, %v9651_v34 }
0x1148   :  { %v9799_v8 = vpop.f32.mrb[58].mxu1 }
0x1149   :  { %v9803_v7 = vadd.f32 %v9799_v8, %v9727_v44  ;;  %v10595_v41 = vpop.f32.mrb[59].mxu1 }
0x114b   :  { %v9804_v50 = vadd.f32 %v9803_v7, %v9123_v46 }
0x114d   :  { %v9805_v59 = vadd.f32 %v9804_v50, %v13696_v11 }
0x114f   :  { %v9806_v1 = vmax.f32 %v9805_v59, 0.0 }
0x1151   :  { %v9807_v5 = vmul.f32 %v13778_v35, %v9806_v1 }
0x1153   :  { %10629 = vmatmul.mubr.f32.vlgmr.msra.gmra.mrb[56].mxu0 %v9807_v5 }
0x1226   :  { %v9890_v33 = vpop.f32.mrb[56].mxu0 }
0x1227   :  { %9894 = vst [vmem:[%s13937_s28] sm:$0xff] %v9890_v33  ;;  %v10630_v36 = vpop.f32.mrb[57].mxu0 }
0x1228   :  { %9899 = vsyncpa [#allocation3], 1 }
0x1229   :  { %9900 = vsyncpa [#allocation5], 1 }
0x122a   :  { %9901 = vsyncpa [#allocation8], 1 }
0x122b   :  { %9902 = vsyncpa [#allocation11], 1 }
0x122c   :  { %9903 = vsyncpa [#allocation14], 1 }
0x122d   :  { %9904 = vsyncpa [#allocation17], 1 }
0x122e   :  { %9905 = vsyncpa [#allocation20], 1 }

</bundles_post_ra>
